<compile_context>
chip_gen: v7x
topology: tpu7x:2x2x1
jax: 0.10.0
libtpu: 0.0.40
codegen_flags: <defaults>
</compile_context>

<pallas_src>
import jax
import jax.numpy as jnp
from jax.experimental import pallas as pl
from jax.experimental.pallas import tpu as pltpu

INPUT_DIM = 5
HIDDEN_DIM = 64
OUTPUT_DIM = 1

GP = 128   # padded gate / hidden width (one full lane tile per gate)
FCP = 128  # padded FC hidden width


def lstm_fc_kernel(x_ref,                      # (S*BP, Din)   time-major, batch-padded
                   wih1_ref, b1_ref,           # (Din, 4*GP), (1, 4*GP)
                   whh1_ref,                   # (GP, 4*GP)
                   wih2_ref, whh2_ref, b2_ref, # (GP, 4*GP), (GP, 4*GP), (1, 4*GP)
                   wfc1_ref, bfc1_ref,         # (GP, FCP), (1, FCP)
                   wfc2_ref, bfc2_ref,         # (1, FCP), (1, 1)
                   out_ref):                   # (BP, OUTPUT_DIM)
    BP = out_ref.shape[0]
    S = x_ref.shape[0] // BP
    gp = whh1_ref.shape[0]          # == GP
    g4 = whh1_ref.shape[1]          # == 4*GP

    # ---- hoisted layer-1 input projection (bias folded in) -----------------
    z1_all = (jnp.dot(x_ref[...], wih1_ref[...],
                      preferred_element_type=jnp.float32)
              + b1_ref[...])                                   # (S*BP, 4*GP)

    whh1 = whh1_ref[...]
    wih2 = wih2_ref[...]
    whh2 = whh2_ref[...]
    b2 = jnp.broadcast_to(b2_ref[...], (BP, g4))               # hoisted broadcast

    def gates(z):
        i = jax.nn.sigmoid(z[:, 0:gp])
        f = jax.nn.sigmoid(z[:, gp:2 * gp])
        g = jnp.tanh(z[:, 2 * gp:3 * gp])
        o = jax.nn.sigmoid(z[:, 3 * gp:4 * gp])
        return i, f, g, o

    h1 = jnp.zeros((BP, gp), jnp.float32)
    c1 = jnp.zeros((BP, gp), jnp.float32)
    h2 = jnp.zeros((BP, gp), jnp.float32)
    c2 = jnp.zeros((BP, gp), jnp.float32)

    # S is small and static -> fully unrolled with static (tile-aligned) slices.
    for t in range(S):
        # layer 1: one matmul on the serial path
        z1 = z1_all[t * BP:(t + 1) * BP, :] + jnp.dot(
            h1, whh1, preferred_element_type=jnp.float32)
        i1, f1, g1, o1 = gates(z1)
        c1 = f1 * c1 + i1 * g1
        h1 = o1 * jnp.tanh(c1)

        # layer 2: two dots (no concat copy on the serial chain)
        z2 = (jnp.dot(h1, wih2, preferred_element_type=jnp.float32)
              + jnp.dot(h2, whh2, preferred_element_type=jnp.float32)
              + b2)
        i2, f2, g2, o2 = gates(z2)
        c2 = f2 * c2 + i2 * g2
        h2 = o2 * jnp.tanh(c2)

    # ---- FC head: Linear(H, H//2) -> ReLU -> Linear(H//2, 1) ---------------
    hid = jnp.maximum(
        jnp.dot(h2, wfc1_ref[...], preferred_element_type=jnp.float32)
        + bfc1_ref[...], 0.0)                                  # (BP, FCP)
    # N=1 output: VPU multiply + lane reduce instead of an MXU matmul.
    out = jnp.sum(hid * wfc2_ref[...], axis=-1, keepdims=True) + bfc2_ref[...]
    out_ref[...] = out


# --------------------------- host-side packing ------------------------------

def _pad_gates(w, rows_out):
    """(K, 4H) gate-blocked matrix -> (rows_out, 4*GP), each gate in its own
    128-lane block (lanes H..GP-1 zero), rows K..rows_out-1 zero."""
    K, four_h = w.shape
    H = four_h // 4
    out = jnp.zeros((rows_out, 4 * GP), jnp.float32)
    for k in range(4):
        out = out.at[:K, k * GP:k * GP + H].set(w[:, k * H:(k + 1) * H])
    return out


def pack_params(params):
    """Convert math-layout params into the padded kernel layout."""
    wih1, whh1, b1, wih2, whh2, b2, wfc1, bfc1, wfc2, bfc2 = params
    H = whh1.shape[0]
    H2 = wfc1.shape[1]
    din = wih1.shape[0]

    wih1_p = _pad_gates(wih1, din)                       # (Din, 4*GP)
    b1_p = _pad_gates(b1, 1)                             # (1, 4*GP)
    whh1_p = _pad_gates(whh1, GP)                        # (GP, 4*GP)

    wih2_p = _pad_gates(wih2, GP)                        # (GP, 4*GP)
    whh2_p = _pad_gates(whh2, GP)                        # (GP, 4*GP)
    b2_p = _pad_gates(b2, 1)                             # (1, 4*GP)

    wfc1_p = jnp.zeros((GP, FCP), jnp.float32).at[:H, :H2].set(wfc1)
    bfc1_p = jnp.zeros((1, FCP), jnp.float32).at[:, :H2].set(bfc1)
    wfc2_p = jnp.zeros((1, FCP), jnp.float32).at[:, :H2].set(wfc2[:, 0])
    bfc2_p = bfc2.reshape(1, 1).astype(jnp.float32)

    return (wih1_p, b1_p, whh1_p, wih2_p, whh2_p, b2_p,
            wfc1_p, bfc1_p, wfc2_p, bfc2_p)


@jax.jit
def flight_price_predictor(x, params):
    """x: [batch, seq_len, input_dim] (PyTorch batch_first). Returns [batch, OUTPUT_DIM]."""
    B, S, D = x.shape
    BP = max(8, ((B + 7) // 8) * 8)                      # pad batch to sublane tile

    kp = pack_params(params)

    # time-major, batch padded to BP, flattened for the hoisted projection
    x_tm = jnp.zeros((S, BP, D), jnp.float32)
    x_tm = x_tm.at[:, :B, :].set(jnp.transpose(x.astype(jnp.float32), (1, 0, 2)))
    x2d = x_tm.reshape(S * BP, D)

    vmem = pl.BlockSpec(memory_space=pltpu.MemorySpace.VMEM)
    out = pl.pallas_call(
        lstm_fc_kernel,
        out_shape=jax.ShapeDtypeStruct((BP, OUTPUT_DIM), jnp.float32),
        in_specs=[vmem] * 11,
        out_specs=vmem,
    )(x2d, *kp)
    return out[:B]


# --------------------------- init + reference -------------------------------

def init_params(key, input_dim=INPUT_DIM, hidden_dim=HIDDEN_DIM,
                output_dim=OUTPUT_DIM):
    """Deterministic init mirroring PyTorch parameter shapes (then transposed)."""
    H = hidden_dim
    ks = jax.random.split(key, 12)
    bound = 1.0 / jnp.sqrt(H)

    def u(k, shape):
        return jax.random.uniform(k, shape, jnp.float32, -bound, bound)

    # Layer 1 (PyTorch: W_ih (4H, in), W_hh (4H, H), b_ih (4H,), b_hh (4H,))
    wih1 = u(ks[0], (4 * H, input_dim)).T          # (in, 4H)
    whh1 = u(ks[1], (4 * H, H)).T                  # (H, 4H)
    b1 = (u(ks[2], (4 * H,)) + u(ks[3], (4 * H,))).reshape(1, 4 * H)
    # Layer 2
    wih2 = u(ks[4], (4 * H, H)).T                  # (H, 4H)
    whh2 = u(ks[5], (4 * H, H)).T                  # (H, 4H)
    b2 = (u(ks[6], (4 * H,)) + u(ks[7], (4 * H,))).reshape(1, 4 * H)
    # FC head
    wfc1 = u(ks[8], (H // 2, H)).T                 # (H, H//2)
    bfc1 = u(ks[9], (H // 2,)).reshape(1, H // 2)
    wfc2 = u(ks[10], (output_dim, H // 2)).T       # (H//2, out)
    bfc2 = u(ks[11], (output_dim,)).reshape(1, output_dim)

    return (wih1, whh1, b1, wih2, whh2, b2, wfc1, bfc1, wfc2, bfc2)


def reference_forward(x, params):
    """Pure-JAX reference (same math as the PyTorch module) for validation."""
    wih1, whh1, b1, wih2, whh2, b2, wfc1, bfc1, wfc2, bfc2 = params
    H = whh1.shape[0]
    B, S, D = x.shape

    def cell(x_t, h, c, wih, whh, b):
        z = x_t @ wih + h @ whh + b
        i = jax.nn.sigmoid(z[:, 0:H])
        f = jax.nn.sigmoid(z[:, H:2 * H])
        g = jnp.tanh(z[:, 2 * H:3 * H])
        o = jax.nn.sigmoid(z[:, 3 * H:4 * H])
        c = f * c + i * g
        h = o * jnp.tanh(c)
        return h, c

    h1 = c1 = h2 = c2 = jnp.zeros((B, H), jnp.float32)
    for t in range(S):
        x_t = x[:, t, :]
        h1, c1 = cell(x_t, h1, c1, wih1, whh1, b1)
        h2, c2 = cell(h1, h2, c2, wih2, whh2, b2)
    hid = jnp.maximum(h2 @ wfc1 + bfc1, 0.0)
    return hid @ wfc2 + bfc2


if __name__ == "__main__":
    key = jax.random.PRNGKey(0)
    k_x, k_p = jax.random.split(key)

    batch, seq_len = 2, 8
    x = jax.random.normal(k_x, (batch, seq_len, INPUT_DIM), jnp.float32)
    params = init_params(k_p)

    out = flight_price_predictor(x, params)
    out = jax.block_until_ready(out)

    ref = reference_forward(x, params)
    assert out.shape == (batch, OUTPUT_DIM)
    assert jnp.allclose(out, ref, atol=1e-4, rtol=1e-4)

    print("KERNEL_OK")
</pallas_src>

<mosaic_0001>
module attributes {stable_mosaic.version = 11 : i64} {
  func.func @lstm_fc_kernel(%arg0: memref<64x5xf32, #tpu.memory_space<vmem>>, %arg1: memref<5x512xf32, #tpu.memory_space<vmem>>, %arg2: memref<1x512xf32, #tpu.memory_space<vmem>>, %arg3: memref<128x512xf32, #tpu.memory_space<vmem>>, %arg4: memref<128x512xf32, #tpu.memory_space<vmem>>, %arg5: memref<128x512xf32, #tpu.memory_space<vmem>>, %arg6: memref<1x512xf32, #tpu.memory_space<vmem>>, %arg7: memref<128x128xf32, #tpu.memory_space<vmem>>, %arg8: memref<1x128xf32, #tpu.memory_space<vmem>>, %arg9: memref<1x128xf32, #tpu.memory_space<vmem>>, %arg10: memref<1x1xf32, #tpu.memory_space<vmem>>, %arg11: memref<8x1xf32, #tpu.memory_space<vmem>>) attributes {dimension_semantics = [], scalar_prefetch = 0 : i64, scratch_operands = 0 : i64, tpu.core_type = #tpu.core_type<tc>} {
    %c0 = arith.constant 0 : index
    %c0_0 = arith.constant 0 : index
    %0 = vector.load %arg0[%c0, %c0_0] : memref<64x5xf32, #tpu.memory_space<vmem>>, vector<64x5xf32>
    %c0_1 = arith.constant 0 : index
    %c0_2 = arith.constant 0 : index
    %1 = vector.load %arg1[%c0_1, %c0_2] : memref<5x512xf32, #tpu.memory_space<vmem>>, vector<5x512xf32>
    %cst = arith.constant dense<0.000000e+00> : vector<64x512xf32>
    %2 = tpu.matmul %0, %1, %cst {dimension_numbers = #tpu.dot_dimension_numbers<[1], [0], [0], [1], [0, 0, 1, 1], [], []>} : vector<64x5xf32>, vector<5x512xf32>, vector<64x512xf32> -> vector<64x512xf32>
    %c0_3 = arith.constant 0 : index
    %c0_4 = arith.constant 0 : index
    %3 = vector.load %arg2[%c0_3, %c0_4] : memref<1x512xf32, #tpu.memory_space<vmem>>, vector<1x512xf32>
    %4 = vector.broadcast %3 : vector<1x512xf32> to vector<64x512xf32>
    %5 = arith.addf %2, %4 : vector<64x512xf32>
    %c0_5 = arith.constant 0 : index
    %c0_6 = arith.constant 0 : index
    %6 = vector.load %arg3[%c0_5, %c0_6] : memref<128x512xf32, #tpu.memory_space<vmem>>, vector<128x512xf32>
    %c0_7 = arith.constant 0 : index
    %c0_8 = arith.constant 0 : index
    %7 = vector.load %arg4[%c0_7, %c0_8] : memref<128x512xf32, #tpu.memory_space<vmem>>, vector<128x512xf32>
    %c0_9 = arith.constant 0 : index
    %c0_10 = arith.constant 0 : index
    %8 = vector.load %arg5[%c0_9, %c0_10] : memref<128x512xf32, #tpu.memory_space<vmem>>, vector<128x512xf32>
    %c0_11 = arith.constant 0 : index
    %c0_12 = arith.constant 0 : index
    %9 = vector.load %arg6[%c0_11, %c0_12] : memref<1x512xf32, #tpu.memory_space<vmem>>, vector<1x512xf32>
    %10 = vector.shape_cast %9 : vector<1x512xf32> to vector<1x512xf32>
    %11 = vector.broadcast %10 : vector<1x512xf32> to vector<8x512xf32>
    %cst_13 = arith.constant 0.000000e+00 : f32
    %12 = vector.broadcast %cst_13 : f32 to vector<8x128xf32>
    %cst_14 = arith.constant 0.000000e+00 : f32
    %13 = vector.broadcast %cst_14 : f32 to vector<8x128xf32>
    %cst_15 = arith.constant 0.000000e+00 : f32
    %14 = vector.broadcast %cst_15 : f32 to vector<8x128xf32>
    %cst_16 = arith.constant 0.000000e+00 : f32
    %15 = vector.broadcast %cst_16 : f32 to vector<8x128xf32>
    %16 = vector.extract_strided_slice %5 {offsets = [0, 0], sizes = [8, 512], strides = [1, 1]} : vector<64x512xf32> to vector<8x512xf32>
    %cst_17 = arith.constant dense<0.000000e+00> : vector<8x512xf32>
    %17 = tpu.matmul %12, %6, %cst_17 {dimension_numbers = #tpu.dot_dimension_numbers<[1], [0], [0], [1], [0, 0, 1, 1], [], []>} : vector<8x128xf32>, vector<128x512xf32>, vector<8x512xf32> -> vector<8x512xf32>
    %18 = arith.addf %16, %17 : vector<8x512xf32>
    %19 = vector.extract_strided_slice %18 {offsets = [0, 0], sizes = [8, 128], strides = [1, 1]} : vector<8x512xf32> to vector<8x128xf32>
    %20 = arith.negf %19 : vector<8x128xf32>
    %21 = math.exp %20 : vector<8x128xf32>
    %cst_18 = arith.constant 1.000000e+00 : f32
    %22 = vector.broadcast %cst_18 : f32 to vector<8x128xf32>
    %23 = arith.addf %22, %21 : vector<8x128xf32>
    %24 = arith.divf %22, %23 : vector<8x128xf32>
    %25 = vector.extract_strided_slice %18 {offsets = [0, 128], sizes = [8, 128], strides = [1, 1]} : vector<8x512xf32> to vector<8x128xf32>
    %26 = arith.negf %25 : vector<8x128xf32>
    %27 = math.exp %26 : vector<8x128xf32>
    %cst_19 = arith.constant 1.000000e+00 : f32
    %28 = vector.broadcast %cst_19 : f32 to vector<8x128xf32>
    %29 = arith.addf %28, %27 : vector<8x128xf32>
    %30 = arith.divf %28, %29 : vector<8x128xf32>
    %31 = vector.extract_strided_slice %18 {offsets = [0, 256], sizes = [8, 128], strides = [1, 1]} : vector<8x512xf32> to vector<8x128xf32>
    %32 = math.tanh %31 : vector<8x128xf32>
    %33 = vector.extract_strided_slice %18 {offsets = [0, 384], sizes = [8, 128], strides = [1, 1]} : vector<8x512xf32> to vector<8x128xf32>
    %34 = arith.negf %33 : vector<8x128xf32>
    %35 = math.exp %34 : vector<8x128xf32>
    %cst_20 = arith.constant 1.000000e+00 : f32
    %36 = vector.broadcast %cst_20 : f32 to vector<8x128xf32>
    %37 = arith.addf %36, %35 : vector<8x128xf32>
    %38 = arith.divf %36, %37 : vector<8x128xf32>
    %39 = arith.mulf %30, %13 : vector<8x128xf32>
    %40 = arith.mulf %24, %32 : vector<8x128xf32>
    %41 = arith.addf %39, %40 : vector<8x128xf32>
    %42 = math.tanh %41 : vector<8x128xf32>
    %43 = arith.mulf %38, %42 : vector<8x128xf32>
    %cst_21 = arith.constant dense<0.000000e+00> : vector<8x512xf32>
    %44 = tpu.matmul %43, %7, %cst_21 {dimension_numbers = #tpu.dot_dimension_numbers<[1], [0], [0], [1], [0, 0, 1, 1], [], []>} : vector<8x128xf32>, vector<128x512xf32>, vector<8x512xf32> -> vector<8x512xf32>
    %cst_22 = arith.constant dense<0.000000e+00> : vector<8x512xf32>
    %45 = tpu.matmul %14, %8, %cst_22 {dimension_numbers = #tpu.dot_dimension_numbers<[1], [0], [0], [1], [0, 0, 1, 1], [], []>} : vector<8x128xf32>, vector<128x512xf32>, vector<8x512xf32> -> vector<8x512xf32>
    %46 = arith.addf %44, %45 : vector<8x512xf32>
    %47 = arith.addf %46, %11 : vector<8x512xf32>
    %48 = vector.extract_strided_slice %47 {offsets = [0, 0], sizes = [8, 128], strides = [1, 1]} : vector<8x512xf32> to vector<8x128xf32>
    %49 = arith.negf %48 : vector<8x128xf32>
    %50 = math.exp %49 : vector<8x128xf32>
    %cst_23 = arith.constant 1.000000e+00 : f32
    %51 = vector.broadcast %cst_23 : f32 to vector<8x128xf32>
    %52 = arith.addf %51, %50 : vector<8x128xf32>
    %53 = arith.divf %51, %52 : vector<8x128xf32>
    %54 = vector.extract_strided_slice %47 {offsets = [0, 128], sizes = [8, 128], strides = [1, 1]} : vector<8x512xf32> to vector<8x128xf32>
    %55 = arith.negf %54 : vector<8x128xf32>
    %56 = math.exp %55 : vector<8x128xf32>
    %cst_24 = arith.constant 1.000000e+00 : f32
    %57 = vector.broadcast %cst_24 : f32 to vector<8x128xf32>
    %58 = arith.addf %57, %56 : vector<8x128xf32>
    %59 = arith.divf %57, %58 : vector<8x128xf32>
    %60 = vector.extract_strided_slice %47 {offsets = [0, 256], sizes = [8, 128], strides = [1, 1]} : vector<8x512xf32> to vector<8x128xf32>
    %61 = math.tanh %60 : vector<8x128xf32>
    %62 = vector.extract_strided_slice %47 {offsets = [0, 384], sizes = [8, 128], strides = [1, 1]} : vector<8x512xf32> to vector<8x128xf32>
    %63 = arith.negf %62 : vector<8x128xf32>
    %64 = math.exp %63 : vector<8x128xf32>
    %cst_25 = arith.constant 1.000000e+00 : f32
    %65 = vector.broadcast %cst_25 : f32 to vector<8x128xf32>
    %66 = arith.addf %65, %64 : vector<8x128xf32>
    %67 = arith.divf %65, %66 : vector<8x128xf32>
    %68 = arith.mulf %59, %15 : vector<8x128xf32>
    %69 = arith.mulf %53, %61 : vector<8x128xf32>
    %70 = arith.addf %68, %69 : vector<8x128xf32>
    %71 = math.tanh %70 : vector<8x128xf32>
    %72 = arith.mulf %67, %71 : vector<8x128xf32>
    %73 = vector.extract_strided_slice %5 {offsets = [8, 0], sizes = [8, 512], strides = [1, 1]} : vector<64x512xf32> to vector<8x512xf32>
    %cst_26 = arith.constant dense<0.000000e+00> : vector<8x512xf32>
    %74 = tpu.matmul %43, %6, %cst_26 {dimension_numbers = #tpu.dot_dimension_numbers<[1], [0], [0], [1], [0, 0, 1, 1], [], []>} : vector<8x128xf32>, vector<128x512xf32>, vector<8x512xf32> -> vector<8x512xf32>
    %75 = arith.addf %73, %74 : vector<8x512xf32>
    %76 = vector.extract_strided_slice %75 {offsets = [0, 0], sizes = [8, 128], strides = [1, 1]} : vector<8x512xf32> to vector<8x128xf32>
    %77 = arith.negf %76 : vector<8x128xf32>
    %78 = math.exp %77 : vector<8x128xf32>
    %cst_27 = arith.constant 1.000000e+00 : f32
    %79 = vector.broadcast %cst_27 : f32 to vector<8x128xf32>
    %80 = arith.addf %79, %78 : vector<8x128xf32>
    %81 = arith.divf %79, %80 : vector<8x128xf32>
    %82 = vector.extract_strided_slice %75 {offsets = [0, 128], sizes = [8, 128], strides = [1, 1]} : vector<8x512xf32> to vector<8x128xf32>
    %83 = arith.negf %82 : vector<8x128xf32>
    %84 = math.exp %83 : vector<8x128xf32>
    %cst_28 = arith.constant 1.000000e+00 : f32
    %85 = vector.broadcast %cst_28 : f32 to vector<8x128xf32>
    %86 = arith.addf %85, %84 : vector<8x128xf32>
    %87 = arith.divf %85, %86 : vector<8x128xf32>
    %88 = vector.extract_strided_slice %75 {offsets = [0, 256], sizes = [8, 128], strides = [1, 1]} : vector<8x512xf32> to vector<8x128xf32>
    %89 = math.tanh %88 : vector<8x128xf32>
    %90 = vector.extract_strided_slice %75 {offsets = [0, 384], sizes = [8, 128], strides = [1, 1]} : vector<8x512xf32> to vector<8x128xf32>
    %91 = arith.negf %90 : vector<8x128xf32>
    %92 = math.exp %91 : vector<8x128xf32>
    %cst_29 = arith.constant 1.000000e+00 : f32
    %93 = vector.broadcast %cst_29 : f32 to vector<8x128xf32>
    %94 = arith.addf %93, %92 : vector<8x128xf32>
    %95 = arith.divf %93, %94 : vector<8x128xf32>
    %96 = arith.mulf %87, %41 : vector<8x128xf32>
    %97 = arith.mulf %81, %89 : vector<8x128xf32>
    %98 = arith.addf %96, %97 : vector<8x128xf32>
    %99 = math.tanh %98 : vector<8x128xf32>
    %100 = arith.mulf %95, %99 : vector<8x128xf32>
    %cst_30 = arith.constant dense<0.000000e+00> : vector<8x512xf32>
    %101 = tpu.matmul %100, %7, %cst_30 {dimension_numbers = #tpu.dot_dimension_numbers<[1], [0], [0], [1], [0, 0, 1, 1], [], []>} : vector<8x128xf32>, vector<128x512xf32>, vector<8x512xf32> -> vector<8x512xf32>
    %cst_31 = arith.constant dense<0.000000e+00> : vector<8x512xf32>
    %102 = tpu.matmul %72, %8, %cst_31 {dimension_numbers = #tpu.dot_dimension_numbers<[1], [0], [0], [1], [0, 0, 1, 1], [], []>} : vector<8x128xf32>, vector<128x512xf32>, vector<8x512xf32> -> vector<8x512xf32>
    %103 = arith.addf %101, %102 : vector<8x512xf32>
    %104 = arith.addf %103, %11 : vector<8x512xf32>
    %105 = vector.extract_strided_slice %104 {offsets = [0, 0], sizes = [8, 128], strides = [1, 1]} : vector<8x512xf32> to vector<8x128xf32>
    %106 = arith.negf %105 : vector<8x128xf32>
    %107 = math.exp %106 : vector<8x128xf32>
    %cst_32 = arith.constant 1.000000e+00 : f32
    %108 = vector.broadcast %cst_32 : f32 to vector<8x128xf32>
    %109 = arith.addf %108, %107 : vector<8x128xf32>
    %110 = arith.divf %108, %109 : vector<8x128xf32>
    %111 = vector.extract_strided_slice %104 {offsets = [0, 128], sizes = [8, 128], strides = [1, 1]} : vector<8x512xf32> to vector<8x128xf32>
    %112 = arith.negf %111 : vector<8x128xf32>
    %113 = math.exp %112 : vector<8x128xf32>
    %cst_33 = arith.constant 1.000000e+00 : f32
    %114 = vector.broadcast %cst_33 : f32 to vector<8x128xf32>
    %115 = arith.addf %114, %113 : vector<8x128xf32>
    %116 = arith.divf %114, %115 : vector<8x128xf32>
    %117 = vector.extract_strided_slice %104 {offsets = [0, 256], sizes = [8, 128], strides = [1, 1]} : vector<8x512xf32> to vector<8x128xf32>
    %118 = math.tanh %117 : vector<8x128xf32>
    %119 = vector.extract_strided_slice %104 {offsets = [0, 384], sizes = [8, 128], strides = [1, 1]} : vector<8x512xf32> to vector<8x128xf32>
    %120 = arith.negf %119 : vector<8x128xf32>
    %121 = math.exp %120 : vector<8x128xf32>
    %cst_34 = arith.constant 1.000000e+00 : f32
    %122 = vector.broadcast %cst_34 : f32 to vector<8x128xf32>
    %123 = arith.addf %122, %121 : vector<8x128xf32>
    %124 = arith.divf %122, %123 : vector<8x128xf32>
    %125 = arith.mulf %116, %70 : vector<8x128xf32>
    %126 = arith.mulf %110, %118 : vector<8x128xf32>
    %127 = arith.addf %125, %126 : vector<8x128xf32>
    %128 = math.tanh %127 : vector<8x128xf32>
    %129 = arith.mulf %124, %128 : vector<8x128xf32>
    %130 = vector.extract_strided_slice %5 {offsets = [16, 0], sizes = [8, 512], strides = [1, 1]} : vector<64x512xf32> to vector<8x512xf32>
    %cst_35 = arith.constant dense<0.000000e+00> : vector<8x512xf32>
    %131 = tpu.matmul %100, %6, %cst_35 {dimension_numbers = #tpu.dot_dimension_numbers<[1], [0], [0], [1], [0, 0, 1, 1], [], []>} : vector<8x128xf32>, vector<128x512xf32>, vector<8x512xf32> -> vector<8x512xf32>
    %132 = arith.addf %130, %131 : vector<8x512xf32>
    %133 = vector.extract_strided_slice %132 {offsets = [0, 0], sizes = [8, 128], strides = [1, 1]} : vector<8x512xf32> to vector<8x128xf32>
    %134 = arith.negf %133 : vector<8x128xf32>
    %135 = math.exp %134 : vector<8x128xf32>
    %cst_36 = arith.constant 1.000000e+00 : f32
    %136 = vector.broadcast %cst_36 : f32 to vector<8x128xf32>
    %137 = arith.addf %136, %135 : vector<8x128xf32>
    %138 = arith.divf %136, %137 : vector<8x128xf32>
    %139 = vector.extract_strided_slice %132 {offsets = [0, 128], sizes = [8, 128], strides = [1, 1]} : vector<8x512xf32> to vector<8x128xf32>
    %140 = arith.negf %139 : vector<8x128xf32>
    %141 = math.exp %140 : vector<8x128xf32>
    %cst_37 = arith.constant 1.000000e+00 : f32
    %142 = vector.broadcast %cst_37 : f32 to vector<8x128xf32>
    %143 = arith.addf %142, %141 : vector<8x128xf32>
    %144 = arith.divf %142, %143 : vector<8x128xf32>
    %145 = vector.extract_strided_slice %132 {offsets = [0, 256], sizes = [8, 128], strides = [1, 1]} : vector<8x512xf32> to vector<8x128xf32>
    %146 = math.tanh %145 : vector<8x128xf32>
    %147 = vector.extract_strided_slice %132 {offsets = [0, 384], sizes = [8, 128], strides = [1, 1]} : vector<8x512xf32> to vector<8x128xf32>
    %148 = arith.negf %147 : vector<8x128xf32>
    %149 = math.exp %148 : vector<8x128xf32>
    %cst_38 = arith.constant 1.000000e+00 : f32
    %150 = vector.broadcast %cst_38 : f32 to vector<8x128xf32>
    %151 = arith.addf %150, %149 : vector<8x128xf32>
    %152 = arith.divf %150, %151 : vector<8x128xf32>
    %153 = arith.mulf %144, %98 : vector<8x128xf32>
    %154 = arith.mulf %138, %146 : vector<8x128xf32>
    %155 = arith.addf %153, %154 : vector<8x128xf32>
    %156 = math.tanh %155 : vector<8x128xf32>
    %157 = arith.mulf %152, %156 : vector<8x128xf32>
    %cst_39 = arith.constant dense<0.000000e+00> : vector<8x512xf32>
    %158 = tpu.matmul %157, %7, %cst_39 {dimension_numbers = #tpu.dot_dimension_numbers<[1], [0], [0], [1], [0, 0, 1, 1], [], []>} : vector<8x128xf32>, vector<128x512xf32>, vector<8x512xf32> -> vector<8x512xf32>
    %cst_40 = arith.constant dense<0.000000e+00> : vector<8x512xf32>
    %159 = tpu.matmul %129, %8, %cst_40 {dimension_numbers = #tpu.dot_dimension_numbers<[1], [0], [0], [1], [0, 0, 1, 1], [], []>} : vector<8x128xf32>, vector<128x512xf32>, vector<8x512xf32> -> vector<8x512xf32>
    %160 = arith.addf %158, %159 : vector<8x512xf32>
    %161 = arith.addf %160, %11 : vector<8x512xf32>
    %162 = vector.extract_strided_slice %161 {offsets = [0, 0], sizes = [8, 128], strides = [1, 1]} : vector<8x512xf32> to vector<8x128xf32>
    %163 = arith.negf %162 : vector<8x128xf32>
    %164 = math.exp %163 : vector<8x128xf32>
    %cst_41 = arith.constant 1.000000e+00 : f32
    %165 = vector.broadcast %cst_41 : f32 to vector<8x128xf32>
    %166 = arith.addf %165, %164 : vector<8x128xf32>
    %167 = arith.divf %165, %166 : vector<8x128xf32>
    %168 = vector.extract_strided_slice %161 {offsets = [0, 128], sizes = [8, 128], strides = [1, 1]} : vector<8x512xf32> to vector<8x128xf32>
    %169 = arith.negf %168 : vector<8x128xf32>
    %170 = math.exp %169 : vector<8x128xf32>
    %cst_42 = arith.constant 1.000000e+00 : f32
    %171 = vector.broadcast %cst_42 : f32 to vector<8x128xf32>
    %172 = arith.addf %171, %170 : vector<8x128xf32>
    %173 = arith.divf %171, %172 : vector<8x128xf32>
    %174 = vector.extract_strided_slice %161 {offsets = [0, 256], sizes = [8, 128], strides = [1, 1]} : vector<8x512xf32> to vector<8x128xf32>
    %175 = math.tanh %174 : vector<8x128xf32>
    %176 = vector.extract_strided_slice %161 {offsets = [0, 384], sizes = [8, 128], strides = [1, 1]} : vector<8x512xf32> to vector<8x128xf32>
    %177 = arith.negf %176 : vector<8x128xf32>
    %178 = math.exp %177 : vector<8x128xf32>
    %cst_43 = arith.constant 1.000000e+00 : f32
    %179 = vector.broadcast %cst_43 : f32 to vector<8x128xf32>
    %180 = arith.addf %179, %178 : vector<8x128xf32>
    %181 = arith.divf %179, %180 : vector<8x128xf32>
    %182 = arith.mulf %173, %127 : vector<8x128xf32>
    %183 = arith.mulf %167, %175 : vector<8x128xf32>
    %184 = arith.addf %182, %183 : vector<8x128xf32>
    %185 = math.tanh %184 : vector<8x128xf32>
    %186 = arith.mulf %181, %185 : vector<8x128xf32>
    %187 = vector.extract_strided_slice %5 {offsets = [24, 0], sizes = [8, 512], strides = [1, 1]} : vector<64x512xf32> to vector<8x512xf32>
    %cst_44 = arith.constant dense<0.000000e+00> : vector<8x512xf32>
    %188 = tpu.matmul %157, %6, %cst_44 {dimension_numbers = #tpu.dot_dimension_numbers<[1], [0], [0], [1], [0, 0, 1, 1], [], []>} : vector<8x128xf32>, vector<128x512xf32>, vector<8x512xf32> -> vector<8x512xf32>
    %189 = arith.addf %187, %188 : vector<8x512xf32>
    %190 = vector.extract_strided_slice %189 {offsets = [0, 0], sizes = [8, 128], strides = [1, 1]} : vector<8x512xf32> to vector<8x128xf32>
    %191 = arith.negf %190 : vector<8x128xf32>
    %192 = math.exp %191 : vector<8x128xf32>
    %cst_45 = arith.constant 1.000000e+00 : f32
    %193 = vector.broadcast %cst_45 : f32 to vector<8x128xf32>
    %194 = arith.addf %193, %192 : vector<8x128xf32>
    %195 = arith.divf %193, %194 : vector<8x128xf32>
    %196 = vector.extract_strided_slice %189 {offsets = [0, 128], sizes = [8, 128], strides = [1, 1]} : vector<8x512xf32> to vector<8x128xf32>
    %197 = arith.negf %196 : vector<8x128xf32>
    %198 = math.exp %197 : vector<8x128xf32>
    %cst_46 = arith.constant 1.000000e+00 : f32
    %199 = vector.broadcast %cst_46 : f32 to vector<8x128xf32>
    %200 = arith.addf %199, %198 : vector<8x128xf32>
    %201 = arith.divf %199, %200 : vector<8x128xf32>
    %202 = vector.extract_strided_slice %189 {offsets = [0, 256], sizes = [8, 128], strides = [1, 1]} : vector<8x512xf32> to vector<8x128xf32>
    %203 = math.tanh %202 : vector<8x128xf32>
    %204 = vector.extract_strided_slice %189 {offsets = [0, 384], sizes = [8, 128], strides = [1, 1]} : vector<8x512xf32> to vector<8x128xf32>
    %205 = arith.negf %204 : vector<8x128xf32>
    %206 = math.exp %205 : vector<8x128xf32>
    %cst_47 = arith.constant 1.000000e+00 : f32
    %207 = vector.broadcast %cst_47 : f32 to vector<8x128xf32>
    %208 = arith.addf %207, %206 : vector<8x128xf32>
    %209 = arith.divf %207, %208 : vector<8x128xf32>
    %210 = arith.mulf %201, %155 : vector<8x128xf32>
    %211 = arith.mulf %195, %203 : vector<8x128xf32>
    %212 = arith.addf %210, %211 : vector<8x128xf32>
    %213 = math.tanh %212 : vector<8x128xf32>
    %214 = arith.mulf %209, %213 : vector<8x128xf32>
    %cst_48 = arith.constant dense<0.000000e+00> : vector<8x512xf32>
    %215 = tpu.matmul %214, %7, %cst_48 {dimension_numbers = #tpu.dot_dimension_numbers<[1], [0], [0], [1], [0, 0, 1, 1], [], []>} : vector<8x128xf32>, vector<128x512xf32>, vector<8x512xf32> -> vector<8x512xf32>
    %cst_49 = arith.constant dense<0.000000e+00> : vector<8x512xf32>
    %216 = tpu.matmul %186, %8, %cst_49 {dimension_numbers = #tpu.dot_dimension_numbers<[1], [0], [0], [1], [0, 0, 1, 1], [], []>} : vector<8x128xf32>, vector<128x512xf32>, vector<8x512xf32> -> vector<8x512xf32>
    %217 = arith.addf %215, %216 : vector<8x512xf32>
    %218 = arith.addf %217, %11 : vector<8x512xf32>
    %219 = vector.extract_strided_slice %218 {offsets = [0, 0], sizes = [8, 128], strides = [1, 1]} : vector<8x512xf32> to vector<8x128xf32>
    %220 = arith.negf %219 : vector<8x128xf32>
    %221 = math.exp %220 : vector<8x128xf32>
    %cst_50 = arith.constant 1.000000e+00 : f32
    %222 = vector.broadcast %cst_50 : f32 to vector<8x128xf32>
    %223 = arith.addf %222, %221 : vector<8x128xf32>
    %224 = arith.divf %222, %223 : vector<8x128xf32>
    %225 = vector.extract_strided_slice %218 {offsets = [0, 128], sizes = [8, 128], strides = [1, 1]} : vector<8x512xf32> to vector<8x128xf32>
    %226 = arith.negf %225 : vector<8x128xf32>
    %227 = math.exp %226 : vector<8x128xf32>
    %cst_51 = arith.constant 1.000000e+00 : f32
    %228 = vector.broadcast %cst_51 : f32 to vector<8x128xf32>
    %229 = arith.addf %228, %227 : vector<8x128xf32>
    %230 = arith.divf %228, %229 : vector<8x128xf32>
    %231 = vector.extract_strided_slice %218 {offsets = [0, 256], sizes = [8, 128], strides = [1, 1]} : vector<8x512xf32> to vector<8x128xf32>
    %232 = math.tanh %231 : vector<8x128xf32>
    %233 = vector.extract_strided_slice %218 {offsets = [0, 384], sizes = [8, 128], strides = [1, 1]} : vector<8x512xf32> to vector<8x128xf32>
    %234 = arith.negf %233 : vector<8x128xf32>
    %235 = math.exp %234 : vector<8x128xf32>
    %cst_52 = arith.constant 1.000000e+00 : f32
    %236 = vector.broadcast %cst_52 : f32 to vector<8x128xf32>
    %237 = arith.addf %236, %235 : vector<8x128xf32>
    %238 = arith.divf %236, %237 : vector<8x128xf32>
    %239 = arith.mulf %230, %184 : vector<8x128xf32>
    %240 = arith.mulf %224, %232 : vector<8x128xf32>
    %241 = arith.addf %239, %240 : vector<8x128xf32>
    %242 = math.tanh %241 : vector<8x128xf32>
    %243 = arith.mulf %238, %242 : vector<8x128xf32>
    %244 = vector.extract_strided_slice %5 {offsets = [32, 0], sizes = [8, 512], strides = [1, 1]} : vector<64x512xf32> to vector<8x512xf32>
    %cst_53 = arith.constant dense<0.000000e+00> : vector<8x512xf32>
    %245 = tpu.matmul %214, %6, %cst_53 {dimension_numbers = #tpu.dot_dimension_numbers<[1], [0], [0], [1], [0, 0, 1, 1], [], []>} : vector<8x128xf32>, vector<128x512xf32>, vector<8x512xf32> -> vector<8x512xf32>
    %246 = arith.addf %244, %245 : vector<8x512xf32>
    %247 = vector.extract_strided_slice %246 {offsets = [0, 0], sizes = [8, 128], strides = [1, 1]} : vector<8x512xf32> to vector<8x128xf32>
    %248 = arith.negf %247 : vector<8x128xf32>
    %249 = math.exp %248 : vector<8x128xf32>
    %cst_54 = arith.constant 1.000000e+00 : f32
    %250 = vector.broadcast %cst_54 : f32 to vector<8x128xf32>
    %251 = arith.addf %250, %249 : vector<8x128xf32>
    %252 = arith.divf %250, %251 : vector<8x128xf32>
    %253 = vector.extract_strided_slice %246 {offsets = [0, 128], sizes = [8, 128], strides = [1, 1]} : vector<8x512xf32> to vector<8x128xf32>
    %254 = arith.negf %253 : vector<8x128xf32>
    %255 = math.exp %254 : vector<8x128xf32>
    %cst_55 = arith.constant 1.000000e+00 : f32
    %256 = vector.broadcast %cst_55 : f32 to vector<8x128xf32>
    %257 = arith.addf %256, %255 : vector<8x128xf32>
    %258 = arith.divf %256, %257 : vector<8x128xf32>
    %259 = vector.extract_strided_slice %246 {offsets = [0, 256], sizes = [8, 128], strides = [1, 1]} : vector<8x512xf32> to vector<8x128xf32>
    %260 = math.tanh %259 : vector<8x128xf32>
    %261 = vector.extract_strided_slice %246 {offsets = [0, 384], sizes = [8, 128], strides = [1, 1]} : vector<8x512xf32> to vector<8x128xf32>
    %262 = arith.negf %261 : vector<8x128xf32>
    %263 = math.exp %262 : vector<8x128xf32>
    %cst_56 = arith.constant 1.000000e+00 : f32
    %264 = vector.broadcast %cst_56 : f32 to vector<8x128xf32>
    %265 = arith.addf %264, %263 : vector<8x128xf32>
    %266 = arith.divf %264, %265 : vector<8x128xf32>
    %267 = arith.mulf %258, %212 : vector<8x128xf32>
    %268 = arith.mulf %252, %260 : vector<8x128xf32>
    %269 = arith.addf %267, %268 : vector<8x128xf32>
    %270 = math.tanh %269 : vector<8x128xf32>
    %271 = arith.mulf %266, %270 : vector<8x128xf32>
    %cst_57 = arith.constant dense<0.000000e+00> : vector<8x512xf32>
    %272 = tpu.matmul %271, %7, %cst_57 {dimension_numbers = #tpu.dot_dimension_numbers<[1], [0], [0], [1], [0, 0, 1, 1], [], []>} : vector<8x128xf32>, vector<128x512xf32>, vector<8x512xf32> -> vector<8x512xf32>
    %cst_58 = arith.constant dense<0.000000e+00> : vector<8x512xf32>
    %273 = tpu.matmul %243, %8, %cst_58 {dimension_numbers = #tpu.dot_dimension_numbers<[1], [0], [0], [1], [0, 0, 1, 1], [], []>} : vector<8x128xf32>, vector<128x512xf32>, vector<8x512xf32> -> vector<8x512xf32>
    %274 = arith.addf %272, %273 : vector<8x512xf32>
    %275 = arith.addf %274, %11 : vector<8x512xf32>
    %276 = vector.extract_strided_slice %275 {offsets = [0, 0], sizes = [8, 128], strides = [1, 1]} : vector<8x512xf32> to vector<8x128xf32>
    %277 = arith.negf %276 : vector<8x128xf32>
    %278 = math.exp %277 : vector<8x128xf32>
    %cst_59 = arith.constant 1.000000e+00 : f32
    %279 = vector.broadcast %cst_59 : f32 to vector<8x128xf32>
    %280 = arith.addf %279, %278 : vector<8x128xf32>
    %281 = arith.divf %279, %280 : vector<8x128xf32>
    %282 = vector.extract_strided_slice %275 {offsets = [0, 128], sizes = [8, 128], strides = [1, 1]} : vector<8x512xf32> to vector<8x128xf32>
    %283 = arith.negf %282 : vector<8x128xf32>
    %284 = math.exp %283 : vector<8x128xf32>
    %cst_60 = arith.constant 1.000000e+00 : f32
    %285 = vector.broadcast %cst_60 : f32 to vector<8x128xf32>
    %286 = arith.addf %285, %284 : vector<8x128xf32>
    %287 = arith.divf %285, %286 : vector<8x128xf32>
    %288 = vector.extract_strided_slice %275 {offsets = [0, 256], sizes = [8, 128], strides = [1, 1]} : vector<8x512xf32> to vector<8x128xf32>
    %289 = math.tanh %288 : vector<8x128xf32>
    %290 = vector.extract_strided_slice %275 {offsets = [0, 384], sizes = [8, 128], strides = [1, 1]} : vector<8x512xf32> to vector<8x128xf32>
    %291 = arith.negf %290 : vector<8x128xf32>
    %292 = math.exp %291 : vector<8x128xf32>
    %cst_61 = arith.constant 1.000000e+00 : f32
    %293 = vector.broadcast %cst_61 : f32 to vector<8x128xf32>
    %294 = arith.addf %293, %292 : vector<8x128xf32>
    %295 = arith.divf %293, %294 : vector<8x128xf32>
    %296 = arith.mulf %287, %241 : vector<8x128xf32>
    %297 = arith.mulf %281, %289 : vector<8x128xf32>
    %298 = arith.addf %296, %297 : vector<8x128xf32>
    %299 = math.tanh %298 : vector<8x128xf32>
    %300 = arith.mulf %295, %299 : vector<8x128xf32>
    %301 = vector.extract_strided_slice %5 {offsets = [40, 0], sizes = [8, 512], strides = [1, 1]} : vector<64x512xf32> to vector<8x512xf32>
    %cst_62 = arith.constant dense<0.000000e+00> : vector<8x512xf32>
    %302 = tpu.matmul %271, %6, %cst_62 {dimension_numbers = #tpu.dot_dimension_numbers<[1], [0], [0], [1], [0, 0, 1, 1], [], []>} : vector<8x128xf32>, vector<128x512xf32>, vector<8x512xf32> -> vector<8x512xf32>
    %303 = arith.addf %301, %302 : vector<8x512xf32>
    %304 = vector.extract_strided_slice %303 {offsets = [0, 0], sizes = [8, 128], strides = [1, 1]} : vector<8x512xf32> to vector<8x128xf32>
    %305 = arith.negf %304 : vector<8x128xf32>
    %306 = math.exp %305 : vector<8x128xf32>
    %cst_63 = arith.constant 1.000000e+00 : f32
    %307 = vector.broadcast %cst_63 : f32 to vector<8x128xf32>
    %308 = arith.addf %307, %306 : vector<8x128xf32>
    %309 = arith.divf %307, %308 : vector<8x128xf32>
    %310 = vector.extract_strided_slice %303 {offsets = [0, 128], sizes = [8, 128], strides = [1, 1]} : vector<8x512xf32> to vector<8x128xf32>
    %311 = arith.negf %310 : vector<8x128xf32>
    %312 = math.exp %311 : vector<8x128xf32>
    %cst_64 = arith.constant 1.000000e+00 : f32
    %313 = vector.broadcast %cst_64 : f32 to vector<8x128xf32>
    %314 = arith.addf %313, %312 : vector<8x128xf32>
    %315 = arith.divf %313, %314 : vector<8x128xf32>
    %316 = vector.extract_strided_slice %303 {offsets = [0, 256], sizes = [8, 128], strides = [1, 1]} : vector<8x512xf32> to vector<8x128xf32>
    %317 = math.tanh %316 : vector<8x128xf32>
    %318 = vector.extract_strided_slice %303 {offsets = [0, 384], sizes = [8, 128], strides = [1, 1]} : vector<8x512xf32> to vector<8x128xf32>
    %319 = arith.negf %318 : vector<8x128xf32>
    %320 = math.exp %319 : vector<8x128xf32>
    %cst_65 = arith.constant 1.000000e+00 : f32
    %321 = vector.broadcast %cst_65 : f32 to vector<8x128xf32>
    %322 = arith.addf %321, %320 : vector<8x128xf32>
    %323 = arith.divf %321, %322 : vector<8x128xf32>
    %324 = arith.mulf %315, %269 : vector<8x128xf32>
    %325 = arith.mulf %309, %317 : vector<8x128xf32>
    %326 = arith.addf %324, %325 : vector<8x128xf32>
    %327 = math.tanh %326 : vector<8x128xf32>
    %328 = arith.mulf %323, %327 : vector<8x128xf32>
    %cst_66 = arith.constant dense<0.000000e+00> : vector<8x512xf32>
    %329 = tpu.matmul %328, %7, %cst_66 {dimension_numbers = #tpu.dot_dimension_numbers<[1], [0], [0], [1], [0, 0, 1, 1], [], []>} : vector<8x128xf32>, vector<128x512xf32>, vector<8x512xf32> -> vector<8x512xf32>
    %cst_67 = arith.constant dense<0.000000e+00> : vector<8x512xf32>
    %330 = tpu.matmul %300, %8, %cst_67 {dimension_numbers = #tpu.dot_dimension_numbers<[1], [0], [0], [1], [0, 0, 1, 1], [], []>} : vector<8x128xf32>, vector<128x512xf32>, vector<8x512xf32> -> vector<8x512xf32>
    %331 = arith.addf %329, %330 : vector<8x512xf32>
    %332 = arith.addf %331, %11 : vector<8x512xf32>
    %333 = vector.extract_strided_slice %332 {offsets = [0, 0], sizes = [8, 128], strides = [1, 1]} : vector<8x512xf32> to vector<8x128xf32>
    %334 = arith.negf %333 : vector<8x128xf32>
    %335 = math.exp %334 : vector<8x128xf32>
    %cst_68 = arith.constant 1.000000e+00 : f32
    %336 = vector.broadcast %cst_68 : f32 to vector<8x128xf32>
    %337 = arith.addf %336, %335 : vector<8x128xf32>
    %338 = arith.divf %336, %337 : vector<8x128xf32>
    %339 = vector.extract_strided_slice %332 {offsets = [0, 128], sizes = [8, 128], strides = [1, 1]} : vector<8x512xf32> to vector<8x128xf32>
    %340 = arith.negf %339 : vector<8x128xf32>
    %341 = math.exp %340 : vector<8x128xf32>
    %cst_69 = arith.constant 1.000000e+00 : f32
    %342 = vector.broadcast %cst_69 : f32 to vector<8x128xf32>
    %343 = arith.addf %342, %341 : vector<8x128xf32>
    %344 = arith.divf %342, %343 : vector<8x128xf32>
    %345 = vector.extract_strided_slice %332 {offsets = [0, 256], sizes = [8, 128], strides = [1, 1]} : vector<8x512xf32> to vector<8x128xf32>
    %346 = math.tanh %345 : vector<8x128xf32>
    %347 = vector.extract_strided_slice %332 {offsets = [0, 384], sizes = [8, 128], strides = [1, 1]} : vector<8x512xf32> to vector<8x128xf32>
    %348 = arith.negf %347 : vector<8x128xf32>
    %349 = math.exp %348 : vector<8x128xf32>
    %cst_70 = arith.constant 1.000000e+00 : f32
    %350 = vector.broadcast %cst_70 : f32 to vector<8x128xf32>
    %351 = arith.addf %350, %349 : vector<8x128xf32>
    %352 = arith.divf %350, %351 : vector<8x128xf32>
    %353 = arith.mulf %344, %298 : vector<8x128xf32>
    %354 = arith.mulf %338, %346 : vector<8x128xf32>
    %355 = arith.addf %353, %354 : vector<8x128xf32>
    %356 = math.tanh %355 : vector<8x128xf32>
    %357 = arith.mulf %352, %356 : vector<8x128xf32>
    %358 = vector.extract_strided_slice %5 {offsets = [48, 0], sizes = [8, 512], strides = [1, 1]} : vector<64x512xf32> to vector<8x512xf32>
    %cst_71 = arith.constant dense<0.000000e+00> : vector<8x512xf32>
    %359 = tpu.matmul %328, %6, %cst_71 {dimension_numbers = #tpu.dot_dimension_numbers<[1], [0], [0], [1], [0, 0, 1, 1], [], []>} : vector<8x128xf32>, vector<128x512xf32>, vector<8x512xf32> -> vector<8x512xf32>
    %360 = arith.addf %358, %359 : vector<8x512xf32>
    %361 = vector.extract_strided_slice %360 {offsets = [0, 0], sizes = [8, 128], strides = [1, 1]} : vector<8x512xf32> to vector<8x128xf32>
    %362 = arith.negf %361 : vector<8x128xf32>
    %363 = math.exp %362 : vector<8x128xf32>
    %cst_72 = arith.constant 1.000000e+00 : f32
    %364 = vector.broadcast %cst_72 : f32 to vector<8x128xf32>
    %365 = arith.addf %364, %363 : vector<8x128xf32>
    %366 = arith.divf %364, %365 : vector<8x128xf32>
    %367 = vector.extract_strided_slice %360 {offsets = [0, 128], sizes = [8, 128], strides = [1, 1]} : vector<8x512xf32> to vector<8x128xf32>
    %368 = arith.negf %367 : vector<8x128xf32>
    %369 = math.exp %368 : vector<8x128xf32>
    %cst_73 = arith.constant 1.000000e+00 : f32
    %370 = vector.broadcast %cst_73 : f32 to vector<8x128xf32>
    %371 = arith.addf %370, %369 : vector<8x128xf32>
    %372 = arith.divf %370, %371 : vector<8x128xf32>
    %373 = vector.extract_strided_slice %360 {offsets = [0, 256], sizes = [8, 128], strides = [1, 1]} : vector<8x512xf32> to vector<8x128xf32>
    %374 = math.tanh %373 : vector<8x128xf32>
    %375 = vector.extract_strided_slice %360 {offsets = [0, 384], sizes = [8, 128], strides = [1, 1]} : vector<8x512xf32> to vector<8x128xf32>
    %376 = arith.negf %375 : vector<8x128xf32>
    %377 = math.exp %376 : vector<8x128xf32>
    %cst_74 = arith.constant 1.000000e+00 : f32
    %378 = vector.broadcast %cst_74 : f32 to vector<8x128xf32>
    %379 = arith.addf %378, %377 : vector<8x128xf32>
    %380 = arith.divf %378, %379 : vector<8x128xf32>
    %381 = arith.mulf %372, %326 : vector<8x128xf32>
    %382 = arith.mulf %366, %374 : vector<8x128xf32>
    %383 = arith.addf %381, %382 : vector<8x128xf32>
    %384 = math.tanh %383 : vector<8x128xf32>
    %385 = arith.mulf %380, %384 : vector<8x128xf32>
    %cst_75 = arith.constant dense<0.000000e+00> : vector<8x512xf32>
    %386 = tpu.matmul %385, %7, %cst_75 {dimension_numbers = #tpu.dot_dimension_numbers<[1], [0], [0], [1], [0, 0, 1, 1], [], []>} : vector<8x128xf32>, vector<128x512xf32>, vector<8x512xf32> -> vector<8x512xf32>
    %cst_76 = arith.constant dense<0.000000e+00> : vector<8x512xf32>
    %387 = tpu.matmul %357, %8, %cst_76 {dimension_numbers = #tpu.dot_dimension_numbers<[1], [0], [0], [1], [0, 0, 1, 1], [], []>} : vector<8x128xf32>, vector<128x512xf32>, vector<8x512xf32> -> vector<8x512xf32>
    %388 = arith.addf %386, %387 : vector<8x512xf32>
    %389 = arith.addf %388, %11 : vector<8x512xf32>
    %390 = vector.extract_strided_slice %389 {offsets = [0, 0], sizes = [8, 128], strides = [1, 1]} : vector<8x512xf32> to vector<8x128xf32>
    %391 = arith.negf %390 : vector<8x128xf32>
    %392 = math.exp %391 : vector<8x128xf32>
    %cst_77 = arith.constant 1.000000e+00 : f32
    %393 = vector.broadcast %cst_77 : f32 to vector<8x128xf32>
    %394 = arith.addf %393, %392 : vector<8x128xf32>
    %395 = arith.divf %393, %394 : vector<8x128xf32>
    %396 = vector.extract_strided_slice %389 {offsets = [0, 128], sizes = [8, 128], strides = [1, 1]} : vector<8x512xf32> to vector<8x128xf32>
    %397 = arith.negf %396 : vector<8x128xf32>
    %398 = math.exp %397 : vector<8x128xf32>
    %cst_78 = arith.constant 1.000000e+00 : f32
    %399 = vector.broadcast %cst_78 : f32 to vector<8x128xf32>
    %400 = arith.addf %399, %398 : vector<8x128xf32>
    %401 = arith.divf %399, %400 : vector<8x128xf32>
    %402 = vector.extract_strided_slice %389 {offsets = [0, 256], sizes = [8, 128], strides = [1, 1]} : vector<8x512xf32> to vector<8x128xf32>
    %403 = math.tanh %402 : vector<8x128xf32>
    %404 = vector.extract_strided_slice %389 {offsets = [0, 384], sizes = [8, 128], strides = [1, 1]} : vector<8x512xf32> to vector<8x128xf32>
    %405 = arith.negf %404 : vector<8x128xf32>
    %406 = math.exp %405 : vector<8x128xf32>
    %cst_79 = arith.constant 1.000000e+00 : f32
    %407 = vector.broadcast %cst_79 : f32 to vector<8x128xf32>
    %408 = arith.addf %407, %406 : vector<8x128xf32>
    %409 = arith.divf %407, %408 : vector<8x128xf32>
    %410 = arith.mulf %401, %355 : vector<8x128xf32>
    %411 = arith.mulf %395, %403 : vector<8x128xf32>
    %412 = arith.addf %410, %411 : vector<8x128xf32>
    %413 = math.tanh %412 : vector<8x128xf32>
    %414 = arith.mulf %409, %413 : vector<8x128xf32>
    %415 = vector.extract_strided_slice %5 {offsets = [56, 0], sizes = [8, 512], strides = [1, 1]} : vector<64x512xf32> to vector<8x512xf32>
    %cst_80 = arith.constant dense<0.000000e+00> : vector<8x512xf32>
    %416 = tpu.matmul %385, %6, %cst_80 {dimension_numbers = #tpu.dot_dimension_numbers<[1], [0], [0], [1], [0, 0, 1, 1], [], []>} : vector<8x128xf32>, vector<128x512xf32>, vector<8x512xf32> -> vector<8x512xf32>
    %417 = arith.addf %415, %416 : vector<8x512xf32>
    %418 = vector.extract_strided_slice %417 {offsets = [0, 0], sizes = [8, 128], strides = [1, 1]} : vector<8x512xf32> to vector<8x128xf32>
    %419 = arith.negf %418 : vector<8x128xf32>
    %420 = math.exp %419 : vector<8x128xf32>
    %cst_81 = arith.constant 1.000000e+00 : f32
    %421 = vector.broadcast %cst_81 : f32 to vector<8x128xf32>
    %422 = arith.addf %421, %420 : vector<8x128xf32>
    %423 = arith.divf %421, %422 : vector<8x128xf32>
    %424 = vector.extract_strided_slice %417 {offsets = [0, 128], sizes = [8, 128], strides = [1, 1]} : vector<8x512xf32> to vector<8x128xf32>
    %425 = arith.negf %424 : vector<8x128xf32>
    %426 = math.exp %425 : vector<8x128xf32>
    %cst_82 = arith.constant 1.000000e+00 : f32
    %427 = vector.broadcast %cst_82 : f32 to vector<8x128xf32>
    %428 = arith.addf %427, %426 : vector<8x128xf32>
    %429 = arith.divf %427, %428 : vector<8x128xf32>
    %430 = vector.extract_strided_slice %417 {offsets = [0, 256], sizes = [8, 128], strides = [1, 1]} : vector<8x512xf32> to vector<8x128xf32>
    %431 = math.tanh %430 : vector<8x128xf32>
    %432 = vector.extract_strided_slice %417 {offsets = [0, 384], sizes = [8, 128], strides = [1, 1]} : vector<8x512xf32> to vector<8x128xf32>
    %433 = arith.negf %432 : vector<8x128xf32>
    %434 = math.exp %433 : vector<8x128xf32>
    %cst_83 = arith.constant 1.000000e+00 : f32
    %435 = vector.broadcast %cst_83 : f32 to vector<8x128xf32>
    %436 = arith.addf %435, %434 : vector<8x128xf32>
    %437 = arith.divf %435, %436 : vector<8x128xf32>
    %438 = arith.mulf %429, %383 : vector<8x128xf32>
    %439 = arith.mulf %423, %431 : vector<8x128xf32>
    %440 = arith.addf %438, %439 : vector<8x128xf32>
    %441 = math.tanh %440 : vector<8x128xf32>
    %442 = arith.mulf %437, %441 : vector<8x128xf32>
    %cst_84 = arith.constant dense<0.000000e+00> : vector<8x512xf32>
    %443 = tpu.matmul %442, %7, %cst_84 {dimension_numbers = #tpu.dot_dimension_numbers<[1], [0], [0], [1], [0, 0, 1, 1], [], []>} : vector<8x128xf32>, vector<128x512xf32>, vector<8x512xf32> -> vector<8x512xf32>
    %cst_85 = arith.constant dense<0.000000e+00> : vector<8x512xf32>
    %444 = tpu.matmul %414, %8, %cst_85 {dimension_numbers = #tpu.dot_dimension_numbers<[1], [0], [0], [1], [0, 0, 1, 1], [], []>} : vector<8x128xf32>, vector<128x512xf32>, vector<8x512xf32> -> vector<8x512xf32>
    %445 = arith.addf %443, %444 : vector<8x512xf32>
    %446 = arith.addf %445, %11 : vector<8x512xf32>
    %447 = vector.extract_strided_slice %446 {offsets = [0, 0], sizes = [8, 128], strides = [1, 1]} : vector<8x512xf32> to vector<8x128xf32>
    %448 = arith.negf %447 : vector<8x128xf32>
    %449 = math.exp %448 : vector<8x128xf32>
    %cst_86 = arith.constant 1.000000e+00 : f32
    %450 = vector.broadcast %cst_86 : f32 to vector<8x128xf32>
    %451 = arith.addf %450, %449 : vector<8x128xf32>
    %452 = arith.divf %450, %451 : vector<8x128xf32>
    %453 = vector.extract_strided_slice %446 {offsets = [0, 128], sizes = [8, 128], strides = [1, 1]} : vector<8x512xf32> to vector<8x128xf32>
    %454 = arith.negf %453 : vector<8x128xf32>
    %455 = math.exp %454 : vector<8x128xf32>
    %cst_87 = arith.constant 1.000000e+00 : f32
    %456 = vector.broadcast %cst_87 : f32 to vector<8x128xf32>
    %457 = arith.addf %456, %455 : vector<8x128xf32>
    %458 = arith.divf %456, %457 : vector<8x128xf32>
    %459 = vector.extract_strided_slice %446 {offsets = [0, 256], sizes = [8, 128], strides = [1, 1]} : vector<8x512xf32> to vector<8x128xf32>
    %460 = math.tanh %459 : vector<8x128xf32>
    %461 = vector.extract_strided_slice %446 {offsets = [0, 384], sizes = [8, 128], strides = [1, 1]} : vector<8x512xf32> to vector<8x128xf32>
    %462 = arith.negf %461 : vector<8x128xf32>
    %463 = math.exp %462 : vector<8x128xf32>
    %cst_88 = arith.constant 1.000000e+00 : f32
    %464 = vector.broadcast %cst_88 : f32 to vector<8x128xf32>
    %465 = arith.addf %464, %463 : vector<8x128xf32>
    %466 = arith.divf %464, %465 : vector<8x128xf32>
    %467 = arith.mulf %458, %412 : vector<8x128xf32>
    %468 = arith.mulf %452, %460 : vector<8x128xf32>
    %469 = arith.addf %467, %468 : vector<8x128xf32>
    %470 = math.tanh %469 : vector<8x128xf32>
    %471 = arith.mulf %466, %470 : vector<8x128xf32>
    %c0_89 = arith.constant 0 : index
    %c0_90 = arith.constant 0 : index
    %472 = vector.load %arg7[%c0_89, %c0_90] : memref<128x128xf32, #tpu.memory_space<vmem>>, vector<128x128xf32>
    %cst_91 = arith.constant dense<0.000000e+00> : vector<8x128xf32>
    %473 = tpu.matmul %471, %472, %cst_91 {dimension_numbers = #tpu.dot_dimension_numbers<[1], [0], [0], [1], [0, 0, 1, 1], [], []>} : vector<8x128xf32>, vector<128x128xf32>, vector<8x128xf32> -> vector<8x128xf32>
    %c0_92 = arith.constant 0 : index
    %c0_93 = arith.constant 0 : index
    %474 = vector.load %arg8[%c0_92, %c0_93] : memref<1x128xf32, #tpu.memory_space<vmem>>, vector<1x128xf32>
    %475 = vector.broadcast %474 : vector<1x128xf32> to vector<8x128xf32>
    %476 = arith.addf %473, %475 : vector<8x128xf32>
    %cst_94 = arith.constant 0.000000e+00 : f32
    %477 = vector.broadcast %cst_94 : f32 to vector<8x128xf32>
    %478 = arith.maximumf %476, %477 : vector<8x128xf32>
    %c0_95 = arith.constant 0 : index
    %c0_96 = arith.constant 0 : index
    %479 = vector.load %arg9[%c0_95, %c0_96] : memref<1x128xf32, #tpu.memory_space<vmem>>, vector<1x128xf32>
    %480 = vector.broadcast %479 : vector<1x128xf32> to vector<8x128xf32>
    %481 = arith.mulf %478, %480 : vector<8x128xf32>
    %cst_97 = arith.constant dense<0.000000e+00> : vector<8xf32>
    %482 = vector.multi_reduction <add>, %481, %cst_97 [1] : vector<8x128xf32> to vector<8xf32>
    %483 = vector.shape_cast %482 : vector<8xf32> to vector<8x1xf32>
    %c0_98 = arith.constant 0 : index
    %c0_99 = arith.constant 0 : index
    %484 = vector.load %arg10[%c0_98, %c0_99] : memref<1x1xf32, #tpu.memory_space<vmem>>, vector<1x1xf32>
    %485 = vector.broadcast %484 : vector<1x1xf32> to vector<8x1xf32>
    %486 = arith.addf %483, %485 : vector<8x1xf32>
    %c0_100 = arith.constant 0 : index
    %c0_101 = arith.constant 0 : index
    %487 = vector.load %arg11[%c0_100, %c0_101] : memref<8x1xf32, #tpu.memory_space<vmem>>, vector<8x1xf32>
    tpu.vector_store %arg11[%c0_100, %c0_101], %486 {strides = array<i32>} : memref<8x1xf32, #tpu.memory_space<vmem>>, vector<8x1xf32>,
    return
  }
}

</mosaic_0001>

<bundles_post_ra>
// kernel: flight_price_predictor.1
= control target key start
LH: loop header
LB: loop body
LE: loop exit
PB: predicated region body
PF: predicated region fallthrough
CT: control target
= control target key end

     0   :  { %vm99_vm0 = vcmask 1044480   ;;  %vm74_vm1 = vcmask 39936   ;;  %v8524_v3 = vmov 0.0   ;;  %vm6566_vm2 = vmmov 0   ;;  %s8512_s1 = inlined_call_operand.vmem [shape: f32[5,512], index: 1, kind: input, shape index: {}]   ;;  %s8513_s0 = inlined_call_operand.vmem [shape: f32[64,5], index: 0, kind: input, shape index: {}]   ;;  %s8514_s3 = inlined_call_operand.vmem [shape: f32[128,512], index: 3, kind: input, shape index: {}]   ;;  %s8515_s5 = inlined_call_operand.vmem [shape: f32[128,512], index: 5, kind: input, shape index: {}]   ;;  %s8516_s4 = inlined_call_operand.vmem [shape: f32[128,512], index: 4, kind: input, shape index: {}]   ;;  %s8517_s2 = inlined_call_operand.vmem [shape: f32[1,512], index: 2, kind: input, shape index: {}]   ;;  %s8518_s6 = inlined_call_operand.vmem [shape: f32[1,512], index: 6, kind: input, shape index: {}]   ;;  %s8519_s7 = inlined_call_operand.vmem [shape: f32[128,128], index: 7, kind: input, shape index: {}]   ;;  %s8520_s10 = inlined_call_operand.<no memory space> [shape: f32[1,1], index: 10, kind: input, shape index: {}]   ;;  %s8521_s8 = inlined_call_operand.vmem [shape: f32[1,128], index: 8, kind: input, shape index: {}]   ;;  %s8522_s9 = inlined_call_operand.vmem [shape: f32[1,128], index: 9, kind: input, shape index: {}]   ;;  %s8523_s11 = inlined_call_operand.vmem [shape: f32[8,1], index: 11, kind: output, shape index: {}]  }
   0x1   :  { %v49_v0 = vld [vmem:[%s8512_s1 + $0x8] sm:$0x1f]  ;;  %v51_v1 = vld [vmem:[%s8512_s1 + $0x18] sm:$0x1f]  ;;  %v48_v2 = vld [vmem:[%s8512_s1] sm:$0x1f]  ;;  %176 = vmatprep.mubr.f32.mxu0 %v8524_v3  ;;  %289 = vmatprep.mubr.f32.mxu1 %v8524_v3 }
   0x2   :  { %4526 = vmatprep.subr.msk.mxu0 %vm99_vm0, %v49_v0  ;;  %4536 = vmatprep.subr.msk.mxu1 %vm99_vm0, %v51_v1  ;;  %v50_v4 = vld [vmem:[%s8512_s1 + $0x10] sm:$0x1f]  ;;  %v40_v5 = vld [vmem:[%s8513_s0] sm:$0xff]  ;;  %v339_v6 = vld [vmem:[%s8514_s3 + $0x8] sm:$0xff]  ;;  %vm4520_vm3 = vcmask 7168  }
   0x3   :  { %4527 = vmatpush1.msk.msra.mxu0 %vm99_vm0, %v48_v2  ;;  %4537 = vmatpush1.msk.msra.mxu1 %vm99_vm0, %v50_v4  ;;  %v343_v7 = vld [vmem:[%s8514_s3 + $0x28] sm:$0xff]  ;;  %v341_v8 = vld [vmem:[%s8514_s3 + $0x18] sm:$0xff]  ;;  %v338_v12 = vld [vmem:[%s8514_s3] sm:$0xff] }
   0x4   :  { %v345_v9 = vld [vmem:[%s8514_s3 + $0x38] sm:$0xff]  ;;  %4528 = vmatmul.mubr.msk.f32.vlgmr.msra.gmra.mrb[0].mxu0 %vm74_vm1, %v40_v5  ;;  %4538 = vmatmul.mubr.msk.f32.vlgmr.msra.gmra.mrb[0].mxu1 %vm74_vm1, %v40_v5  ;;  %v6662_v10 = vpack.c.bf16 %v343_v7, %v339_v6  ;;  %v342_v13 = vld [vmem:[%s8514_s3 + $0x20] sm:$0xff]  ;;  %v340_v14 = vld [vmem:[%s8514_s3 + $0x10] sm:$0xff] }
   0x5   :  { %v6664_v11 = vpack.c.bf16 %v345_v9, %v341_v8  ;;  %v6675_v15 = vpack.c.bf16 %v342_v13, %v338_v12  ;;  %v344_v16 = vld [vmem:[%s8514_s3 + $0x30] sm:$0xff]  ;;  %182 = vmatprep.mubr.f32.mxu0 %v8524_v3  ;;  %295 = vmatprep.mubr.f32.mxu1 %v8524_v3  ;;  %v41_v17 = vld [vmem:[%s8513_s0 + $0x8] sm:$0xff]  ;;  %v349_v21 = vld [vmem:[%s8514_s3 + $0x58] sm:$0xff] }
   0x6   :  { %8727 = vst [vmem:[#allocation3_spill] sm:$0xff] %v6662_v10  ;;  %v347_v18 = vld [vmem:[%s8514_s3 + $0x48] sm:$0xff]  ;;  %4650 = vmatprep.subr.bf16.mxu0 %v6662_v10  ;;  %v6690_v19 = vpack.c.bf16 %v344_v16, %v340_v14  ;;  %v353_v22 = vld [vmem:[%s8514_s3 + $0x78] sm:$0xff]  ;;  %v346_v25 = vld [vmem:[%s8514_s3 + $0x40] sm:$0xff] }
   0x7   :  { %8728 = vst [vmem:[#allocation4_spill] sm:$0xff] %v6664_v11  ;;  %4682 = vmatprep.subr.bf16.mxu1 %v6664_v11  ;;  %v351_v20 = vld [vmem:[%s8514_s3 + $0x68] sm:$0xff]  ;;  %4652 = vmatpush1.bf16.msra.mxu0 %v6675_v15  ;;  %v6704_v24 = vpack.c.bf16 %v353_v22, %v349_v21  ;;  %v350_v26 = vld [vmem:[%s8514_s3 + $0x60] sm:$0xff]  ;;  %v348_v27 = vld [vmem:[%s8514_s3 + $0x50] sm:$0xff] }
   0x8   :  { %v6702_v23 = vpack.c.bf16 %v351_v20, %v347_v18  ;;  %4684 = vmatpush1.bf16.msra.mxu1 %v6690_v19  ;;  %4529 = vmatmul.mubr.msk.f32.gmra.mrb[2].mxu0 %vm74_vm1, %v41_v17  ;;  %v6717_v28 = vpack.c.bf16 %v350_v26, %v346_v25  ;;  %v352_v29 = vld [vmem:[%s8514_s3 + $0x70] sm:$0xff]  ;;  %v355_v31 = vld [vmem:[%s8514_s3 + $0x88] sm:$0xff]  ;;  %v357_v34 = vld [vmem:[%s8514_s3 + $0x98] sm:$0xff] }
   0x9   :  { %v42_v30 = vld [vmem:[%s8513_s0 + $0x10] sm:$0xff]  ;;  %4539 = vmatmul.mubr.msk.f32.gmra.mrb[2].mxu1 %vm74_vm1, %v41_v17  ;;  %v6730_v32 = vpack.c.bf16 %v352_v29, %v348_v27  ;;  %v359_v33 = vld [vmem:[%s8514_s3 + $0xa8] sm:$0xff]  ;;  %v361_v35 = vld [vmem:[%s8514_s3 + $0xb8] sm:$0xff]  ;;  %4686 = vmatprep.subr.bf16.mxu1 %v6704_v24 }
   0xa   :  { %4654 = vmatprep.subr.bf16.mxu0 %v6702_v23  ;;  %188 = vmatprep.mubr.f32.mxu0 %v8524_v3  ;;  %v6743_v36 = vpack.c.bf16 %v359_v33, %v355_v31  ;;  %v6745_v37 = vpack.c.bf16 %v361_v35, %v357_v34  ;;  %v354_v38 = vld [vmem:[%s8514_s3 + $0x80] sm:$0xff]  ;;  %v356_v40 = vld [vmem:[%s8514_s3 + $0x90] sm:$0xff]  ;;  %v43_v43 = vld [vmem:[%s8513_s0 + $0x18] sm:$0xff] }
   0xb   :  { %v358_v39 = vld [vmem:[%s8514_s3 + $0xa0] sm:$0xff]  ;;  %4656 = vmatpush1.bf16.msra.mxu0 %v6717_v28  ;;  %301 = vmatprep.mubr.f32.mxu1 %v8524_v3  ;;  %v360_v42 = vld [vmem:[%s8514_s3 + $0xb0] sm:$0xff]  ;;  %v363_v44 = vld [vmem:[%s8514_s3 + $0xc8] sm:$0xff] }
   0xc   :  { %8729 = vst [vmem:[#allocation5_spill] sm:$0xff] %v6743_v36  ;;  %8730 = vst [vmem:[#allocation6_spill] sm:$0xff] %v6745_v37  ;;  %v6758_v41 = vpack.c.bf16 %v358_v39, %v354_v38  ;;  %4688 = vmatpush1.bf16.msra.mxu1 %v6730_v32  ;;  %4530 = vmatmul.mubr.msk.f32.gmra.mrb[4].mxu0 %vm74_vm1, %v42_v30  ;;  %v6771_v45 = vpack.c.bf16 %v360_v42, %v356_v40  ;;  %v367_v46 = vld [vmem:[%s8514_s3 + $0xe8] sm:$0xff]  ;;  %v365_v47 = vld [vmem:[%s8514_s3 + $0xd8] sm:$0xff] }
   0xd   :  { %v369_v48 = vld [vmem:[%s8514_s3 + $0xf8] sm:$0xff]  ;;  %4540 = vmatmul.mubr.msk.f32.gmra.mrb[4].mxu1 %vm74_vm1, %v42_v30  ;;  %4658 = vmatprep.subr.bf16.mxu0 %v6743_v36  ;;  %v6784_v49 = vpack.c.bf16 %v367_v46, %v363_v44  ;;  %v362_v50 = vld [vmem:[%s8514_s3 + $0xc0] sm:$0xff]  ;;  %v364_v52 = vld [vmem:[%s8514_s3 + $0xd0] sm:$0xff] }
   0xe   :  { %8731 = vst [vmem:[#allocation7_spill] sm:$0xff] %v6758_v41  ;;  %8732 = vst [vmem:[#allocation8_spill] sm:$0xff] %v6771_v45  ;;  %v366_v51 = vld [vmem:[%s8514_s3 + $0xe0] sm:$0xff]  ;;  %4690 = vmatprep.subr.bf16.mxu1 %v6745_v37  ;;  %194 = vmatprep.mubr.f32.mxu0 %v8524_v3  ;;  %v6797_v53 = vpack.c.bf16 %v369_v48, %v365_v47  ;;  %v368_v54 = vld [vmem:[%s8514_s3 + $0xf0] sm:$0xff] }
   0xf   :  { %8733 = vst [vmem:[#allocation9_spill] sm:$0xff] %v6784_v49  ;;  %v371_v55 = vld [vmem:[%s8514_s3 + $0x108] sm:$0xff]  ;;  %4660 = vmatpush1.bf16.msra.mxu0 %v6758_v41  ;;  %307 = vmatprep.mubr.f32.mxu1 %v8524_v3  ;;  %v6807_v56 = vpack.c.bf16 %v366_v51, %v362_v50  ;;  %v373_v58 = vld [vmem:[%s8514_s3 + $0x118] sm:$0xff]  ;;  %v6820_v60 = vpack.c.bf16 %v368_v54, %v364_v52  ;;  %v370_v61 = vld [vmem:[%s8514_s3 + $0x100] sm:$0xff] }
  0x10   :  { %8734 = vst [vmem:[#allocation10_spill] sm:$0xff] %v6797_v53  ;;  %v375_v57 = vld [vmem:[%s8514_s3 + $0x128] sm:$0xff]  ;;  %v377_v59 = vld [vmem:[%s8514_s3 + $0x138] sm:$0xff]  ;;  %4692 = vmatpush1.bf16.msra.mxu1 %v6771_v45  ;;  %4531 = vmatmul.mubr.msk.f32.gmra.mrb[6].mxu0 %vm74_vm1, %v43_v43  ;;  %v374_v62 = vld [vmem:[%s8514_s3 + $0x120] sm:$0xff] }
  0x11   :  { %8735 = vst [vmem:[#allocation11_spill] sm:$0xff] %v6807_v56  ;;  %8736 = vst [vmem:[#allocation12_spill] sm:$0xff] %v6820_v60  ;;  %4541 = vmatmul.mubr.msk.f32.gmra.mrb[6].mxu1 %vm74_vm1, %v43_v43  ;;  %4662 = vmatprep.subr.bf16.mxu0 %v6784_v49  ;;  %v44_v63 = vld [vmem:[%s8513_s0 + $0x20] sm:$0xff]  ;;  %v6833_v0 = vpack.c.bf16 %v375_v57, %v371_v55  ;;  %v372_v1 = vld [vmem:[%s8514_s3 + $0x110] sm:$0xff]  ;;  %v6843_v4 = vpack.c.bf16 %v377_v59, %v373_v58 }
  0x12   :  { %v376_v2 = vld [vmem:[%s8514_s3 + $0x130] sm:$0xff]  ;;  %4694 = vmatprep.subr.bf16.mxu1 %v6797_v53  ;;  %200 = vmatprep.mubr.f32.mxu0 %v8524_v3  ;;  %v379_v5 = vld [vmem:[%s8514_s3 + $0x148] sm:$0xff]  ;;  %v6853_v7 = vpack.c.bf16 %v374_v62, %v370_v61  ;;  %v381_v8 = vld [vmem:[%s8514_s3 + $0x158] sm:$0xff] }
  0x13   :  { %8737 = vst [vmem:[#allocation13_spill] sm:$0xff] %v6833_v0  ;;  %8738 = vst [vmem:[#allocation14_spill] sm:$0xff] %v6843_v4  ;;  %v383_v6 = vld [vmem:[%s8514_s3 + $0x168] sm:$0xff]  ;;  %4664 = vmatpush1.bf16.msra.mxu0 %v6807_v56  ;;  %313 = vmatprep.mubr.f32.mxu1 %v8524_v3  ;;  %v385_v9 = vld [vmem:[%s8514_s3 + $0x178] sm:$0xff]  ;;  %v6863_v12 = vpack.c.bf16 %v376_v2, %v372_v1 }
  0x14   :  { %8739 = vst [vmem:[#allocation15_spill] sm:$0xff] %v6853_v7  ;;  %4696 = vmatpush1.bf16.msra.mxu1 %v6820_v60  ;;  %4532 = vmatmul.mubr.msk.f32.gmra.mrb[8].mxu0 %vm74_vm1, %v44_v63  ;;  %v378_v13 = vld [vmem:[%s8514_s3 + $0x140] sm:$0xff]  ;;  %v45_v16 = vld [vmem:[%s8513_s0 + $0x28] sm:$0xff]  ;;  %v6876_v17 = vpack.c.bf16 %v383_v6, %v379_v5  ;;  %v380_v18 = vld [vmem:[%s8514_s3 + $0x150] sm:$0xff]  ;;  %v6886_v21 = vpack.c.bf16 %v385_v9, %v381_v8 }
  0x15   :  { %8740 = vst [vmem:[#allocation16_spill] sm:$0xff] %v6863_v12  ;;  %v382_v14 = vld [vmem:[%s8514_s3 + $0x160] sm:$0xff]  ;;  %4542 = vmatmul.mubr.msk.f32.gmra.mrb[8].mxu1 %vm74_vm1, %v44_v63  ;;  %4666 = vmatprep.subr.bf16.mxu0 %v6833_v0  ;;  %v384_v20 = vld [vmem:[%s8514_s3 + $0x170] sm:$0xff]  ;;  %v387_v22 = vld [vmem:[%s8514_s3 + $0x188] sm:$0xff] }
  0x16   :  { %8741 = vst [vmem:[#allocation17_spill] sm:$0xff] %v6876_v17  ;;  %4698 = vmatprep.subr.bf16.mxu1 %v6843_v4  ;;  %206 = vmatprep.mubr.f32.mxu0 %v8524_v3  ;;  %8742 = vst [vmem:[#allocation18_spill] sm:$0xff] %v6886_v21  ;;  %v391_v25 = vld [vmem:[%s8514_s3 + $0x1a8] sm:$0xff]  ;;  %v6896_v26 = vpack.c.bf16 %v382_v14, %v378_v13  ;;  %v389_v27 = vld [vmem:[%s8514_s3 + $0x198] sm:$0xff]  ;;  %v6906_v30 = vpack.c.bf16 %v384_v20, %v380_v18 }
  0x17   :  { %4668 = vmatpush1.bf16.msra.mxu0 %v6853_v7  ;;  %319 = vmatprep.mubr.f32.mxu1 %v8524_v3  ;;  %v393_v29 = vld [vmem:[%s8514_s3 + $0x1b8] sm:$0xff]  ;;  %v386_v31 = vld [vmem:[%s8514_s3 + $0x180] sm:$0xff]  ;;  %v46_v34 = vld [vmem:[%s8513_s0 + $0x30] sm:$0xff]  ;;  %v6919_v35 = vpack.c.bf16 %v391_v25, %v387_v22 }
  0x18   :  { %8743 = vst [vmem:[#allocation19_spill] sm:$0xff] %v6896_v26  ;;  %4700 = vmatpush1.bf16.msra.mxu1 %v6863_v12  ;;  %4533 = vmatmul.mubr.msk.f32.gmra.mrb[10].mxu0 %vm74_vm1, %v45_v16  ;;  %8744 = vst [vmem:[#allocation20_spill] sm:$0xff] %v6906_v30  ;;  %v390_v33 = vld [vmem:[%s8514_s3 + $0x1a0] sm:$0xff]  ;;  %v388_v38 = vld [vmem:[%s8514_s3 + $0x190] sm:$0xff]  ;;  %v6929_v40 = vpack.c.bf16 %v393_v29, %v389_v27 }
  0x19   :  { %4543 = vmatmul.mubr.msk.f32.gmra.mrb[10].mxu1 %vm74_vm1, %v45_v16  ;;  %4670 = vmatprep.subr.bf16.mxu0 %v6876_v17  ;;  %8745 = vst [vmem:[#allocation21_spill] sm:$0xff] %v6919_v35  ;;  %v392_v39 = vld [vmem:[%s8514_s3 + $0x1b0] sm:$0xff]  ;;  %v395_v42 = vld [vmem:[%s8514_s3 + $0x1c8] sm:$0xff]  ;;  %v6939_v44 = vpack.c.bf16 %v390_v33, %v386_v31  ;;  %v47_v46 = vld [vmem:[%s8513_s0 + $0x38] sm:$0xff] }
  0x1a   :  { %4702 = vmatprep.subr.bf16.mxu1 %v6886_v21  ;;  %212 = vmatprep.mubr.f32.mxu0 %v8524_v3  ;;  %8746 = vst [vmem:[#allocation22_spill] sm:$0xff] %v6929_v40  ;;  %v399_v43 = vld [vmem:[%s8514_s3 + $0x1e8] sm:$0xff]  ;;  %v397_v47 = vld [vmem:[%s8514_s3 + $0x1d8] sm:$0xff]  ;;  %v6952_v50 = vpack.c.bf16 %v392_v39, %v388_v38  ;;  %v394_v51 = vld [vmem:[%s8514_s3 + $0x1c0] sm:$0xff] }
  0x1b   :  { %4672 = vmatpush1.bf16.msra.mxu0 %v6896_v26  ;;  %325 = vmatprep.mubr.f32.mxu1 %v8524_v3  ;;  %8747 = vst [vmem:[#allocation23_spill] sm:$0xff] %v6939_v44  ;;  %v401_v48 = vld [vmem:[%s8514_s3 + $0x1f8] sm:$0xff]  ;;  %v398_v52 = vld [vmem:[%s8514_s3 + $0x1e0] sm:$0xff]  ;;  %v396_v54 = vld [vmem:[%s8514_s3 + $0x1d0] sm:$0xff]  ;;  %v6965_v55 = vpack.c.bf16 %v399_v43, %v395_v42 }
  0x1c   :  { %4704 = vmatpush1.bf16.msra.mxu1 %v6906_v30  ;;  %4534 = vmatmul.mubr.msk.f32.gmra.mrb[12].mxu0 %vm74_vm1, %v46_v34  ;;  %8748 = vst [vmem:[#allocation24_spill] sm:$0xff] %v6952_v50  ;;  %v400_v57 = vld [vmem:[%s8514_s3 + $0x1f0] sm:$0xff]  ;;  %v467_v58 = vld [vmem:[%s8515_s5 + $0x8] sm:$0xff]  ;;  %v6978_v61 = vpack.c.bf16 %v401_v48, %v397_v47  ;;  %v469_v62 = vld [vmem:[%s8515_s5 + $0x18] sm:$0xff]  ;;  %v6988_v1 = vpack.c.bf16 %v398_v52, %v394_v51 }
  0x1d   :  { %4544 = vmatmul.mubr.msk.f32.gmra.mrb[12].mxu1 %vm74_vm1, %v46_v34  ;;  %4674 = vmatprep.subr.bf16.mxu0 %v6919_v35  ;;  %8749 = vst [vmem:[#allocation25_spill] sm:$0xff] %v6965_v55  ;;  %v471_v59 = vld [vmem:[%s8515_s5 + $0x28] sm:$0xff]  ;;  %v473_v63 = vld [vmem:[%s8515_s5 + $0x38] sm:$0xff]  ;;  %v6992_v2 = vpack.c.bf16 %v400_v57, %v396_v54  ;;  %v466_v6 = vld [vmem:[%s8515_s5] sm:$0xff] }
  0x1e   :  { %4706 = vmatprep.subr.bf16.mxu1 %v6929_v40  ;;  %218 = vmatprep.mubr.f32.mxu0 %v8524_v3  ;;  %8750 = vst [vmem:[#allocation26_spill] sm:$0xff] %v6978_v61  ;;  %8751 = vst [vmem:[#allocation27_spill] sm:$0xff] %v6988_v1  ;;  %v6994_v5 = vpack.c.bf16 %v471_v59, %v467_v58  ;;  %v470_v8 = vld [vmem:[%s8515_s5 + $0x20] sm:$0xff]  ;;  %v468_v9 = vld [vmem:[%s8515_s5 + $0x10] sm:$0xff]  ;;  %v7007_v13 = vpack.c.bf16 %v473_v63, %v469_v62 }
  0x1f   :  { %4676 = vmatpush1.bf16.msra.mxu0 %v6939_v44  ;;  %331 = vmatprep.mubr.f32.mxu1 %v8524_v3  ;;  %8752 = vst [vmem:[#allocation28_spill] sm:$0xff] %v6992_v2  ;;  %v472_v14 = vld [vmem:[%s8515_s5 + $0x30] sm:$0xff]  ;;  %v475_v16 = vld [vmem:[%s8515_s5 + $0x48] sm:$0xff]  ;;  %v477_v20 = vld [vmem:[%s8515_s5 + $0x58] sm:$0xff]  ;;  %v7028_v25 = vpack.c.bf16 %v470_v8, %v466_v6 }
  0x20   :  { %4708 = vmatpush1.bf16.msra.mxu1 %v6952_v50  ;;  %4535 = vmatmul.mubr.msk.f32.gmra.mrb[14].mxu0 %vm74_vm1, %v47_v46  ;;  %8753 = vst [vmem:[#allocation29_spill] sm:$0xff] %v6994_v5  ;;  %8754 = vst [vmem:[#allocation30_spill] sm:$0xff] %v7007_v13  ;;  %v479_v18 = vld [vmem:[%s8515_s5 + $0x68] sm:$0xff]  ;;  %v481_v22 = vld [vmem:[%s8515_s5 + $0x78] sm:$0xff]  ;;  %v7032_v27 = vpack.c.bf16 %v472_v14, %v468_v9 }
  0x21   :  { %4545 = vmatmul.mubr.msk.f32.gmra.mrb[14].mxu1 %vm74_vm1, %v47_v46  ;;  %4678 = vmatprep.subr.bf16.mxu0 %v6965_v55  ;;  %8755 = vst [vmem:[#allocation31_spill] sm:$0xff] %v7028_v25  ;;  %v7034_v29 = vpack.c.bf16 %v479_v18, %v475_v16  ;;  %v474_v31 = vld [vmem:[%s8515_s5 + $0x40] sm:$0xff]  ;;  %v476_v34 = vld [vmem:[%s8515_s5 + $0x50] sm:$0xff]  ;;  %v7046_v38 = vpack.c.bf16 %v481_v22, %v477_v20  ;;  %v483_v42 = vld [vmem:[%s8515_s5 + $0x88] sm:$0xff] }
  0x22   :  { %4710 = vmatprep.subr.bf16.mxu1 %v6978_v61  ;;  %616 = vmatprep.mubr.f32.mxu0 %v8524_v3  ;;  %8756 = vst [vmem:[#allocation32_spill] sm:$0xff] %v7032_v27  ;;  %v478_v33 = vld [vmem:[%s8515_s5 + $0x60] sm:$0xff]  ;;  %v480_v39 = vld [vmem:[%s8515_s5 + $0x70] sm:$0xff]  ;;  %v487_v43 = vld [vmem:[%s8515_s5 + $0xa8] sm:$0xff] }
  0x23   :  { %4680 = vmatpush1.bf16.msra.mxu0 %v6988_v1  ;;  %687 = vmatprep.mubr.f32.mxu1 %v8524_v3  ;;  %8757 = vst [vmem:[#allocation33_spill] sm:$0xff] %v7034_v29  ;;  %8758 = vst [vmem:[#allocation34_spill] sm:$0xff] %v7046_v38  ;;  %v485_v46 = vld [vmem:[%s8515_s5 + $0x98] sm:$0xff]  ;;  %v7066_v48 = vpack.c.bf16 %v478_v33, %v474_v31  ;;  %v7070_v51 = vpack.c.bf16 %v480_v39, %v476_v34  ;;  %v482_v54 = vld [vmem:[%s8515_s5 + $0x80] sm:$0xff] }
  0x24   :  { %4712 = vmatpush1.bf16.msra.mxu1 %v6992_v2  ;;  %4714 = vmatprep.subr.bf16.mxu0 %v6994_v5  ;;  %v489_v47 = vld [vmem:[%s8515_s5 + $0xb8] sm:$0xff]  ;;  %v7072_v52 = vpack.c.bf16 %v487_v43, %v483_v42  ;;  %v486_v57 = vld [vmem:[%s8515_s5 + $0xa0] sm:$0xff]  ;;  %v484_v58 = vld [vmem:[%s8515_s5 + $0x90] sm:$0xff] }
  0x25   :  { %4746 = vmatprep.subr.bf16.mxu1 %v7007_v13  ;;  %8759 = vst [vmem:[#allocation35_spill] sm:$0xff] %v7066_v48  ;;  %8760 = vst [vmem:[#allocation36_spill] sm:$0xff] %v7070_v51  ;;  %v7084_v59 = vpack.c.bf16 %v489_v47, %v485_v46  ;;  %v488_v62 = vld [vmem:[%s8515_s5 + $0xb0] sm:$0xff]  ;;  %v491_v63 = vld [vmem:[%s8515_s5 + $0xc8] sm:$0xff]  ;;  %v7104_v14 = vpack.c.bf16 %v486_v57, %v482_v54 }
  0x26   :  { %617 = vmatmul.mubr.f32.vlgmr.msra.gmra.mrb[0].mxu0 %v8524_v3  ;;  %8761 = vst [vmem:[#allocation37_spill] sm:$0xff] %v7072_v52  ;;  %v495_v6 = vld [vmem:[%s8515_s5 + $0xe8] sm:$0xff]  ;;  %v493_v8 = vld [vmem:[%s8515_s5 + $0xd8] sm:$0xff]  ;;  %v7108_v16 = vpack.c.bf16 %v488_v62, %v484_v58  ;;  %v490_v20 = vld [vmem:[%s8515_s5 + $0xc0] sm:$0xff] }
  0x27   :  { %688 = vmatmul.mubr.f32.vlgmr.msra.gmra.mrb[0].mxu1 %v8524_v3  ;;  %4716 = vmatpush1.bf16.msra.mxu0 %v7028_v25  ;;  %8762 = vst [vmem:[#allocation38_spill] sm:$0xff] %v7084_v59  ;;  %v497_v9 = vld [vmem:[%s8515_s5 + $0xf8] sm:$0xff]  ;;  %8763 = vst [vmem:[#allocation39_spill] sm:$0xff] %v7104_v14  ;;  %v7110_v18 = vpack.c.bf16 %v495_v6, %v491_v63  ;;  %v494_v22 = vld [vmem:[%s8515_s5 + $0xe0] sm:$0xff] }
  0x28   :  { %4748 = vmatpush1.bf16.msra.mxu1 %v7032_v27  ;;  %4718 = vmatprep.subr.bf16.mxu0 %v7034_v29  ;;  %8764 = vst [vmem:[#allocation40_spill] sm:$0xff] %v7108_v16  ;;  %v492_v31 = vld [vmem:[%s8515_s5 + $0xd0] sm:$0xff]  ;;  %v7122_v33 = vpack.c.bf16 %v497_v9, %v493_v8  ;;  %v499_v39 = vld [vmem:[%s8515_s5 + $0x108] sm:$0xff]  ;;  %v501_v43 = vld [vmem:[%s8515_s5 + $0x118] sm:$0xff]  ;;  %v7140_v47 = vpack.c.bf16 %v494_v22, %v490_v20 }
  0x29   :  { %4750 = vmatprep.subr.bf16.mxu1 %v7046_v38  ;;  %786 = vmatprep.mubr.f32.mxu0 %v8524_v3  ;;  %8765 = vst [vmem:[#allocation41_spill] sm:$0xff] %v7110_v18  ;;  %v496_v34 = vld [vmem:[%s8515_s5 + $0xf0] sm:$0xff]  ;;  %v503_v42 = vld [vmem:[%s8515_s5 + $0x128] sm:$0xff]  ;;  %v505_v46 = vld [vmem:[%s8515_s5 + $0x138] sm:$0xff] }
  0x2a   :  { %857 = vmatprep.mubr.f32.mxu1 %v8524_v3  ;;  %8766 = vst [vmem:[#allocation42_spill] sm:$0xff] %v7122_v33  ;;  %8767 = vst [vmem:[#allocation43_spill] sm:$0xff] %v7140_v47  ;;  %v7144_v54 = vpack.c.bf16 %v496_v34, %v492_v31  ;;  %v7146_v57 = vpack.c.bf16 %v503_v42, %v499_v39  ;;  %v498_v58 = vld [vmem:[%s8515_s5 + $0x100] sm:$0xff]  ;;  %v7155_v63 = vpack.c.bf16 %v505_v46, %v501_v43  ;;  %v500_v6 = vld [vmem:[%s8515_s5 + $0x110] sm:$0xff] }
  0x2b   :  { %4720 = vmatpush1.bf16.msra.mxu0 %v7066_v48  ;;  %v502_v62 = vld [vmem:[%s8515_s5 + $0x120] sm:$0xff]  ;;  %v504_v8 = vld [vmem:[%s8515_s5 + $0x130] sm:$0xff]  ;;  %v507_v22 = vld [vmem:[%s8515_s5 + $0x148] sm:$0xff] }
  0x2c   :  { %4752 = vmatpush1.bf16.msra.mxu1 %v7070_v51  ;;  %4722 = vmatprep.subr.bf16.mxu0 %v7072_v52  ;;  %8768 = vst [vmem:[#allocation44_spill] sm:$0xff] %v7144_v54  ;;  %8769 = vst [vmem:[#allocation45_spill] sm:$0xff] %v7146_v57  ;;  %v7164_v9 = vpack.c.bf16 %v502_v62, %v498_v58  ;;  %v7168_v20 = vpack.c.bf16 %v504_v8, %v500_v6  ;;  %v511_v31 = vld [vmem:[%s8515_s5 + $0x168] sm:$0xff]  ;;  %v509_v34 = vld [vmem:[%s8515_s5 + $0x158] sm:$0xff] }
  0x2d   :  { %4754 = vmatprep.subr.bf16.mxu1 %v7084_v59  ;;  %8770 = vst [vmem:[#allocation46_spill] sm:$0xff] %v7155_v63  ;;  %v7182_v39 = vpack.c.bf16 %v511_v31, %v507_v22  ;;  %v513_v42 = vld [vmem:[%s8515_s5 + $0x178] sm:$0xff]  ;;  %v506_v43 = vld [vmem:[%s8515_s5 + $0x140] sm:$0xff]  ;;  %v508_v6 = vld [vmem:[%s8515_s5 + $0x150] sm:$0xff] }
  0x2e   :  { %8771 = vst [vmem:[#allocation47_spill] sm:$0xff] %v7164_v9  ;;  %8772 = vst [vmem:[#allocation48_spill] sm:$0xff] %v7168_v20  ;;  %v510_v46 = vld [vmem:[%s8515_s5 + $0x160] sm:$0xff]  ;;  %v7193_v58 = vpack.c.bf16 %v513_v42, %v509_v34  ;;  %v512_v8 = vld [vmem:[%s8515_s5 + $0x170] sm:$0xff] }
  0x2f   :  { %4724 = vmatpush1.bf16.msra.mxu0 %v7104_v14  ;;  %8773 = vst [vmem:[#allocation49_spill] sm:$0xff] %v7182_v39  ;;  %v7195_v62 = vpack.c.bf16 %v510_v46, %v506_v43  ;;  %v7204_v22 = vpack.c.bf16 %v512_v8, %v508_v6  ;;  %v515_v31 = vld [vmem:[%s8515_s5 + $0x188] sm:$0xff]  ;;  %v517_v42 = vld [vmem:[%s8515_s5 + $0x198] sm:$0xff]  ;;  %v514_v6 = vld [vmem:[%s8515_s5 + $0x180] sm:$0xff] }
  0x30   :  { %4756 = vmatpush1.bf16.msra.mxu1 %v7108_v16  ;;  %4726 = vmatprep.subr.bf16.mxu0 %v7110_v18  ;;  %8774 = vst [vmem:[#allocation50_spill] sm:$0xff] %v7193_v58  ;;  %v519_v34 = vld [vmem:[%s8515_s5 + $0x1a8] sm:$0xff]  ;;  %v521_v46 = vld [vmem:[%s8515_s5 + $0x1b8] sm:$0xff]  ;;  %v518_v8 = vld [vmem:[%s8515_s5 + $0x1a0] sm:$0xff] }
  0x31   :  { %4758 = vmatprep.subr.bf16.mxu1 %v7122_v33  ;;  %8775 = vst [vmem:[#allocation51_spill] sm:$0xff] %v7195_v62  ;;  %8776 = vst [vmem:[#allocation52_spill] sm:$0xff] %v7204_v22  ;;  %v7218_v43 = vpack.c.bf16 %v519_v34, %v515_v31  ;;  %v7229_v3 = vpack.c.bf16 %v521_v46, %v517_v42  ;;  %v516_v31 = vld [vmem:[%s8515_s5 + $0x190] sm:$0xff]  ;;  %v523_v42 = vld [vmem:[%s8515_s5 + $0x1c8] sm:$0xff] }
  0x32   :  { %v520_v34 = vld [vmem:[%s8515_s5 + $0x1b0] sm:$0xff]  ;;  %v527_v46 = vld [vmem:[%s8515_s5 + $0x1e8] sm:$0xff] }
  0x33   :  { %4728 = vmatpush1.bf16.msra.mxu0 %v7140_v47  ;;  %8777 = vst [vmem:[#allocation53_spill] sm:$0xff] %v7218_v43  ;;  %8778 = vst [vmem:[#allocation54_spill] sm:$0xff] %v7229_v3 }
  0x34   :  { %4760 = vmatpush1.bf16.msra.mxu1 %v7144_v54  ;;  %4730 = vmatprep.subr.bf16.mxu0 %v7146_v57 }
  0x35   :  { %4762 = vmatprep.subr.bf16.mxu1 %v7155_v63 }
  0x37   :  { %4732 = vmatpush1.bf16.msra.mxu0 %v7164_v9 }
  0x38   :  { %4764 = vmatpush1.bf16.msra.mxu1 %v7168_v20  ;;  %4734 = vmatprep.subr.bf16.mxu0 %v7182_v39 }
  0x39   :  { %4766 = vmatprep.subr.bf16.mxu1 %v7193_v58 }
  0x3b   :  { %4736 = vmatpush1.bf16.msra.mxu0 %v7195_v62  ;;  %v7231_v62 = vpack.c.bf16 %v518_v8, %v514_v6  ;;  %v525_v6 = vld [vmem:[%s8515_s5 + $0x1d8] sm:$0xff]  ;;  %v7254_v8 = vpack.c.bf16 %v527_v46, %v523_v42  ;;  %v524_v42 = vld [vmem:[%s8515_s5 + $0x1d0] sm:$0xff] }
  0x3c   :  { %4768 = vmatpush1.bf16.msra.mxu1 %v7204_v22  ;;  %4738 = vmatprep.subr.bf16.mxu0 %v7218_v43  ;;  %v7240_v22 = vpack.c.bf16 %v520_v34, %v516_v31  ;;  %v529_v31 = vld [vmem:[%s8515_s5 + $0x1f8] sm:$0xff]  ;;  %v522_v34 = vld [vmem:[%s8515_s5 + $0x1c0] sm:$0xff]  ;;  %v528_v46 = vld [vmem:[%s8515_s5 + $0x1f0] sm:$0xff] }
  0x3d   :  { %8779 = vst [vmem:[#allocation55_spill] sm:$0xff] %v7231_v62  ;;  %4770 = vmatprep.subr.bf16.mxu1 %v7229_v3  ;;  %8781 = vst [vmem:[#allocation57_spill] sm:$0xff] %v7254_v8  ;;  %v7265_v3 = vpack.c.bf16 %v529_v31, %v525_v6  ;;  %v407_v6 = vld [vmem:[%s8516_s4 + $0x28] sm:$0xff]  ;;  %v405_v31 = vld [vmem:[%s8516_s4 + $0x18] sm:$0xff] }
  0x3e   :  { %8780 = vst [vmem:[#allocation56_spill] sm:$0xff] %v7240_v22 }
  0x3f   :  { %4740 = vmatpush1.bf16.msra.mxu0 %v7231_v62  ;;  %v526_v62 = vld [vmem:[%s8515_s5 + $0x1e0] sm:$0xff]  ;;  %8782 = vst [vmem:[#allocation58_spill] sm:$0xff] %v7265_v3 }
  0x40   :  { %4772 = vmatpush1.bf16.msra.mxu1 %v7240_v22  ;;  %v7267_v43 = vpack.c.bf16 %v526_v62, %v522_v34  ;;  %4742 = vmatprep.subr.bf16.mxu0 %v7254_v8  ;;  %v7276_v22 = vpack.c.bf16 %v528_v46, %v524_v42  ;;  %v403_v62 = vld [vmem:[%s8516_s4 + $0x8] sm:$0xff]  ;;  %v409_v42 = vld [vmem:[%s8516_s4 + $0x38] sm:$0xff]  ;;  %v402_v46 = vld [vmem:[%s8516_s4] sm:$0xff] }
  0x41   :  { %4774 = vmatprep.subr.bf16.mxu1 %v7265_v3  ;;  %v7290_v34 = vpack.c.bf16 %v407_v6, %v403_v62  ;;  %v7301_v3 = vpack.c.bf16 %v409_v42, %v405_v31  ;;  %v404_v62 = vld [vmem:[%s8516_s4 + $0x10] sm:$0xff]  ;;  %v415_v31 = vld [vmem:[%s8516_s4 + $0x68] sm:$0xff]  ;;  %v413_v42 = vld [vmem:[%s8516_s4 + $0x58] sm:$0xff] }
  0x42   :  { %8783 = vst [vmem:[#allocation59_spill] sm:$0xff] %v7267_v43  ;;  %8784 = vst [vmem:[#allocation60_spill] sm:$0xff] %v7276_v22  ;;  %v408_v6 = vld [vmem:[%s8516_s4 + $0x30] sm:$0xff] }
  0x43   :  { %4744 = vmatpush1.bf16.msra.mxu0 %v7267_v43  ;;  %8785 = vst [vmem:[#allocation61_spill] sm:$0xff] %v7290_v34  ;;  %v406_v43 = vld [vmem:[%s8516_s4 + $0x20] sm:$0xff]  ;;  %8786 = vst [vmem:[#allocation62_spill] sm:$0xff] %v7301_v3  ;;  %v7313_v58 = vpack.c.bf16 %v408_v6, %v404_v62  ;;  %v417_v62 = vld [vmem:[%s8516_s4 + $0x78] sm:$0xff] }
  0x44   :  { %4776 = vmatpush1.bf16.msra.mxu1 %v7276_v22  ;;  %v7303_v8 = vpack.c.bf16 %v406_v43, %v402_v46  ;;  %4778 = vmatprep.subr.bf16.mxu0 %v7290_v34  ;;  %v8788_v22 = vmov 0.0   ;;  %v411_v43 = vld [vmem:[%s8516_s4 + $0x48] sm:$0xff]  ;;  %v410_v6 = vld [vmem:[%s8516_s4 + $0x40] sm:$0xff]  ;;  %v7339_v34 = vpack.c.bf16 %v417_v62, %v413_v42  ;;  %v421_v62 = vld [vmem:[%s8516_s4 + $0x98] sm:$0xff] }
  0x45   :  { %8789 = vst [vmem:[#allocation64_spill] sm:$0xff] %v7313_v58  ;;  %4810 = vmatprep.subr.bf16.mxu1 %v7301_v3  ;;  %v7328_v46 = vpack.c.bf16 %v415_v31, %v411_v43  ;;  %v414_v3 = vld [vmem:[%s8516_s4 + $0x60] sm:$0xff]  ;;  %v412_v43 = vld [vmem:[%s8516_s4 + $0x50] sm:$0xff]  ;;  %v423_v42 = vld [vmem:[%s8516_s4 + $0xa8] sm:$0xff] }
  0x46   :  { %8787 = vst [vmem:[#allocation63_spill] sm:$0xff] %v7303_v8  ;;  %787 = vmatmul.mubr.f32.vlgmr.msra.gmra.mrb[16].mxu0 %v8788_v22  ;;  %8791 = vst [vmem:[#allocation66_spill] sm:$0xff] %v7339_v34  ;;  %v7341_v39 = vpack.c.bf16 %v414_v3, %v410_v6  ;;  %v416_v31 = vld [vmem:[%s8516_s4 + $0x70] sm:$0xff]  ;;  %v419_v3 = vld [vmem:[%s8516_s4 + $0x88] sm:$0xff] }
  0x47   :  { %858 = vmatmul.mubr.f32.vlgmr.msra.gmra.mrb[16].mxu1 %v8788_v22  ;;  %4780 = vmatpush1.bf16.msra.mxu0 %v7303_v8  ;;  %8790 = vst [vmem:[#allocation65_spill] sm:$0xff] %v7328_v46  ;;  %v7366_v6 = vpack.c.bf16 %v423_v42, %v419_v3  ;;  %v420_v3 = vld [vmem:[%s8516_s4 + $0x90] sm:$0xff] }
  0x48   :  { %4812 = vmatpush1.bf16.msra.mxu1 %v7313_v58  ;;  %8792 = vst [vmem:[#allocation67_spill] sm:$0xff] %v7341_v39  ;;  %928 = vmatprep.mubr.f32.mxu0 %v8788_v22  ;;  %v7352_v58 = vpack.c.bf16 %v416_v31, %v412_v43  ;;  %v425_v43 = vld [vmem:[%s8516_s4 + $0xb8] sm:$0xff]  ;;  %v418_v31 = vld [vmem:[%s8516_s4 + $0x80] sm:$0xff]  ;;  %v424_v42 = vld [vmem:[%s8516_s4 + $0xb0] sm:$0xff] }
  0x49   :  { %999 = vmatprep.mubr.f32.mxu1 %v8788_v22  ;;  %4782 = vmatprep.subr.bf16.mxu0 %v7328_v46  ;;  %8794 = vst [vmem:[#allocation69_spill] sm:$0xff] %v7366_v6  ;;  %v7377_v46 = vpack.c.bf16 %v425_v43, %v421_v62  ;;  %v427_v62 = vld [vmem:[%s8516_s4 + $0xc8] sm:$0xff]  ;;  %v429_v43 = vld [vmem:[%s8516_s4 + $0xd8] sm:$0xff] }
  0x4a   :  { %8793 = vst [vmem:[#allocation68_spill] sm:$0xff] %v7352_v58  ;;  %4814 = vmatprep.subr.bf16.mxu1 %v7339_v34  ;;  %v422_v34 = vld [vmem:[%s8516_s4 + $0xa0] sm:$0xff] }
  0x4b   :  { %4784 = vmatpush1.bf16.msra.mxu0 %v7341_v39  ;;  %8795 = vst [vmem:[#allocation70_spill] sm:$0xff] %v7377_v46  ;;  %v7379_v8 = vpack.c.bf16 %v422_v34, %v418_v31  ;;  %v431_v34 = vld [vmem:[%s8516_s4 + $0xe8] sm:$0xff] }
  0x4c   :  { %4816 = vmatpush1.bf16.msra.mxu1 %v7352_v58  ;;  %4786 = vmatprep.subr.bf16.mxu0 %v7366_v6  ;;  %v7388_v58 = vpack.c.bf16 %v424_v42, %v420_v3  ;;  %v7402_v31 = vpack.c.bf16 %v431_v34, %v427_v62  ;;  %v433_v3 = vld [vmem:[%s8516_s4 + $0xf8] sm:$0xff]  ;;  %v426_v42 = vld [vmem:[%s8516_s4 + $0xc0] sm:$0xff]  ;;  %v428_v62 = vld [vmem:[%s8516_s4 + $0xd0] sm:$0xff] }
  0x4d   :  { %8796 = vst [vmem:[#allocation71_spill] sm:$0xff] %v7379_v8  ;;  %4818 = vmatprep.subr.bf16.mxu1 %v7377_v46  ;;  %v430_v46 = vld [vmem:[%s8516_s4 + $0xe0] sm:$0xff]  ;;  %v7413_v6 = vpack.c.bf16 %v433_v3, %v429_v43  ;;  %v432_v34 = vld [vmem:[%s8516_s4 + $0xf0] sm:$0xff]  ;;  %v435_v43 = vld [vmem:[%s8516_s4 + $0x108] sm:$0xff] }
  0x4e   :  { %8797 = vst [vmem:[#allocation72_spill] sm:$0xff] %v7388_v58  ;;  %8798 = vst [vmem:[#allocation73_spill] sm:$0xff] %v7402_v31  ;;  %v7415_v39 = vpack.c.bf16 %v430_v46, %v426_v42  ;;  %v439_v46 = vld [vmem:[%s8516_s4 + $0x128] sm:$0xff]  ;;  %v437_v3 = vld [vmem:[%s8516_s4 + $0x118] sm:$0xff] }
  0x4f   :  { %4788 = vmatpush1.bf16.msra.mxu0 %v7379_v8  ;;  %8799 = vst [vmem:[#allocation74_spill] sm:$0xff] %v7413_v6  ;;  %v7438_v42 = vpack.c.bf16 %v439_v46, %v435_v43  ;;  %v436_v43 = vld [vmem:[%s8516_s4 + $0x110] sm:$0xff] }
  0x50   :  { %4820 = vmatpush1.bf16.msra.mxu1 %v7388_v58  ;;  %8800 = vst [vmem:[#allocation75_spill] sm:$0xff] %v7415_v39  ;;  %4790 = vmatprep.subr.bf16.mxu0 %v7402_v31  ;;  %v7424_v58 = vpack.c.bf16 %v432_v34, %v428_v62  ;;  %v441_v62 = vld [vmem:[%s8516_s4 + $0x138] sm:$0xff]  ;;  %v434_v34 = vld [vmem:[%s8516_s4 + $0x100] sm:$0xff]  ;;  %v440_v46 = vld [vmem:[%s8516_s4 + $0x130] sm:$0xff] }
  0x51   :  { %4822 = vmatprep.subr.bf16.mxu1 %v7413_v6  ;;  %8802 = vst [vmem:[#allocation77_spill] sm:$0xff] %v7438_v42  ;;  %v438_v6 = vld [vmem:[%s8516_s4 + $0x120] sm:$0xff]  ;;  %v7449_v31 = vpack.c.bf16 %v441_v62, %v437_v3  ;;  %v443_v3 = vld [vmem:[%s8516_s4 + $0x148] sm:$0xff]  ;;  %v445_v62 = vld [vmem:[%s8516_s4 + $0x158] sm:$0xff] }
  0x52   :  { %8801 = vst [vmem:[#allocation76_spill] sm:$0xff] %v7424_v58  ;;  %v7451_v8 = vpack.c.bf16 %v438_v6, %v434_v34  ;;  %v447_v6 = vld [vmem:[%s8516_s4 + $0x168] sm:$0xff] }
  0x53   :  { %4792 = vmatpush1.bf16.msra.mxu0 %v7415_v39  ;;  %8803 = vst [vmem:[#allocation78_spill] sm:$0xff] %v7449_v31  ;;  %v7474_v34 = vpack.c.bf16 %v447_v6, %v443_v3  ;;  %v444_v3 = vld [vmem:[%s8516_s4 + $0x150] sm:$0xff] }
  0x54   :  { %4824 = vmatpush1.bf16.msra.mxu1 %v7424_v58  ;;  %8804 = vst [vmem:[#allocation79_spill] sm:$0xff] %v7451_v8  ;;  %4794 = vmatprep.subr.bf16.mxu0 %v7438_v42  ;;  %v7460_v58 = vpack.c.bf16 %v440_v46, %v436_v43  ;;  %v449_v43 = vld [vmem:[%s8516_s4 + $0x178] sm:$0xff]  ;;  %v442_v46 = vld [vmem:[%s8516_s4 + $0x140] sm:$0xff]  ;;  %v448_v6 = vld [vmem:[%s8516_s4 + $0x170] sm:$0xff] }
  0x55   :  { %4826 = vmatprep.subr.bf16.mxu1 %v7449_v31  ;;  %8806 = vst [vmem:[#allocation81_spill] sm:$0xff] %v7474_v34  ;;  %v446_v31 = vld [vmem:[%s8516_s4 + $0x160] sm:$0xff]  ;;  %v7485_v42 = vpack.c.bf16 %v449_v43, %v445_v62  ;;  %v453_v62 = vld [vmem:[%s8516_s4 + $0x198] sm:$0xff] }
  0x56   :  { %8805 = vst [vmem:[#allocation80_spill] sm:$0xff] %v7460_v58  ;;  %v7487_v39 = vpack.c.bf16 %v446_v31, %v442_v46  ;;  %v455_v31 = vld [vmem:[%s8516_s4 + $0x1a8] sm:$0xff]  ;;  %v457_v43 = vld [vmem:[%s8516_s4 + $0x1b8] sm:$0xff] }
  0x57   :  { %4796 = vmatpush1.bf16.msra.mxu0 %v7451_v8  ;;  %8807 = vst [vmem:[#allocation82_spill] sm:$0xff] %v7485_v42  ;;  %v7499_v8 = vpack.c.bf16 %v448_v6, %v444_v3  ;;  %v7513_v20 = vpack.c.bf16 %v457_v43, %v453_v62  ;;  %v450_v3 = vld [vmem:[%s8516_s4 + $0x180] sm:$0xff]  ;;  %v459_v62 = vld [vmem:[%s8516_s4 + $0x1c8] sm:$0xff] }
  0x58   :  { %4828 = vmatpush1.bf16.msra.mxu1 %v7460_v58  ;;  %8808 = vst [vmem:[#allocation83_spill] sm:$0xff] %v7487_v39  ;;  %v451_v58 = vld [vmem:[%s8516_s4 + $0x188] sm:$0xff]  ;;  %4798 = vmatprep.subr.bf16.mxu0 %v7474_v34  ;;  %v454_v6 = vld [vmem:[%s8516_s4 + $0x1a0] sm:$0xff]  ;;  %v452_v34 = vld [vmem:[%s8516_s4 + $0x190] sm:$0xff] }
  0x59   :  { %8809 = vst [vmem:[#allocation84_spill] sm:$0xff] %v7499_v8  ;;  %4830 = vmatprep.subr.bf16.mxu1 %v7485_v42  ;;  %v7511_v46 = vpack.c.bf16 %v455_v31, %v451_v58  ;;  %8811 = vst [vmem:[#allocation86_spill] sm:$0xff] %v7513_v20  ;;  %v7526_v58 = vpack.c.bf16 %v454_v6, %v450_v3  ;;  %v456_v31 = vld [vmem:[%s8516_s4 + $0x1b0] sm:$0xff]  ;;  %v463_v43 = vld [vmem:[%s8516_s4 + $0x1e8] sm:$0xff] }
  0x5a   :  { %v7541_v3 = vpack.c.bf16 %v463_v43, %v459_v62  ;;  %v461_v6 = vld [vmem:[%s8516_s4 + $0x1d8] sm:$0xff]  ;;  %v458_v42 = vld [vmem:[%s8516_s4 + $0x1c0] sm:$0xff]  ;;  %v464_v62 = vld [vmem:[%s8516_s4 + $0x1f0] sm:$0xff] }
  0x5b   :  { %8810 = vst [vmem:[#allocation85_spill] sm:$0xff] %v7511_v46  ;;  %4800 = vmatpush1.bf16.msra.mxu0 %v7487_v39  ;;  %8812 = vst [vmem:[#allocation87_spill] sm:$0xff] %v7526_v58  ;;  %v7539_v39 = vpack.c.bf16 %v456_v31, %v452_v34  ;;  %v462_v34 = vld [vmem:[%s8516_s4 + $0x1e0] sm:$0xff]  ;;  %v460_v31 = vld [vmem:[%s8516_s4 + $0x1d0] sm:$0xff] }
  0x5c   :  { %4832 = vmatpush1.bf16.msra.mxu1 %v7499_v8  ;;  %4802 = vmatprep.subr.bf16.mxu0 %v7511_v46  ;;  %8814 = vst [vmem:[#allocation89_spill] sm:$0xff] %v7541_v3  ;;  %v465_v8 = vld [vmem:[%s8516_s4 + $0x1f8] sm:$0xff]  ;;  %v7565_v43 = vpack.c.bf16 %v462_v34, %v458_v42  ;;  %v52_v34 = vld [vmem:[%s8517_s2] sm:$0xf] }
  0x5d   :  { %4834 = vmatprep.subr.bf16.mxu1 %v7513_v20  ;;  %8813 = vst [vmem:[#allocation88_spill] sm:$0xff] %v7539_v39  ;;  %v7552_v9 = vpack.c.bf16 %v465_v8, %v461_v6  ;;  %v7567_v8 = vpack.c.bf16 %v464_v62, %v460_v31  ;;  %v54_v6 = vlaneseq }
  0x5e   :  { %8816 = vst [vmem:[#allocation91_spill] sm:$0xff] %v7565_v43 }
  0x5f   :  { %8815 = vst [vmem:[#allocation90_spill] sm:$0xff] %v7552_v9  ;;  %4804 = vmatpush1.bf16.msra.mxu0 %v7526_v58  ;;  %8817 = vst [vmem:[#allocation92_spill] sm:$0xff] %v7567_v8  ;;  %v7575_v58 = vshrl.u32 %v54_v6, 7 }
  0x60   :  { %4836 = vmatpush1.bf16.msra.mxu1 %v7539_v39  ;;  %4806 = vmatprep.subr.bf16.mxu0 %v7541_v3 }
  0x61   :  { %4838 = vmatprep.subr.bf16.mxu1 %v7552_v9  ;;  %8818 = vst [vmem:[#allocation93_spill] sm:$0xff] %v7575_v58  ;;  %v8622_v42 = vsub.s32 0, %v7575_v58  ;;  %v8623_v31 = vsub.s32 1, %v7575_v58  ;;  %v8630_v6 = vsub.s32 3, %v7575_v58 }
  0x63   :  { %4808 = vmatpush1.bf16.msra.mxu0 %v7565_v43  ;;  %v7584_v62 = vrot.slane %v52_v34, %v8622_v42  ;;  %v7595_v42 = vrot.slane %v52_v34, %v8630_v6 }
  0x64   :  { %4840 = vmatpush1.bf16.msra.mxu1 %v7567_v8  ;;  %4842 = vmatprep.subr.bf16.mxu0 %v6662_v10  ;;  %v7588_v10 = vrot.slane %v52_v34, %v8623_v31  ;;  %v8639_v31 = vsub.s32 2, %v7575_v58 }
  0x65   :  { %4874 = vmatprep.subr.bf16.mxu1 %v6664_v11  ;;  %8819 = vst [vmem:[#allocation94_spill] sm:$0xff] %v7584_v62  ;;  %8821 = vst [vmem:[#allocation96_spill] sm:$0xff] %v7595_v42 }
  0x66   :  { %8820 = vst [vmem:[#allocation95_spill] sm:$0xff] %v7588_v10 }
  0xf9   :  { %v618_v11 = vpop.f32.mrb[0].mxu0 }
  0xfa   :  { %v6209_v8 = vadd.f32 %v618_v11, %v7584_v62  ;;  %v689_v43 = vpop.f32.mrb[0].mxu1  ;;  %v620_v9 = vpop.f32.mrb[1].mxu0  ;;  %v7601_v11 = vrot.slane %v52_v34, %v8639_v31  ;;  %v8837_v31 = vld [vmem:[#allocation59_spill] sm:$0xff] }
  0xfb   :  { %v6210_v3 = vadd.f32 %v620_v9, %v7588_v10  ;;  %v691_v39 = vpop.f32.mrb[1].mxu1 }
  0xfc   :  { %v4546_v20 = vmul.f32 -1.442695, %v6209_v8  ;;  %v6226_v63 = vadd.f32 %v691_v39, %v7595_v42  ;;  %v6225_v9 = vadd.f32 %v689_v43, %v7601_v11 }
  0xfd   :  { %v4547_v46 = vmul.f32 -1.442695, %v6210_v3 }
  0xfe   :  { %6308 = vpow2.f32 %v4546_v20  ;;  %v4548_v62 = vmul.f32 -1.442695, %v6226_v63 }
  0xff   :  { %6310 = vpow2.f32 %v4547_v46 }
 0x100   :  { %6312 = vpow2.f32 %v4548_v62  ;;  %v8826_v62 = vld [vmem:[#allocation48_spill] sm:$0xff] }
 0x101   :  { %6314 = vtanh.f32 %v6225_v9  ;;  %v8828_v9 = vld [vmem:[#allocation50_spill] sm:$0xff] }
 0x108   :  { %v6309_v10 = vpop.eup %6308 }
 0x109   :  { %v6311_v8 = vpop.eup %6310  ;;  %v701_v3 = vadd.f32 1.0, %v6309_v10 }
 0x10a   :  { %v707_v6 = vadd.f32 1.0, %v6311_v8  ;;  %v6313_v20 = vpop.eup %6312  ;;  %v8829_v8 = vld [vmem:[#allocation51_spill] sm:$0xff] }
 0x10b   :  { %6316 = vrcp.f32 %v701_v3  ;;  %v6315_v57 = vpop.eup %6314  ;;  %v714_v42 = vadd.f32 1.0, %v6313_v20  ;;  %v8830_v3 = vld [vmem:[#allocation52_spill] sm:$0xff]  ;;  %v8831_v20 = vld [vmem:[#allocation53_spill] sm:$0xff] }
 0x10c   :  { %6318 = vrcp.f32 %v707_v6  ;;  %v8827_v6 = vld [vmem:[#allocation49_spill] sm:$0xff] }
 0x10d   :  { %6320 = vrcp.f32 %v714_v42  ;;  %v8825_v42 = vld [vmem:[#allocation47_spill] sm:$0xff] }
 0x115   :  { %v6317_v46 = vpop.eup %6316 }
 0x116   :  { %v6319_v54 = vpop.eup %6318  ;;  %v718_v39 = vmul.f32 %v6317_v46, %v6315_v57  ;;  %v8823_v57 = vld [vmem:[#allocation45_spill] sm:$0xff]  ;;  %v8832_v46 = vld [vmem:[#allocation54_spill] sm:$0xff] }
 0x117   :  { %v717_v58 = vmul.f32 0.0, %v6319_v54  ;;  %v6321_v63 = vpop.eup %6320  ;;  %v8822_v54 = vld [vmem:[#allocation44_spill] sm:$0xff] }
 0x119   :  { %v7604_v34 = vadd.f32 %v718_v39, %v717_v58  ;;  %v8824_v58 = vld [vmem:[#allocation46_spill] sm:$0xff]  ;;  %v8833_v39 = vld [vmem:[#allocation55_spill] sm:$0xff] }
 0x11b   :  { %6322 = vtanh.f32 %v7604_v34 }
 0x125   :  { %v6323_v43 = vpop.eup %6322 }
 0x126   :  { %v721_v10 = vmul.f32 %v6323_v43, %v6321_v63  ;;  %v8834_v63 = vld [vmem:[#allocation56_spill] sm:$0xff]  ;;  %v8835_v43 = vld [vmem:[#allocation57_spill] sm:$0xff] }
 0x128   :  { %929 = vmatmul.mubr.f32.vlgmr.msra.gmra.mrb[16].mxu0 %v721_v10  ;;  %1000 = vmatmul.mubr.f32.vlgmr.msra.gmra.mrb[16].mxu1 %v721_v10 }
 0x129   :  { %4844 = vmatpush1.bf16.msra.mxu0 %v6675_v15  ;;  %4876 = vmatpush1.bf16.msra.mxu1 %v6690_v19 }
 0x12a   :  { %4846 = vmatprep.subr.bf16.mxu0 %v6702_v23  ;;  %4878 = vmatprep.subr.bf16.mxu1 %v6704_v24 }
 0x12b   :  { %1098 = vmatprep.mubr.f32.mxu0 %v8788_v22  ;;  %1169 = vmatprep.mubr.f32.mxu1 %v8788_v22 }
 0x12d   :  { %4848 = vmatpush1.bf16.msra.mxu0 %v6717_v28  ;;  %4880 = vmatpush1.bf16.msra.mxu1 %v6730_v32 }
 0x12e   :  { %4850 = vmatprep.subr.bf16.mxu0 %v6743_v36  ;;  %4882 = vmatprep.subr.bf16.mxu1 %v6745_v37 }
 0x131   :  { %4852 = vmatpush1.bf16.msra.mxu0 %v6758_v41  ;;  %4884 = vmatpush1.bf16.msra.mxu1 %v6771_v45 }
 0x132   :  { %4854 = vmatprep.subr.bf16.mxu0 %v6784_v49  ;;  %4886 = vmatprep.subr.bf16.mxu1 %v6797_v53 }
 0x135   :  { %4856 = vmatpush1.bf16.msra.mxu0 %v6807_v56  ;;  %4888 = vmatpush1.bf16.msra.mxu1 %v6820_v60 }
 0x136   :  { %4858 = vmatprep.subr.bf16.mxu0 %v6833_v0  ;;  %4890 = vmatprep.subr.bf16.mxu1 %v6843_v4 }
 0x139   :  { %4860 = vmatpush1.bf16.msra.mxu0 %v6853_v7  ;;  %4892 = vmatpush1.bf16.msra.mxu1 %v6863_v12 }
 0x13a   :  { %4862 = vmatprep.subr.bf16.mxu0 %v6876_v17  ;;  %4894 = vmatprep.subr.bf16.mxu1 %v6886_v21 }
 0x13d   :  { %4864 = vmatpush1.bf16.msra.mxu0 %v6896_v26  ;;  %4896 = vmatpush1.bf16.msra.mxu1 %v6906_v30 }
 0x13e   :  { %4866 = vmatprep.subr.bf16.mxu0 %v6919_v35  ;;  %4898 = vmatprep.subr.bf16.mxu1 %v6929_v40 }
 0x141   :  { %4868 = vmatpush1.bf16.msra.mxu0 %v6939_v44  ;;  %4900 = vmatpush1.bf16.msra.mxu1 %v6952_v50 }
 0x142   :  { %4870 = vmatprep.subr.bf16.mxu0 %v6965_v55  ;;  %4902 = vmatprep.subr.bf16.mxu1 %v6978_v61 }
 0x145   :  { %4872 = vmatpush1.bf16.msra.mxu0 %v6988_v1  ;;  %4904 = vmatpush1.bf16.msra.mxu1 %v6992_v2 }
 0x146   :  { %4906 = vmatprep.subr.bf16.mxu0 %v6994_v5  ;;  %4938 = vmatprep.subr.bf16.mxu1 %v7007_v13 }
 0x148   :  { %1099 = vmatmul.mubr.f32.vlgmr.msra.gmra.mrb[2].mxu0 %v721_v10  ;;  %1170 = vmatmul.mubr.f32.vlgmr.msra.gmra.mrb[2].mxu1 %v721_v10  ;;  %v8836_v10 = vld [vmem:[#allocation58_spill] sm:$0xff] }
 0x149   :  { %4908 = vmatpush1.bf16.msra.mxu0 %v7028_v25  ;;  %4940 = vmatpush1.bf16.msra.mxu1 %v7032_v27 }
 0x14a   :  { %4910 = vmatprep.subr.bf16.mxu0 %v7034_v29  ;;  %4942 = vmatprep.subr.bf16.mxu1 %v7046_v38 }
 0x14b   :  { %1268 = vmatprep.mubr.f32.mxu0 %v8788_v22  ;;  %1339 = vmatprep.mubr.f32.mxu1 %v8788_v22 }
 0x14d   :  { %4912 = vmatpush1.bf16.msra.mxu0 %v7066_v48  ;;  %4944 = vmatpush1.bf16.msra.mxu1 %v7070_v51 }
 0x14e   :  { %4914 = vmatprep.subr.bf16.mxu0 %v7072_v52  ;;  %4946 = vmatprep.subr.bf16.mxu1 %v7084_v59 }
 0x151   :  { %4916 = vmatpush1.bf16.msra.mxu0 %v7104_v14  ;;  %4948 = vmatpush1.bf16.msra.mxu1 %v7108_v16 }
 0x152   :  { %4918 = vmatprep.subr.bf16.mxu0 %v7110_v18  ;;  %4950 = vmatprep.subr.bf16.mxu1 %v7122_v33 }
 0x155   :  { %4920 = vmatpush1.bf16.msra.mxu0 %v7140_v47  ;;  %4952 = vmatpush1.bf16.msra.mxu1 %v8822_v54 }
 0x156   :  { %4922 = vmatprep.subr.bf16.mxu0 %v8823_v57  ;;  %4954 = vmatprep.subr.bf16.mxu1 %v8824_v58 }
 0x159   :  { %4924 = vmatpush1.bf16.msra.mxu0 %v8825_v42  ;;  %4956 = vmatpush1.bf16.msra.mxu1 %v8826_v62 }
 0x15a   :  { %4926 = vmatprep.subr.bf16.mxu0 %v8827_v6  ;;  %4958 = vmatprep.subr.bf16.mxu1 %v8828_v9  ;;  %v8838_v6 = vld [vmem:[#allocation60_spill] sm:$0xff]  ;;  %v8839_v9 = vld [vmem:[#allocation61_spill] sm:$0xff] }
 0x15d   :  { %4928 = vmatpush1.bf16.msra.mxu0 %v8829_v8  ;;  %4960 = vmatpush1.bf16.msra.mxu1 %v8830_v3  ;;  %v8840_v8 = vld [vmem:[#allocation62_spill] sm:$0xff] }
 0x15e   :  { %4930 = vmatprep.subr.bf16.mxu0 %v8831_v20  ;;  %4962 = vmatprep.subr.bf16.mxu1 %v8832_v46  ;;  %v530_v46 = vld [vmem:[%s8518_s6] sm:$0xf]  ;;  %v8841_v20 = vld [vmem:[#allocation93_spill] sm:$0xff] }
 0x15f   :  { %v8846_v57 = vsub.s32 3, %v8841_v20 }
 0x161   :  { %4932 = vmatpush1.bf16.msra.mxu0 %v8833_v39  ;;  %4964 = vmatpush1.bf16.msra.mxu1 %v8834_v63  ;;  %v8842_v39 = vsub.s32 0, %v8841_v20  ;;  %v7690_v54 = vrot.slane %v530_v46, %v8846_v57 }
 0x162   :  { %4934 = vmatprep.subr.bf16.mxu0 %v8835_v43  ;;  %4966 = vmatprep.subr.bf16.mxu1 %v8836_v10  ;;  %v8844_v43 = vsub.s32 1, %v8841_v20 }
 0x163   :  { %v7680_v3 = vrot.slane %v530_v46, %v8842_v39  ;;  %8847 = vst [vmem:[#allocation98_spill] sm:$0xff] %v7690_v54 }
 0x164   :  { %v7684_v63 = vrot.slane %v530_v46, %v8844_v43  ;;  %v8848_v43 = vsub.s32 2, %v8841_v20 }
 0x165   :  { %4936 = vmatpush1.bf16.msra.mxu0 %v8837_v31  ;;  %4968 = vmatpush1.bf16.msra.mxu1 %v8838_v6  ;;  %8843 = vst [vmem:[#allocation93_spill] sm:$0xff] %v7680_v3 }
 0x166   :  { %4970 = vmatprep.subr.bf16.mxu0 %v8839_v9  ;;  %5002 = vmatprep.subr.bf16.mxu1 %v8840_v8  ;;  %8845 = vst [vmem:[#allocation97_spill] sm:$0xff] %v7684_v63  ;;  %v7695_v47 = vrot.slane %v530_v46, %v8848_v43 }
 0x168   :  { %8849 = vst [vmem:[#allocation99_spill] sm:$0xff] %v7695_v47 }
 0x1fb   :  { %v930_v10 = vpop.f32.mrb[16].mxu0  ;;  %v1001_v31 = vpop.f32.mrb[16].mxu1 }
 0x1fc   :  { %v1006_v6 = vadd.f32 %v930_v10, %v7680_v3  ;;  %v932_v62 = vpop.f32.mrb[17].mxu0  ;;  %v1003_v9 = vpop.f32.mrb[17].mxu1  ;;  %v1008_v10 = vadd.f32 %v1001_v31, %v7695_v47  ;;  %v8851_v31 = vld [vmem:[#allocation94_spill] sm:$0xff] }
 0x1fd   :  { %v1007_v8 = vadd.f32 %v932_v62, %v7684_v63  ;;  %v1009_v39 = vadd.f32 %v1003_v9, %v7690_v54 }
 0x1fe   :  { %v4549_v42 = vmul.f32 -1.442695, %v1006_v6 }
 0x1ff   :  { %v4550_v58 = vmul.f32 -1.442695, %v1007_v8  ;;  %v4551_v33 = vmul.f32 -1.442695, %v1009_v39 }
 0x200   :  { %6324 = vpow2.f32 %v4549_v42 }
 0x201   :  { %6326 = vpow2.f32 %v4550_v58 }
 0x202   :  { %6328 = vpow2.f32 %v4551_v33 }
 0x203   :  { %6330 = vtanh.f32 %v1008_v10 }
 0x20a   :  { %v6325_v3 = vpop.eup %6324 }
 0x20b   :  { %v6327_v18 = vpop.eup %6326  ;;  %v1013_v62 = vadd.f32 1.0, %v6325_v3 }
 0x20c   :  { %v1019_v6 = vadd.f32 1.0, %v6327_v18  ;;  %v6329_v57 = vpop.eup %6328  ;;  %v8852_v18 = vld [vmem:[#allocation95_spill] sm:$0xff] }
 0x20d   :  { %6332 = vrcp.f32 %v1013_v62  ;;  %v6331_v42 = vpop.eup %6330  ;;  %v1026_v54 = vadd.f32 1.0, %v6329_v57 }
 0x20e   :  { %6334 = vrcp.f32 %v1019_v6 }
 0x20f   :  { %6336 = vrcp.f32 %v1026_v54 }
 0x217   :  { %v6333_v58 = vpop.eup %6332 }
 0x218   :  { %v6335_v8 = vpop.eup %6334  ;;  %v1030_v9 = vmul.f32 %v6333_v58, %v6331_v42  ;;  %v8853_v42 = vld [vmem:[#allocation96_spill] sm:$0xff] }
 0x219   :  { %v1029_v20 = vmul.f32 0.0, %v6335_v8  ;;  %v6337_v58 = vpop.eup %6336 }
 0x21b   :  { %v7698_v46 = vadd.f32 %v1030_v9, %v1029_v20  ;;  %v1100_v39 = vpop.f32.mrb[2].mxu0  ;;  %v1171_v43 = vpop.f32.mrb[2].mxu1 }
 0x21c   :  { %v6211_v47 = vadd.f32 %v1100_v39, %v8851_v31  ;;  %v1102_v3 = vpop.f32.mrb[3].mxu0  ;;  %v1173_v33 = vpop.f32.mrb[3].mxu1  ;;  %v6227_v20 = vadd.f32 %v1171_v43, %v7601_v11  ;;  %v8858_v43 = vld [vmem:[#allocation67_spill] sm:$0xff] }
 0x21d   :  { %8850 = vst [vmem:[#allocation100_spill] sm:$0xff] %v7698_v46  ;;  %6338 = vtanh.f32 %v7698_v46  ;;  %v6212_v10 = vadd.f32 %v1102_v3, %v8852_v18  ;;  %v6228_v57 = vadd.f32 %v1173_v33, %v8853_v42  ;;  %v8854_v46 = vld [vmem:[#allocation63_spill] sm:$0xff]  ;;  %v8857_v33 = vld [vmem:[#allocation66_spill] sm:$0xff] }
 0x21e   :  { %v4552_v62 = vmul.f32 -1.442695, %v6211_v47  ;;  %v8855_v47 = vld [vmem:[#allocation64_spill] sm:$0xff] }
 0x21f   :  { %v4553_v6 = vmul.f32 -1.442695, %v6212_v10  ;;  %v4554_v9 = vmul.f32 -1.442695, %v6228_v57  ;;  %v8856_v10 = vld [vmem:[#allocation65_spill] sm:$0xff]  ;;  %v8862_v57 = vld [vmem:[#allocation71_spill] sm:$0xff] }
 0x220   :  { %6340 = vpow2.f32 %v4552_v62  ;;  %v8860_v62 = vld [vmem:[#allocation69_spill] sm:$0xff] }
 0x221   :  { %6342 = vpow2.f32 %v4553_v6  ;;  %v8861_v6 = vld [vmem:[#allocation70_spill] sm:$0xff] }
 0x222   :  { %6344 = vpow2.f32 %v4554_v9 }
 0x223   :  { %6346 = vtanh.f32 %v6227_v20 }
 0x227   :  { %v6339_v8 = vpop.eup %6338 }
 0x228   :  { %v1033_v54 = vmul.f32 %v6339_v8, %v6337_v58  ;;  %v8863_v58 = vld [vmem:[#allocation72_spill] sm:$0xff]  ;;  %v8864_v8 = vld [vmem:[#allocation73_spill] sm:$0xff] }
 0x22a   :  { %v6341_v63 = vpop.eup %6340  ;;  %1269 = vmatmul.mubr.f32.vlgmr.msra.gmra.mrb[18].mxu0 %v1033_v54  ;;  %1340 = vmatmul.mubr.f32.vlgmr.msra.gmra.mrb[18].mxu1 %v1033_v54 }
 0x22b   :  { %v6343_v39 = vpop.eup %6342  ;;  %v1183_v31 = vadd.f32 1.0, %v6341_v63  ;;  %4972 = vmatpush1.bf16.msra.mxu0 %v8854_v46  ;;  %5004 = vmatpush1.bf16.msra.mxu1 %v8855_v47  ;;  %v8859_v63 = vld [vmem:[#allocation68_spill] sm:$0xff] }
 0x22c   :  { %v1189_v3 = vadd.f32 1.0, %v6343_v39  ;;  %4974 = vmatprep.subr.bf16.mxu0 %v8856_v10  ;;  %5006 = vmatprep.subr.bf16.mxu1 %v8857_v33  ;;  %v6345_v9 = vpop.eup %6344  ;;  %v8866_v39 = vld [vmem:[#allocation75_spill] sm:$0xff]  ;;  %v8868_v33 = vld [vmem:[#allocation77_spill] sm:$0xff] }
 0x22d   :  { %6348 = vrcp.f32 %v1183_v31  ;;  %1410 = vmatprep.mubr.f32.mxu0 %v8788_v22  ;;  %1481 = vmatprep.mubr.f32.mxu1 %v8788_v22  ;;  %v8865_v31 = vld [vmem:[#allocation74_spill] sm:$0xff]  ;;  %v6347_v20 = vpop.eup %6346  ;;  %v8872_v10 = vld [vmem:[#allocation81_spill] sm:$0xff] }
 0x22e   :  { %6350 = vrcp.f32 %v1189_v3  ;;  %v8867_v3 = vld [vmem:[#allocation76_spill] sm:$0xff] }
 0x22f   :  { %4976 = vmatpush1.bf16.msra.mxu0 %v8858_v43  ;;  %5008 = vmatpush1.bf16.msra.mxu1 %v8859_v63 }
 0x230   :  { %4978 = vmatprep.subr.bf16.mxu0 %v8860_v62  ;;  %5010 = vmatprep.subr.bf16.mxu1 %v8861_v6  ;;  %v1196_v62 = vadd.f32 1.0, %v6345_v9  ;;  %v8869_v6 = vld [vmem:[#allocation78_spill] sm:$0xff]  ;;  %v8874_v9 = vld [vmem:[#allocation83_spill] sm:$0xff] }
 0x232   :  { %6352 = vrcp.f32 %v1196_v62  ;;  %v8881_v62 = vld [vmem:[#allocation90_spill] sm:$0xff] }
 0x233   :  { %4980 = vmatpush1.bf16.msra.mxu0 %v8862_v57  ;;  %5012 = vmatpush1.bf16.msra.mxu1 %v8863_v58 }
 0x234   :  { %4982 = vmatprep.subr.bf16.mxu0 %v8864_v8  ;;  %5014 = vmatprep.subr.bf16.mxu1 %v8865_v31  ;;  %v8870_v8 = vld [vmem:[#allocation79_spill] sm:$0xff]  ;;  %v8871_v31 = vld [vmem:[#allocation80_spill] sm:$0xff] }
 0x237   :  { %v6349_v54 = vpop.eup %6348  ;;  %4984 = vmatpush1.bf16.msra.mxu0 %v8866_v39  ;;  %5016 = vmatpush1.bf16.msra.mxu1 %v8867_v3  ;;  %v8873_v39 = vld [vmem:[#allocation82_spill] sm:$0xff] }
 0x238   :  { %v6351_v63 = vpop.eup %6350  ;;  %v1200_v43 = vmul.f32 %v6349_v54, %v6347_v20  ;;  %4986 = vmatprep.subr.bf16.mxu0 %v8868_v33  ;;  %5018 = vmatprep.subr.bf16.mxu1 %v8869_v6  ;;  %v8875_v20 = vld [vmem:[#allocation84_spill] sm:$0xff]  ;;  %v8876_v54 = vld [vmem:[#allocation85_spill] sm:$0xff] }
 0x239   :  { %v1199_v58 = vmul.f32 %v6351_v63, %v7604_v34  ;;  %v8877_v34 = vld [vmem:[#allocation86_spill] sm:$0xff]  ;;  %v8879_v63 = vld [vmem:[#allocation88_spill] sm:$0xff] }
 0x23b   :  { %v7724_v57 = vadd.f32 %v1200_v43, %v1199_v58  ;;  %4988 = vmatpush1.bf16.msra.mxu0 %v8870_v8  ;;  %5020 = vmatpush1.bf16.msra.mxu1 %v8871_v31  ;;  %v8878_v43 = vld [vmem:[#allocation87_spill] sm:$0xff]  ;;  %v8880_v58 = vld [vmem:[#allocation89_spill] sm:$0xff]  ;;  %v8883_v8 = vld [vmem:[#allocation92_spill] sm:$0xff] }
 0x23c   :  { %4990 = vmatprep.subr.bf16.mxu0 %v8872_v10  ;;  %5022 = vmatprep.subr.bf16.mxu1 %v8873_v39  ;;  %v6353_v10 = vpop.eup %6352  ;;  %v8882_v31 = vld [vmem:[#allocation91_spill] sm:$0xff] }
 0x23d   :  { %6354 = vtanh.f32 %v7724_v57 }
 0x23f   :  { %4992 = vmatpush1.bf16.msra.mxu0 %v8874_v9  ;;  %5024 = vmatpush1.bf16.msra.mxu1 %v8875_v20  ;;  %v8884_v20 = vld [vmem:[#allocation3_spill] sm:$0xff] }
 0x240   :  { %4994 = vmatprep.subr.bf16.mxu0 %v8876_v54  ;;  %5026 = vmatprep.subr.bf16.mxu1 %v8877_v34  ;;  %v8885_v54 = vld [vmem:[#allocation4_spill] sm:$0xff] }
 0x243   :  { %4996 = vmatpush1.bf16.msra.mxu0 %v8878_v43  ;;  %5028 = vmatpush1.bf16.msra.mxu1 %v8879_v63 }
 0x244   :  { %4998 = vmatprep.subr.bf16.mxu0 %v8880_v58  ;;  %5030 = vmatprep.subr.bf16.mxu1 %v8881_v62 }
 0x247   :  { %v6355_v39 = vpop.eup %6354  ;;  %5000 = vmatpush1.bf16.msra.mxu0 %v8882_v31  ;;  %5032 = vmatpush1.bf16.msra.mxu1 %v8883_v8 }
 0x248   :  { %v1203_v9 = vmul.f32 %v6355_v39, %v6353_v10  ;;  %5034 = vmatprep.subr.bf16.mxu0 %v8884_v20  ;;  %5066 = vmatprep.subr.bf16.mxu1 %v8885_v54  ;;  %v8886_v10 = vld [vmem:[#allocation41_spill] sm:$0xff]  ;;  %v8887_v39 = vld [vmem:[#allocation42_spill] sm:$0xff] }
 0x24a   :  { %1411 = vmatmul.mubr.f32.vlgmr.msra.gmra.mrb[18].mxu0 %v1203_v9  ;;  %1482 = vmatmul.mubr.f32.vlgmr.msra.gmra.mrb[18].mxu1 %v1203_v9 }
 0x24b   :  { %5036 = vmatpush1.bf16.msra.mxu0 %v6675_v15  ;;  %5068 = vmatpush1.bf16.msra.mxu1 %v6690_v19 }
 0x24c   :  { %5038 = vmatprep.subr.bf16.mxu0 %v6702_v23  ;;  %5070 = vmatprep.subr.bf16.mxu1 %v6704_v24 }
 0x24d   :  { %1580 = vmatprep.mubr.f32.mxu0 %v8788_v22  ;;  %1651 = vmatprep.mubr.f32.mxu1 %v8788_v22 }
 0x24f   :  { %5040 = vmatpush1.bf16.msra.mxu0 %v6717_v28  ;;  %5072 = vmatpush1.bf16.msra.mxu1 %v6730_v32 }
 0x250   :  { %5042 = vmatprep.subr.bf16.mxu0 %v6743_v36  ;;  %5074 = vmatprep.subr.bf16.mxu1 %v6745_v37 }
 0x253   :  { %5044 = vmatpush1.bf16.msra.mxu0 %v6758_v41  ;;  %5076 = vmatpush1.bf16.msra.mxu1 %v6771_v45 }
 0x254   :  { %5046 = vmatprep.subr.bf16.mxu0 %v6784_v49  ;;  %5078 = vmatprep.subr.bf16.mxu1 %v6797_v53 }
 0x257   :  { %5048 = vmatpush1.bf16.msra.mxu0 %v6807_v56  ;;  %5080 = vmatpush1.bf16.msra.mxu1 %v6820_v60 }
 0x258   :  { %5050 = vmatprep.subr.bf16.mxu0 %v6833_v0  ;;  %5082 = vmatprep.subr.bf16.mxu1 %v6843_v4 }
 0x25b   :  { %5052 = vmatpush1.bf16.msra.mxu0 %v6853_v7  ;;  %5084 = vmatpush1.bf16.msra.mxu1 %v6863_v12 }
 0x25c   :  { %5054 = vmatprep.subr.bf16.mxu0 %v6876_v17  ;;  %5086 = vmatprep.subr.bf16.mxu1 %v6886_v21 }
 0x25f   :  { %5056 = vmatpush1.bf16.msra.mxu0 %v6896_v26  ;;  %5088 = vmatpush1.bf16.msra.mxu1 %v6906_v30 }
 0x260   :  { %5058 = vmatprep.subr.bf16.mxu0 %v6919_v35  ;;  %5090 = vmatprep.subr.bf16.mxu1 %v6929_v40 }
 0x263   :  { %5060 = vmatpush1.bf16.msra.mxu0 %v6939_v44  ;;  %5092 = vmatpush1.bf16.msra.mxu1 %v6952_v50 }
 0x264   :  { %5062 = vmatprep.subr.bf16.mxu0 %v6965_v55  ;;  %5094 = vmatprep.subr.bf16.mxu1 %v6978_v61 }
 0x267   :  { %5064 = vmatpush1.bf16.msra.mxu0 %v6988_v1  ;;  %5096 = vmatpush1.bf16.msra.mxu1 %v6992_v2 }
 0x268   :  { %5098 = vmatprep.subr.bf16.mxu0 %v6994_v5  ;;  %5130 = vmatprep.subr.bf16.mxu1 %v7007_v13  ;;  %v8909_v13 = vld [vmem:[#allocation97_spill] sm:$0xff] }
 0x26a   :  { %1581 = vmatmul.mubr.f32.vlgmr.msra.gmra.mrb[4].mxu0 %v1203_v9  ;;  %1652 = vmatmul.mubr.f32.vlgmr.msra.gmra.mrb[4].mxu1 %v1203_v9  ;;  %v8888_v9 = vld [vmem:[#allocation43_spill] sm:$0xff] }
 0x26b   :  { %5100 = vmatpush1.bf16.msra.mxu0 %v7028_v25  ;;  %5132 = vmatpush1.bf16.msra.mxu1 %v7032_v27  ;;  %v8908_v27 = vld [vmem:[#allocation93_spill] sm:$0xff] }
 0x26c   :  { %5102 = vmatprep.subr.bf16.mxu0 %v7034_v29  ;;  %5134 = vmatprep.subr.bf16.mxu1 %v7046_v38  ;;  %v8889_v38 = vld [vmem:[#allocation44_spill] sm:$0xff]  ;;  %v8890_v29 = vld [vmem:[#allocation45_spill] sm:$0xff] }
 0x26d   :  { %1750 = vmatprep.mubr.f32.mxu0 %v8788_v22  ;;  %1821 = vmatprep.mubr.f32.mxu1 %v8788_v22 }
 0x26f   :  { %5104 = vmatpush1.bf16.msra.mxu0 %v7066_v48  ;;  %5136 = vmatpush1.bf16.msra.mxu1 %v7070_v51  ;;  %v8891_v48 = vld [vmem:[#allocation46_spill] sm:$0xff]  ;;  %v8892_v51 = vld [vmem:[#allocation47_spill] sm:$0xff] }
 0x270   :  { %5106 = vmatprep.subr.bf16.mxu0 %v7072_v52  ;;  %5138 = vmatprep.subr.bf16.mxu1 %v7084_v59  ;;  %v8893_v52 = vld [vmem:[#allocation48_spill] sm:$0xff]  ;;  %v8894_v59 = vld [vmem:[#allocation49_spill] sm:$0xff] }
 0x273   :  { %5108 = vmatpush1.bf16.msra.mxu0 %v7104_v14  ;;  %5140 = vmatpush1.bf16.msra.mxu1 %v7108_v16  ;;  %v8895_v14 = vld [vmem:[#allocation50_spill] sm:$0xff]  ;;  %v8896_v16 = vld [vmem:[#allocation51_spill] sm:$0xff] }
 0x274   :  { %5110 = vmatprep.subr.bf16.mxu0 %v8886_v10  ;;  %5142 = vmatprep.subr.bf16.mxu1 %v8887_v39  ;;  %v8897_v10 = vld [vmem:[#allocation52_spill] sm:$0xff]  ;;  %v8898_v39 = vld [vmem:[#allocation53_spill] sm:$0xff] }
 0x277   :  { %5112 = vmatpush1.bf16.msra.mxu0 %v8888_v9  ;;  %5144 = vmatpush1.bf16.msra.mxu1 %v8889_v38  ;;  %v8899_v9 = vld [vmem:[#allocation54_spill] sm:$0xff]  ;;  %v8900_v38 = vld [vmem:[#allocation55_spill] sm:$0xff] }
 0x278   :  { %5114 = vmatprep.subr.bf16.mxu0 %v8890_v29  ;;  %5146 = vmatprep.subr.bf16.mxu1 %v8891_v48  ;;  %v8901_v29 = vld [vmem:[#allocation56_spill] sm:$0xff]  ;;  %v8902_v48 = vld [vmem:[#allocation57_spill] sm:$0xff] }
 0x27b   :  { %5116 = vmatpush1.bf16.msra.mxu0 %v8892_v51  ;;  %5148 = vmatpush1.bf16.msra.mxu1 %v8893_v52  ;;  %v8903_v51 = vld [vmem:[#allocation58_spill] sm:$0xff]  ;;  %v8904_v52 = vld [vmem:[#allocation59_spill] sm:$0xff] }
 0x27c   :  { %5118 = vmatprep.subr.bf16.mxu0 %v8894_v59  ;;  %5150 = vmatprep.subr.bf16.mxu1 %v8895_v14  ;;  %v8905_v59 = vld [vmem:[#allocation60_spill] sm:$0xff]  ;;  %v8906_v14 = vld [vmem:[#allocation61_spill] sm:$0xff] }
 0x27f   :  { %5120 = vmatpush1.bf16.msra.mxu0 %v8896_v16  ;;  %5152 = vmatpush1.bf16.msra.mxu1 %v8897_v10  ;;  %v8907_v16 = vld [vmem:[#allocation62_spill] sm:$0xff] }
 0x280   :  { %5122 = vmatprep.subr.bf16.mxu0 %v8898_v39  ;;  %5154 = vmatprep.subr.bf16.mxu1 %v8899_v9 }
 0x283   :  { %5124 = vmatpush1.bf16.msra.mxu0 %v8900_v38  ;;  %5156 = vmatpush1.bf16.msra.mxu1 %v8901_v29 }
 0x284   :  { %5126 = vmatprep.subr.bf16.mxu0 %v8902_v48  ;;  %5158 = vmatprep.subr.bf16.mxu1 %v8903_v51  ;;  %v8910_v51 = vld [vmem:[#allocation98_spill] sm:$0xff] }
 0x287   :  { %5128 = vmatpush1.bf16.msra.mxu0 %v8904_v52  ;;  %5160 = vmatpush1.bf16.msra.mxu1 %v8905_v59  ;;  %v8911_v59 = vld [vmem:[#allocation99_spill] sm:$0xff] }
 0x288   :  { %5162 = vmatprep.subr.bf16.mxu0 %v8906_v14  ;;  %5194 = vmatprep.subr.bf16.mxu1 %v8907_v16 }
 0x31d   :  { %v1412_v10 = vpop.f32.mrb[18].mxu0  ;;  %v1483_v39 = vpop.f32.mrb[18].mxu1 }
 0x31e   :  { %v1488_v9 = vadd.f32 %v1412_v10, %v8908_v27  ;;  %v1414_v25 = vpop.f32.mrb[19].mxu0  ;;  %v1485_v38 = vpop.f32.mrb[19].mxu1  ;;  %v1490_v1 = vadd.f32 %v1483_v39, %v8911_v59  ;;  %v8913_v59 = vld [vmem:[#allocation94_spill] sm:$0xff] }
 0x31f   :  { %v1489_v29 = vadd.f32 %v1414_v25, %v8909_v13  ;;  %v1491_v52 = vadd.f32 %v1485_v38, %v8910_v51 }
 0x320   :  { %v4555_v5 = vmul.f32 -1.442695, %v1488_v9 }
 0x321   :  { %v4556_v48 = vmul.f32 -1.442695, %v1489_v29  ;;  %v4557_v2 = vmul.f32 -1.442695, %v1491_v52 }
 0x322   :  { %6356 = vpow2.f32 %v4555_v5 }
 0x323   :  { %6358 = vpow2.f32 %v4556_v48  ;;  %v8912_v48 = vld [vmem:[#allocation100_spill] sm:$0xff] }
 0x324   :  { %6360 = vpow2.f32 %v4557_v2 }
 0x325   :  { %6362 = vtanh.f32 %v1490_v1 }
 0x32c   :  { %v6357_v14 = vpop.eup %6356 }
 0x32d   :  { %v6359_v61 = vpop.eup %6358  ;;  %v1495_v16 = vadd.f32 1.0, %v6357_v14 }
 0x32e   :  { %v1501_v55 = vadd.f32 1.0, %v6359_v61  ;;  %v6361_v10 = vpop.eup %6360 }
 0x32f   :  { %6364 = vrcp.f32 %v1495_v16  ;;  %v6363_v27 = vpop.eup %6362  ;;  %v1508_v5 = vadd.f32 1.0, %v6361_v10 }
 0x330   :  { %6366 = vrcp.f32 %v1501_v55 }
 0x331   :  { %6368 = vrcp.f32 %v1508_v5 }
 0x339   :  { %v6365_v25 = vpop.eup %6364 }
 0x33a   :  { %v6367_v9 = vpop.eup %6366  ;;  %v1512_v29 = vmul.f32 %v6365_v25, %v6363_v27 }
 0x33b   :  { %v1511_v13 = vmul.f32 %v6367_v9, %v8912_v48  ;;  %v6369_v10 = vpop.eup %6368 }
 0x33d   :  { %v7816_v38 = vadd.f32 %v1512_v29, %v1511_v13  ;;  %v1582_v52 = vpop.f32.mrb[4].mxu0  ;;  %v1653_v39 = vpop.f32.mrb[4].mxu1 }
 0x33e   :  { %v6213_v14 = vadd.f32 %v1582_v52, %v8913_v59  ;;  %v1584_v2 = vpop.f32.mrb[5].mxu0  ;;  %v1655_v1 = vpop.f32.mrb[5].mxu1  ;;  %v6229_v9 = vadd.f32 %v1653_v39, %v7601_v11  ;;  %v8916_v39 = vld [vmem:[#allocation67_spill] sm:$0xff] }
 0x33f   :  { %v6214_v61 = vadd.f32 %v1584_v2, %v8852_v18  ;;  %6370 = vtanh.f32 %v7816_v38  ;;  %v6230_v27 = vadd.f32 %v1655_v1, %v8853_v42  ;;  %v8914_v2 = vld [vmem:[#allocation65_spill] sm:$0xff]  ;;  %v8915_v1 = vld [vmem:[#allocation66_spill] sm:$0xff] }
 0x340   :  { %v4558_v55 = vmul.f32 -1.442695, %v6213_v14 }
 0x341   :  { %v4559_v16 = vmul.f32 -1.442695, %v6214_v61  ;;  %v4560_v25 = vmul.f32 -1.442695, %v6230_v27  ;;  %v8917_v61 = vld [vmem:[#allocation68_spill] sm:$0xff]  ;;  %v8920_v27 = vld [vmem:[#allocation71_spill] sm:$0xff] }
 0x342   :  { %6372 = vpow2.f32 %v4558_v55  ;;  %v8918_v55 = vld [vmem:[#allocation69_spill] sm:$0xff] }
 0x343   :  { %6374 = vpow2.f32 %v4559_v16  ;;  %v8919_v16 = vld [vmem:[#allocation70_spill] sm:$0xff] }
 0x344   :  { %6376 = vpow2.f32 %v4560_v25  ;;  %v8923_v25 = vld [vmem:[#allocation74_spill] sm:$0xff] }
 0x345   :  { %6378 = vtanh.f32 %v6229_v9 }
 0x349   :  { %v6371_v13 = vpop.eup %6370 }
 0x34a   :  { %v1515_v29 = vmul.f32 %v6371_v13, %v6369_v10  ;;  %v8921_v10 = vld [vmem:[#allocation72_spill] sm:$0xff]  ;;  %v8922_v13 = vld [vmem:[#allocation73_spill] sm:$0xff] }
 0x34c   :  { %v6373_v5 = vpop.eup %6372  ;;  %1751 = vmatmul.mubr.f32.vlgmr.msra.gmra.mrb[20].mxu0 %v1515_v29  ;;  %1822 = vmatmul.mubr.f32.vlgmr.msra.gmra.mrb[20].mxu1 %v1515_v29 }
 0x34d   :  { %v6375_v48 = vpop.eup %6374  ;;  %v1665_v52 = vadd.f32 1.0, %v6373_v5  ;;  %5164 = vmatpush1.bf16.msra.mxu0 %v8854_v46  ;;  %5196 = vmatpush1.bf16.msra.mxu1 %v8855_v47 }
 0x34e   :  { %v1671_v14 = vadd.f32 1.0, %v6375_v48  ;;  %5166 = vmatprep.subr.bf16.mxu0 %v8914_v2  ;;  %5198 = vmatprep.subr.bf16.mxu1 %v8915_v1  ;;  %v6377_v9 = vpop.eup %6376  ;;  %v8924_v48 = vld [vmem:[#allocation75_spill] sm:$0xff] }
 0x34f   :  { %6380 = vrcp.f32 %v1665_v52  ;;  %1892 = vmatprep.mubr.f32.mxu0 %v8788_v22  ;;  %1963 = vmatprep.mubr.f32.mxu1 %v8788_v22  ;;  %v6379_v29 = vpop.eup %6378 }
 0x350   :  { %6382 = vrcp.f32 %v1671_v14 }
 0x351   :  { %5168 = vmatpush1.bf16.msra.mxu0 %v8916_v39  ;;  %5200 = vmatpush1.bf16.msra.mxu1 %v8917_v61 }
 0x352   :  { %5170 = vmatprep.subr.bf16.mxu0 %v8918_v55  ;;  %5202 = vmatprep.subr.bf16.mxu1 %v8919_v16  ;;  %v1678_v55 = vadd.f32 1.0, %v6377_v9  ;;  %v8927_v16 = vld [vmem:[#allocation81_spill] sm:$0xff]  ;;  %v8929_v9 = vld [vmem:[#allocation83_spill] sm:$0xff] }
 0x354   :  { %6384 = vrcp.f32 %v1678_v55 }
 0x355   :  { %5172 = vmatpush1.bf16.msra.mxu0 %v8920_v27  ;;  %5204 = vmatpush1.bf16.msra.mxu1 %v8921_v10 }
 0x356   :  { %5174 = vmatprep.subr.bf16.mxu0 %v8922_v13  ;;  %5206 = vmatprep.subr.bf16.mxu1 %v8923_v25  ;;  %v8925_v13 = vld [vmem:[#allocation79_spill] sm:$0xff]  ;;  %v8926_v25 = vld [vmem:[#allocation80_spill] sm:$0xff] }
 0x359   :  { %v6381_v5 = vpop.eup %6380  ;;  %5176 = vmatpush1.bf16.msra.mxu0 %v8924_v48  ;;  %5208 = vmatpush1.bf16.msra.mxu1 %v8867_v3  ;;  %v8928_v48 = vld [vmem:[#allocation82_spill] sm:$0xff] }
 0x35a   :  { %v6383_v52 = vpop.eup %6382  ;;  %v1682_v14 = vmul.f32 %v6381_v5, %v6379_v29  ;;  %5178 = vmatprep.subr.bf16.mxu0 %v8868_v33  ;;  %5210 = vmatprep.subr.bf16.mxu1 %v8869_v6  ;;  %v8930_v29 = vld [vmem:[#allocation84_spill] sm:$0xff]  ;;  %v8931_v5 = vld [vmem:[#allocation85_spill] sm:$0xff] }
 0x35b   :  { %v1681_v10 = vmul.f32 %v6383_v52, %v7724_v57  ;;  %v8932_v52 = vld [vmem:[#allocation25_spill] sm:$0xff] }
 0x35d   :  { %v7842_v27 = vadd.f32 %v1682_v14, %v1681_v10  ;;  %5180 = vmatpush1.bf16.msra.mxu0 %v8925_v13  ;;  %5212 = vmatpush1.bf16.msra.mxu1 %v8926_v25  ;;  %v8933_v14 = vld [vmem:[#allocation26_spill] sm:$0xff] }
 0x35e   :  { %5182 = vmatprep.subr.bf16.mxu0 %v8927_v16  ;;  %5214 = vmatprep.subr.bf16.mxu1 %v8928_v48  ;;  %v6385_v57 = vpop.eup %6384 }
 0x35f   :  { %6386 = vtanh.f32 %v7842_v27 }
 0x361   :  { %5184 = vmatpush1.bf16.msra.mxu0 %v8929_v9  ;;  %5216 = vmatpush1.bf16.msra.mxu1 %v8930_v29 }
 0x362   :  { %5186 = vmatprep.subr.bf16.mxu0 %v8931_v5  ;;  %5218 = vmatprep.subr.bf16.mxu1 %v8877_v34 }
 0x365   :  { %5188 = vmatpush1.bf16.msra.mxu0 %v8878_v43  ;;  %5220 = vmatpush1.bf16.msra.mxu1 %v8879_v63 }
 0x366   :  { %5190 = vmatprep.subr.bf16.mxu0 %v8880_v58  ;;  %5222 = vmatprep.subr.bf16.mxu1 %v8881_v62 }
 0x369   :  { %v6387_v55 = vpop.eup %6386  ;;  %5192 = vmatpush1.bf16.msra.mxu0 %v8882_v31  ;;  %5224 = vmatpush1.bf16.msra.mxu1 %v8883_v8 }
 0x36a   :  { %5226 = vmatprep.subr.bf16.mxu0 %v8884_v20  ;;  %5258 = vmatprep.subr.bf16.mxu1 %v8885_v54  ;;  %v1685_v10 = vmul.f32 %v6387_v55, %v6385_v57  ;;  %v8934_v57 = vld [vmem:[#allocation27_spill] sm:$0xff]  ;;  %v8935_v55 = vld [vmem:[#allocation28_spill] sm:$0xff] }
 0x36c   :  { %1893 = vmatmul.mubr.f32.vlgmr.msra.gmra.mrb[20].mxu0 %v1685_v10  ;;  %1964 = vmatmul.mubr.f32.vlgmr.msra.gmra.mrb[20].mxu1 %v1685_v10 }
 0x36d   :  { %5228 = vmatpush1.bf16.msra.mxu0 %v6675_v15  ;;  %5260 = vmatpush1.bf16.msra.mxu1 %v6690_v19 }
 0x36e   :  { %5230 = vmatprep.subr.bf16.mxu0 %v6702_v23  ;;  %5262 = vmatprep.subr.bf16.mxu1 %v6704_v24 }
 0x36f   :  { %2062 = vmatprep.mubr.f32.mxu0 %v8788_v22  ;;  %2133 = vmatprep.mubr.f32.mxu1 %v8788_v22 }
 0x371   :  { %5232 = vmatpush1.bf16.msra.mxu0 %v6717_v28  ;;  %5264 = vmatpush1.bf16.msra.mxu1 %v6730_v32 }
 0x372   :  { %5234 = vmatprep.subr.bf16.mxu0 %v6743_v36  ;;  %5266 = vmatprep.subr.bf16.mxu1 %v6745_v37 }
 0x375   :  { %5236 = vmatpush1.bf16.msra.mxu0 %v6758_v41  ;;  %5268 = vmatpush1.bf16.msra.mxu1 %v6771_v45 }
 0x376   :  { %5238 = vmatprep.subr.bf16.mxu0 %v6784_v49  ;;  %5270 = vmatprep.subr.bf16.mxu1 %v6797_v53 }
 0x379   :  { %5240 = vmatpush1.bf16.msra.mxu0 %v6807_v56  ;;  %5272 = vmatpush1.bf16.msra.mxu1 %v6820_v60 }
 0x37a   :  { %5242 = vmatprep.subr.bf16.mxu0 %v6833_v0  ;;  %5274 = vmatprep.subr.bf16.mxu1 %v6843_v4 }
 0x37d   :  { %5244 = vmatpush1.bf16.msra.mxu0 %v6853_v7  ;;  %5276 = vmatpush1.bf16.msra.mxu1 %v6863_v12  ;;  %v8971_v12 = vld [vmem:[#allocation97_spill] sm:$0xff] }
 0x37e   :  { %5246 = vmatprep.subr.bf16.mxu0 %v6876_v17  ;;  %5278 = vmatprep.subr.bf16.mxu1 %v6886_v21  ;;  %v8936_v21 = vld [vmem:[#allocation29_spill] sm:$0xff] }
 0x381   :  { %5248 = vmatpush1.bf16.msra.mxu0 %v6896_v26  ;;  %5280 = vmatpush1.bf16.msra.mxu1 %v6906_v30  ;;  %v8937_v26 = vld [vmem:[#allocation30_spill] sm:$0xff]  ;;  %v8970_v30 = vld [vmem:[#allocation93_spill] sm:$0xff] }
 0x382   :  { %5250 = vmatprep.subr.bf16.mxu0 %v6919_v35  ;;  %5282 = vmatprep.subr.bf16.mxu1 %v6929_v40  ;;  %v8938_v35 = vld [vmem:[#allocation31_spill] sm:$0xff]  ;;  %v8939_v40 = vld [vmem:[#allocation32_spill] sm:$0xff] }
 0x385   :  { %5252 = vmatpush1.bf16.msra.mxu0 %v6939_v44  ;;  %5284 = vmatpush1.bf16.msra.mxu1 %v6952_v50  ;;  %v8940_v44 = vld [vmem:[#allocation33_spill] sm:$0xff]  ;;  %v8941_v50 = vld [vmem:[#allocation34_spill] sm:$0xff] }
 0x386   :  { %5254 = vmatprep.subr.bf16.mxu0 %v8932_v52  ;;  %5286 = vmatprep.subr.bf16.mxu1 %v8933_v14  ;;  %v8951_v14 = vld [vmem:[#allocation44_spill] sm:$0xff]  ;;  %v8952_v52 = vld [vmem:[#allocation45_spill] sm:$0xff] }
 0x389   :  { %5256 = vmatpush1.bf16.msra.mxu0 %v8934_v57  ;;  %5288 = vmatpush1.bf16.msra.mxu1 %v8935_v55  ;;  %v8942_v57 = vld [vmem:[#allocation35_spill] sm:$0xff]  ;;  %v8943_v55 = vld [vmem:[#allocation36_spill] sm:$0xff] }
 0x38a   :  { %5290 = vmatprep.subr.bf16.mxu0 %v8936_v21  ;;  %5322 = vmatprep.subr.bf16.mxu1 %v8937_v26  ;;  %v8944_v21 = vld [vmem:[#allocation37_spill] sm:$0xff]  ;;  %v8945_v26 = vld [vmem:[#allocation38_spill] sm:$0xff] }
 0x38c   :  { %2063 = vmatmul.mubr.f32.vlgmr.msra.gmra.mrb[6].mxu0 %v1685_v10  ;;  %2134 = vmatmul.mubr.f32.vlgmr.msra.gmra.mrb[6].mxu1 %v1685_v10  ;;  %v8946_v10 = vld [vmem:[#allocation39_spill] sm:$0xff] }
 0x38d   :  { %5292 = vmatpush1.bf16.msra.mxu0 %v8938_v35  ;;  %5324 = vmatpush1.bf16.msra.mxu1 %v8939_v40  ;;  %v8947_v35 = vld [vmem:[#allocation40_spill] sm:$0xff]  ;;  %v8948_v40 = vld [vmem:[#allocation41_spill] sm:$0xff] }
 0x38e   :  { %5294 = vmatprep.subr.bf16.mxu0 %v8940_v44  ;;  %5326 = vmatprep.subr.bf16.mxu1 %v8941_v50  ;;  %v8949_v44 = vld [vmem:[#allocation42_spill] sm:$0xff]  ;;  %v8950_v50 = vld [vmem:[#allocation43_spill] sm:$0xff] }
 0x38f   :  { %2232 = vmatprep.mubr.f32.mxu0 %v8788_v22  ;;  %2303 = vmatprep.mubr.f32.mxu1 %v8788_v22 }
 0x391   :  { %5296 = vmatpush1.bf16.msra.mxu0 %v8942_v57  ;;  %5328 = vmatpush1.bf16.msra.mxu1 %v8943_v55  ;;  %v8953_v57 = vld [vmem:[#allocation46_spill] sm:$0xff]  ;;  %v8954_v55 = vld [vmem:[#allocation47_spill] sm:$0xff] }
 0x392   :  { %5298 = vmatprep.subr.bf16.mxu0 %v8944_v21  ;;  %5330 = vmatprep.subr.bf16.mxu1 %v8945_v26  ;;  %v8955_v21 = vld [vmem:[#allocation48_spill] sm:$0xff]  ;;  %v8956_v26 = vld [vmem:[#allocation49_spill] sm:$0xff] }
 0x395   :  { %5300 = vmatpush1.bf16.msra.mxu0 %v8946_v10  ;;  %5332 = vmatpush1.bf16.msra.mxu1 %v8947_v35  ;;  %v8957_v10 = vld [vmem:[#allocation50_spill] sm:$0xff]  ;;  %v8958_v35 = vld [vmem:[#allocation51_spill] sm:$0xff] }
 0x396   :  { %5302 = vmatprep.subr.bf16.mxu0 %v8948_v40  ;;  %5334 = vmatprep.subr.bf16.mxu1 %v8949_v44  ;;  %v8959_v40 = vld [vmem:[#allocation52_spill] sm:$0xff]  ;;  %v8960_v44 = vld [vmem:[#allocation53_spill] sm:$0xff] }
 0x399   :  { %5304 = vmatpush1.bf16.msra.mxu0 %v8950_v50  ;;  %5336 = vmatpush1.bf16.msra.mxu1 %v8951_v14  ;;  %v8961_v50 = vld [vmem:[#allocation54_spill] sm:$0xff]  ;;  %v8962_v14 = vld [vmem:[#allocation55_spill] sm:$0xff] }
 0x39a   :  { %5306 = vmatprep.subr.bf16.mxu0 %v8952_v52  ;;  %5338 = vmatprep.subr.bf16.mxu1 %v8953_v57  ;;  %v8963_v52 = vld [vmem:[#allocation56_spill] sm:$0xff]  ;;  %v8964_v57 = vld [vmem:[#allocation57_spill] sm:$0xff] }
 0x39d   :  { %5308 = vmatpush1.bf16.msra.mxu0 %v8954_v55  ;;  %5340 = vmatpush1.bf16.msra.mxu1 %v8955_v21  ;;  %v8965_v55 = vld [vmem:[#allocation58_spill] sm:$0xff]  ;;  %v8966_v21 = vld [vmem:[#allocation59_spill] sm:$0xff] }
 0x39e   :  { %5310 = vmatprep.subr.bf16.mxu0 %v8956_v26  ;;  %5342 = vmatprep.subr.bf16.mxu1 %v8957_v10  ;;  %v8967_v26 = vld [vmem:[#allocation60_spill] sm:$0xff]  ;;  %v8968_v10 = vld [vmem:[#allocation61_spill] sm:$0xff] }
 0x3a1   :  { %5312 = vmatpush1.bf16.msra.mxu0 %v8958_v35  ;;  %5344 = vmatpush1.bf16.msra.mxu1 %v8959_v40  ;;  %v8969_v35 = vld [vmem:[#allocation62_spill] sm:$0xff] }
 0x3a2   :  { %5314 = vmatprep.subr.bf16.mxu0 %v8960_v44  ;;  %5346 = vmatprep.subr.bf16.mxu1 %v8961_v50 }
 0x3a5   :  { %5316 = vmatpush1.bf16.msra.mxu0 %v8962_v14  ;;  %5348 = vmatpush1.bf16.msra.mxu1 %v8963_v52 }
 0x3a6   :  { %5318 = vmatprep.subr.bf16.mxu0 %v8964_v57  ;;  %5350 = vmatprep.subr.bf16.mxu1 %v8965_v55 }
 0x3a9   :  { %5320 = vmatpush1.bf16.msra.mxu0 %v8966_v21  ;;  %5352 = vmatpush1.bf16.msra.mxu1 %v8967_v26  ;;  %v8972_v26 = vld [vmem:[#allocation99_spill] sm:$0xff] }
 0x3aa   :  { %5354 = vmatprep.subr.bf16.mxu0 %v8968_v10  ;;  %5386 = vmatprep.subr.bf16.mxu1 %v8969_v35 }
 0x43f   :  { %v1894_v40 = vpop.f32.mrb[20].mxu0  ;;  %v1965_v44 = vpop.f32.mrb[20].mxu1 }
 0x440   :  { %v1970_v50 = vadd.f32 %v1894_v40, %v8970_v30  ;;  %v1896_v17 = vpop.f32.mrb[21].mxu0  ;;  %v1967_v14 = vpop.f32.mrb[21].mxu1  ;;  %v1972_v4 = vadd.f32 %v1965_v44, %v8972_v26 }
 0x441   :  { %v1971_v52 = vadd.f32 %v1896_v17, %v8971_v12  ;;  %v1973_v21 = vadd.f32 %v1967_v14, %v8910_v51 }
 0x442   :  { %v4561_v7 = vmul.f32 -1.442695, %v1970_v50 }
 0x443   :  { %v4562_v57 = vmul.f32 -1.442695, %v1971_v52  ;;  %v4563_v55 = vmul.f32 -1.442695, %v1973_v21 }
 0x444   :  { %6388 = vpow2.f32 %v4561_v7 }
 0x445   :  { %6390 = vpow2.f32 %v4562_v57 }
 0x446   :  { %6392 = vpow2.f32 %v4563_v55 }
 0x447   :  { %6394 = vtanh.f32 %v1972_v4 }
 0x44e   :  { %v6389_v10 = vpop.eup %6388 }
 0x44f   :  { %v6391_v0 = vpop.eup %6390  ;;  %v1977_v35 = vadd.f32 1.0, %v6389_v10 }
 0x450   :  { %v1983_v60 = vadd.f32 1.0, %v6391_v0  ;;  %v6393_v40 = vpop.eup %6392 }
 0x451   :  { %6396 = vrcp.f32 %v1977_v35  ;;  %v6395_v30 = vpop.eup %6394  ;;  %v1990_v7 = vadd.f32 1.0, %v6393_v40 }
 0x452   :  { %6398 = vrcp.f32 %v1983_v60 }
 0x453   :  { %6400 = vrcp.f32 %v1990_v7 }
 0x45b   :  { %v6397_v17 = vpop.eup %6396 }
 0x45c   :  { %v6399_v50 = vpop.eup %6398  ;;  %v1994_v52 = vmul.f32 %v6397_v17, %v6395_v30 }
 0x45d   :  { %v1993_v57 = vmul.f32 %v6399_v50, %v7816_v38  ;;  %v6401_v38 = vpop.eup %6400 }
 0x45f   :  { %v7934_v14 = vadd.f32 %v1994_v52, %v1993_v57  ;;  %v2064_v21 = vpop.f32.mrb[6].mxu0  ;;  %v2135_v44 = vpop.f32.mrb[6].mxu1 }
 0x460   :  { %v6215_v10 = vadd.f32 %v2064_v21, %v8913_v59  ;;  %v2066_v55 = vpop.f32.mrb[7].mxu0  ;;  %v2137_v4 = vpop.f32.mrb[7].mxu1  ;;  %v6231_v50 = vadd.f32 %v2135_v44, %v7601_v11  ;;  %v8973_v44 = vld [vmem:[#allocation69_spill] sm:$0xff] }
 0x461   :  { %v6216_v0 = vadd.f32 %v2066_v55, %v8852_v18  ;;  %6402 = vtanh.f32 %v7934_v14  ;;  %v6232_v30 = vadd.f32 %v2137_v4, %v8853_v42  ;;  %v8974_v55 = vld [vmem:[#allocation70_spill] sm:$0xff]  ;;  %v8975_v4 = vld [vmem:[#allocation71_spill] sm:$0xff] }
 0x462   :  { %v4564_v60 = vmul.f32 -1.442695, %v6215_v10 }
 0x463   :  { %v4565_v35 = vmul.f32 -1.442695, %v6216_v0  ;;  %v4566_v17 = vmul.f32 -1.442695, %v6232_v30  ;;  %v8976_v0 = vld [vmem:[#allocation72_spill] sm:$0xff] }
 0x464   :  { %6404 = vpow2.f32 %v4564_v60  ;;  %v8977_v60 = vld [vmem:[#allocation73_spill] sm:$0xff] }
 0x465   :  { %6406 = vpow2.f32 %v4565_v35  ;;  %v8978_v35 = vld [vmem:[#allocation74_spill] sm:$0xff] }
 0x466   :  { %6408 = vpow2.f32 %v4566_v17  ;;  %v8979_v17 = vld [vmem:[#allocation75_spill] sm:$0xff] }
 0x467   :  { %6410 = vtanh.f32 %v6231_v50 }
 0x46b   :  { %v6403_v40 = vpop.eup %6402 }
 0x46c   :  { %v1997_v52 = vmul.f32 %v6403_v40, %v6401_v38 }
 0x46e   :  { %v6405_v7 = vpop.eup %6404  ;;  %2233 = vmatmul.mubr.f32.vlgmr.msra.gmra.mrb[22].mxu0 %v1997_v52  ;;  %2304 = vmatmul.mubr.f32.vlgmr.msra.gmra.mrb[22].mxu1 %v1997_v52 }
 0x46f   :  { %v6407_v57 = vpop.eup %6406  ;;  %v2147_v21 = vadd.f32 1.0, %v6405_v7  ;;  %5356 = vmatpush1.bf16.msra.mxu0 %v8854_v46  ;;  %5388 = vmatpush1.bf16.msra.mxu1 %v8855_v47 }
 0x470   :  { %v2153_v10 = vadd.f32 1.0, %v6407_v57  ;;  %5358 = vmatprep.subr.bf16.mxu0 %v8914_v2  ;;  %5390 = vmatprep.subr.bf16.mxu1 %v8915_v1  ;;  %v6409_v30 = vpop.eup %6408 }
 0x471   :  { %6412 = vrcp.f32 %v2147_v21  ;;  %2374 = vmatprep.mubr.f32.mxu0 %v8788_v22  ;;  %2445 = vmatprep.mubr.f32.mxu1 %v8788_v22  ;;  %v6411_v38 = vpop.eup %6410  ;;  %v2160_v7 = vadd.f32 1.0, %v6409_v30 }
 0x472   :  { %6414 = vrcp.f32 %v2153_v10 }
 0x473   :  { %5360 = vmatpush1.bf16.msra.mxu0 %v8916_v39  ;;  %5392 = vmatpush1.bf16.msra.mxu1 %v8917_v61  ;;  %6416 = vrcp.f32 %v2160_v7  ;;  %v8984_v7 = vld [vmem:[#allocation16_spill] sm:$0xff] }
 0x474   :  { %5362 = vmatprep.subr.bf16.mxu0 %v8973_v44  ;;  %5394 = vmatprep.subr.bf16.mxu1 %v8974_v55 }
 0x477   :  { %5364 = vmatpush1.bf16.msra.mxu0 %v8975_v4  ;;  %5396 = vmatpush1.bf16.msra.mxu1 %v8976_v0 }
 0x478   :  { %5366 = vmatprep.subr.bf16.mxu0 %v8977_v60  ;;  %5398 = vmatprep.subr.bf16.mxu1 %v8978_v35 }
 0x47b   :  { %v6413_v40 = vpop.eup %6412  ;;  %5368 = vmatpush1.bf16.msra.mxu0 %v8979_v17  ;;  %5400 = vmatpush1.bf16.msra.mxu1 %v8867_v3 }
 0x47c   :  { %v6415_v50 = vpop.eup %6414  ;;  %v2164_v52 = vmul.f32 %v6413_v40, %v6411_v38  ;;  %5370 = vmatprep.subr.bf16.mxu0 %v8868_v33  ;;  %5402 = vmatprep.subr.bf16.mxu1 %v8869_v6  ;;  %v8980_v38 = vld [vmem:[#allocation12_spill] sm:$0xff]  ;;  %v8981_v40 = vld [vmem:[#allocation13_spill] sm:$0xff] }
 0x47d   :  { %v2163_v57 = vmul.f32 %v6415_v50, %v7842_v27  ;;  %v6417_v27 = vpop.eup %6416  ;;  %v8982_v50 = vld [vmem:[#allocation14_spill] sm:$0xff] }
 0x47f   :  { %v7960_v21 = vadd.f32 %v2164_v52, %v2163_v57  ;;  %5372 = vmatpush1.bf16.msra.mxu0 %v8925_v13  ;;  %5404 = vmatpush1.bf16.msra.mxu1 %v8926_v25  ;;  %v8983_v52 = vld [vmem:[#allocation15_spill] sm:$0xff]  ;;  %v8985_v57 = vld [vmem:[#allocation17_spill] sm:$0xff] }
 0x480   :  { %5374 = vmatprep.subr.bf16.mxu0 %v8927_v16  ;;  %5406 = vmatprep.subr.bf16.mxu1 %v8928_v48 }
 0x481   :  { %6418 = vtanh.f32 %v7960_v21 }
 0x483   :  { %5376 = vmatpush1.bf16.msra.mxu0 %v8929_v9  ;;  %5408 = vmatpush1.bf16.msra.mxu1 %v8930_v29 }
 0x484   :  { %5378 = vmatprep.subr.bf16.mxu0 %v8931_v5  ;;  %5410 = vmatprep.subr.bf16.mxu1 %v8877_v34 }
 0x487   :  { %5380 = vmatpush1.bf16.msra.mxu0 %v8878_v43  ;;  %5412 = vmatpush1.bf16.msra.mxu1 %v8879_v63 }
 0x488   :  { %5382 = vmatprep.subr.bf16.mxu0 %v8880_v58  ;;  %5414 = vmatprep.subr.bf16.mxu1 %v8881_v62 }
 0x48b   :  { %v6419_v10 = vpop.eup %6418  ;;  %5384 = vmatpush1.bf16.msra.mxu0 %v8882_v31  ;;  %5416 = vmatpush1.bf16.msra.mxu1 %v8883_v8 }
 0x48c   :  { %v2167_v30 = vmul.f32 %v6419_v10, %v6417_v27  ;;  %5418 = vmatprep.subr.bf16.mxu0 %v8884_v20  ;;  %5450 = vmatprep.subr.bf16.mxu1 %v8885_v54  ;;  %v8986_v27 = vld [vmem:[#allocation18_spill] sm:$0xff]  ;;  %v8987_v10 = vld [vmem:[#allocation19_spill] sm:$0xff] }
 0x48e   :  { %2375 = vmatmul.mubr.f32.vlgmr.msra.gmra.mrb[22].mxu0 %v2167_v30  ;;  %2446 = vmatmul.mubr.f32.vlgmr.msra.gmra.mrb[22].mxu1 %v2167_v30 }
 0x48f   :  { %5420 = vmatpush1.bf16.msra.mxu0 %v6675_v15  ;;  %5452 = vmatpush1.bf16.msra.mxu1 %v6690_v19 }
 0x490   :  { %5422 = vmatprep.subr.bf16.mxu0 %v6702_v23  ;;  %5454 = vmatprep.subr.bf16.mxu1 %v6704_v24 }
 0x491   :  { %2544 = vmatprep.mubr.f32.mxu0 %v8788_v22  ;;  %2615 = vmatprep.mubr.f32.mxu1 %v8788_v22 }
 0x493   :  { %5424 = vmatpush1.bf16.msra.mxu0 %v6717_v28  ;;  %5456 = vmatpush1.bf16.msra.mxu1 %v6730_v32 }
 0x494   :  { %5426 = vmatprep.subr.bf16.mxu0 %v6743_v36  ;;  %5458 = vmatprep.subr.bf16.mxu1 %v6745_v37 }
 0x497   :  { %5428 = vmatpush1.bf16.msra.mxu0 %v6758_v41  ;;  %5460 = vmatpush1.bf16.msra.mxu1 %v6771_v45 }
 0x498   :  { %5430 = vmatprep.subr.bf16.mxu0 %v6784_v49  ;;  %5462 = vmatprep.subr.bf16.mxu1 %v6797_v53  ;;  %v8988_v49 = vld [vmem:[#allocation20_spill] sm:$0xff]  ;;  %v8989_v53 = vld [vmem:[#allocation21_spill] sm:$0xff] }
 0x49b   :  { %5432 = vmatpush1.bf16.msra.mxu0 %v6807_v56  ;;  %5464 = vmatpush1.bf16.msra.mxu1 %v8980_v38  ;;  %v8990_v56 = vld [vmem:[#allocation22_spill] sm:$0xff]  ;;  %v8991_v38 = vld [vmem:[#allocation23_spill] sm:$0xff] }
 0x49c   :  { %5434 = vmatprep.subr.bf16.mxu0 %v8981_v40  ;;  %5466 = vmatprep.subr.bf16.mxu1 %v8982_v50  ;;  %v8992_v40 = vld [vmem:[#allocation24_spill] sm:$0xff]  ;;  %v8993_v50 = vld [vmem:[#allocation25_spill] sm:$0xff] }
 0x49f   :  { %5436 = vmatpush1.bf16.msra.mxu0 %v8983_v52  ;;  %5468 = vmatpush1.bf16.msra.mxu1 %v8984_v7  ;;  %v8994_v52 = vld [vmem:[#allocation26_spill] sm:$0xff]  ;;  %v8995_v7 = vld [vmem:[#allocation27_spill] sm:$0xff] }
 0x4a0   :  { %5438 = vmatprep.subr.bf16.mxu0 %v8985_v57  ;;  %5470 = vmatprep.subr.bf16.mxu1 %v8986_v27  ;;  %v8996_v57 = vld [vmem:[#allocation28_spill] sm:$0xff]  ;;  %v8997_v27 = vld [vmem:[#allocation29_spill] sm:$0xff] }
 0x4a3   :  { %5440 = vmatpush1.bf16.msra.mxu0 %v8987_v10  ;;  %5472 = vmatpush1.bf16.msra.mxu1 %v8988_v49  ;;  %v8998_v10 = vld [vmem:[#allocation30_spill] sm:$0xff]  ;;  %v9031_v49 = vld [vmem:[#allocation93_spill] sm:$0xff] }
 0x4a4   :  { %5442 = vmatprep.subr.bf16.mxu0 %v8989_v53  ;;  %5474 = vmatprep.subr.bf16.mxu1 %v8990_v56  ;;  %v8999_v53 = vld [vmem:[#allocation31_spill] sm:$0xff]  ;;  %v9000_v56 = vld [vmem:[#allocation32_spill] sm:$0xff] }
 0x4a7   :  { %5444 = vmatpush1.bf16.msra.mxu0 %v8991_v38  ;;  %5476 = vmatpush1.bf16.msra.mxu1 %v8992_v40  ;;  %v9001_v38 = vld [vmem:[#allocation33_spill] sm:$0xff]  ;;  %v9002_v40 = vld [vmem:[#allocation34_spill] sm:$0xff] }
 0x4a8   :  { %5446 = vmatprep.subr.bf16.mxu0 %v8993_v50  ;;  %5478 = vmatprep.subr.bf16.mxu1 %v8994_v52  ;;  %v9012_v52 = vld [vmem:[#allocation44_spill] sm:$0xff]  ;;  %v9013_v50 = vld [vmem:[#allocation45_spill] sm:$0xff] }
 0x4ab   :  { %5448 = vmatpush1.bf16.msra.mxu0 %v8995_v7  ;;  %5480 = vmatpush1.bf16.msra.mxu1 %v8996_v57  ;;  %v9003_v7 = vld [vmem:[#allocation35_spill] sm:$0xff]  ;;  %v9004_v57 = vld [vmem:[#allocation36_spill] sm:$0xff] }
 0x4ac   :  { %5482 = vmatprep.subr.bf16.mxu0 %v8997_v27  ;;  %5514 = vmatprep.subr.bf16.mxu1 %v8998_v10  ;;  %v9005_v27 = vld [vmem:[#allocation37_spill] sm:$0xff]  ;;  %v9006_v10 = vld [vmem:[#allocation38_spill] sm:$0xff] }
 0x4ae   :  { %2545 = vmatmul.mubr.f32.vlgmr.msra.gmra.mrb[8].mxu0 %v2167_v30  ;;  %2616 = vmatmul.mubr.f32.vlgmr.msra.gmra.mrb[8].mxu1 %v2167_v30  ;;  %v9007_v30 = vld [vmem:[#allocation39_spill] sm:$0xff] }
 0x4af   :  { %5484 = vmatpush1.bf16.msra.mxu0 %v8999_v53  ;;  %5516 = vmatpush1.bf16.msra.mxu1 %v9000_v56  ;;  %v9008_v53 = vld [vmem:[#allocation40_spill] sm:$0xff]  ;;  %v9009_v56 = vld [vmem:[#allocation41_spill] sm:$0xff] }
 0x4b0   :  { %5486 = vmatprep.subr.bf16.mxu0 %v9001_v38  ;;  %5518 = vmatprep.subr.bf16.mxu1 %v9002_v40  ;;  %v9010_v38 = vld [vmem:[#allocation42_spill] sm:$0xff]  ;;  %v9011_v40 = vld [vmem:[#allocation43_spill] sm:$0xff] }
 0x4b1   :  { %2714 = vmatprep.mubr.f32.mxu0 %v8788_v22  ;;  %2785 = vmatprep.mubr.f32.mxu1 %v8788_v22 }
 0x4b3   :  { %5488 = vmatpush1.bf16.msra.mxu0 %v9003_v7  ;;  %5520 = vmatpush1.bf16.msra.mxu1 %v9004_v57  ;;  %v9014_v7 = vld [vmem:[#allocation46_spill] sm:$0xff]  ;;  %v9015_v57 = vld [vmem:[#allocation47_spill] sm:$0xff] }
 0x4b4   :  { %5490 = vmatprep.subr.bf16.mxu0 %v9005_v27  ;;  %5522 = vmatprep.subr.bf16.mxu1 %v9006_v10  ;;  %v9016_v27 = vld [vmem:[#allocation48_spill] sm:$0xff]  ;;  %v9017_v10 = vld [vmem:[#allocation49_spill] sm:$0xff] }
 0x4b7   :  { %5492 = vmatpush1.bf16.msra.mxu0 %v9007_v30  ;;  %5524 = vmatpush1.bf16.msra.mxu1 %v9008_v53  ;;  %v9018_v30 = vld [vmem:[#allocation50_spill] sm:$0xff]  ;;  %v9019_v53 = vld [vmem:[#allocation51_spill] sm:$0xff] }
 0x4b8   :  { %5494 = vmatprep.subr.bf16.mxu0 %v9009_v56  ;;  %5526 = vmatprep.subr.bf16.mxu1 %v9010_v38  ;;  %v9020_v56 = vld [vmem:[#allocation52_spill] sm:$0xff]  ;;  %v9021_v38 = vld [vmem:[#allocation53_spill] sm:$0xff] }
 0x4bb   :  { %5496 = vmatpush1.bf16.msra.mxu0 %v9011_v40  ;;  %5528 = vmatpush1.bf16.msra.mxu1 %v9012_v52  ;;  %v9022_v40 = vld [vmem:[#allocation54_spill] sm:$0xff]  ;;  %v9023_v52 = vld [vmem:[#allocation55_spill] sm:$0xff] }
 0x4bc   :  { %5498 = vmatprep.subr.bf16.mxu0 %v9013_v50  ;;  %5530 = vmatprep.subr.bf16.mxu1 %v9014_v7  ;;  %v9024_v50 = vld [vmem:[#allocation56_spill] sm:$0xff]  ;;  %v9025_v7 = vld [vmem:[#allocation57_spill] sm:$0xff] }
 0x4bf   :  { %5500 = vmatpush1.bf16.msra.mxu0 %v9015_v57  ;;  %5532 = vmatpush1.bf16.msra.mxu1 %v9016_v27  ;;  %v9026_v57 = vld [vmem:[#allocation58_spill] sm:$0xff]  ;;  %v9027_v27 = vld [vmem:[#allocation59_spill] sm:$0xff] }
 0x4c0   :  { %5502 = vmatprep.subr.bf16.mxu0 %v9017_v10  ;;  %5534 = vmatprep.subr.bf16.mxu1 %v9018_v30  ;;  %v9028_v10 = vld [vmem:[#allocation60_spill] sm:$0xff]  ;;  %v9029_v30 = vld [vmem:[#allocation61_spill] sm:$0xff] }
 0x4c3   :  { %5504 = vmatpush1.bf16.msra.mxu0 %v9019_v53  ;;  %5536 = vmatpush1.bf16.msra.mxu1 %v9020_v56  ;;  %v9030_v53 = vld [vmem:[#allocation62_spill] sm:$0xff] }
 0x4c4   :  { %5506 = vmatprep.subr.bf16.mxu0 %v9021_v38  ;;  %5538 = vmatprep.subr.bf16.mxu1 %v9022_v40 }
 0x4c7   :  { %5508 = vmatpush1.bf16.msra.mxu0 %v9023_v52  ;;  %5540 = vmatpush1.bf16.msra.mxu1 %v9024_v50 }
 0x4c8   :  { %5510 = vmatprep.subr.bf16.mxu0 %v9025_v7  ;;  %5542 = vmatprep.subr.bf16.mxu1 %v9026_v57 }
 0x4cb   :  { %5512 = vmatpush1.bf16.msra.mxu0 %v9027_v27  ;;  %5544 = vmatpush1.bf16.msra.mxu1 %v9028_v10 }
 0x4cc   :  { %5546 = vmatprep.subr.bf16.mxu0 %v9029_v30  ;;  %5578 = vmatprep.subr.bf16.mxu1 %v9030_v53 }
 0x561   :  { %v2376_v56 = vpop.f32.mrb[22].mxu0  ;;  %v2447_v38 = vpop.f32.mrb[22].mxu1 }
 0x562   :  { %v2452_v40 = vadd.f32 %v2376_v56, %v9031_v49  ;;  %v2378_v45 = vpop.f32.mrb[23].mxu0  ;;  %v2449_v52 = vpop.f32.mrb[23].mxu1  ;;  %v2454_v10 = vadd.f32 %v2447_v38, %v8972_v26 }
 0x563   :  { %v2453_v50 = vadd.f32 %v2378_v45, %v8971_v12  ;;  %v2455_v27 = vadd.f32 %v2449_v52, %v8910_v51 }
 0x564   :  { %v4567_v41 = vmul.f32 -1.442695, %v2452_v40 }
 0x565   :  { %v4568_v7 = vmul.f32 -1.442695, %v2453_v50  ;;  %v4569_v57 = vmul.f32 -1.442695, %v2455_v27 }
 0x566   :  { %6420 = vpow2.f32 %v4567_v41 }
 0x567   :  { %6422 = vpow2.f32 %v4568_v7 }
 0x568   :  { %6424 = vpow2.f32 %v4569_v57 }
 0x569   :  { %6426 = vtanh.f32 %v2454_v10 }
 0x570   :  { %v6421_v30 = vpop.eup %6420 }
 0x571   :  { %v6423_v37 = vpop.eup %6422  ;;  %v2459_v53 = vadd.f32 1.0, %v6421_v30 }
 0x572   :  { %v2465_v36 = vadd.f32 1.0, %v6423_v37  ;;  %v6425_v56 = vpop.eup %6424 }
 0x573   :  { %6428 = vrcp.f32 %v2459_v53  ;;  %v6427_v49 = vpop.eup %6426  ;;  %v2472_v41 = vadd.f32 1.0, %v6425_v56 }
 0x574   :  { %6430 = vrcp.f32 %v2465_v36 }
 0x575   :  { %6432 = vrcp.f32 %v2472_v41 }
 0x57d   :  { %v6429_v45 = vpop.eup %6428 }
 0x57e   :  { %v6431_v40 = vpop.eup %6430  ;;  %v2476_v50 = vmul.f32 %v6429_v45, %v6427_v49 }
 0x57f   :  { %v2475_v7 = vmul.f32 %v6431_v40, %v7934_v14  ;;  %v6433_v14 = vpop.eup %6432 }
 0x581   :  { %v8052_v52 = vadd.f32 %v2476_v50, %v2475_v7  ;;  %v2546_v27 = vpop.f32.mrb[8].mxu0  ;;  %v2617_v38 = vpop.f32.mrb[8].mxu1 }
 0x582   :  { %v6217_v30 = vadd.f32 %v2546_v27, %v8913_v59  ;;  %v2548_v57 = vpop.f32.mrb[9].mxu0  ;;  %v2619_v10 = vpop.f32.mrb[9].mxu1  ;;  %v6233_v40 = vadd.f32 %v2617_v38, %v7601_v11 }
 0x583   :  { %v6218_v37 = vadd.f32 %v2548_v57, %v8852_v18  ;;  %6434 = vtanh.f32 %v8052_v52  ;;  %v6234_v49 = vadd.f32 %v2619_v10, %v8853_v42 }
 0x584   :  { %v4570_v36 = vmul.f32 -1.442695, %v6217_v30 }
 0x585   :  { %v4571_v53 = vmul.f32 -1.442695, %v6218_v37  ;;  %v4572_v45 = vmul.f32 -1.442695, %v6234_v49 }
 0x586   :  { %6436 = vpow2.f32 %v4570_v36 }
 0x587   :  { %6438 = vpow2.f32 %v4571_v53 }
 0x588   :  { %6440 = vpow2.f32 %v4572_v45 }
 0x589   :  { %6442 = vtanh.f32 %v6233_v40  ;;  %v9032_v40 = vld [vmem:[#allocation5_spill] sm:$0xff] }
 0x58d   :  { %v6435_v56 = vpop.eup %6434 }
 0x58e   :  { %v2479_v50 = vmul.f32 %v6435_v56, %v6433_v14 }
 0x590   :  { %v6437_v41 = vpop.eup %6436  ;;  %2715 = vmatmul.mubr.f32.vlgmr.msra.gmra.mrb[24].mxu0 %v2479_v50  ;;  %2786 = vmatmul.mubr.f32.vlgmr.msra.gmra.mrb[24].mxu1 %v2479_v50  ;;  %v9033_v50 = vld [vmem:[#allocation6_spill] sm:$0xff] }
 0x591   :  { %v6439_v7 = vpop.eup %6438  ;;  %v2629_v27 = vadd.f32 1.0, %v6437_v41  ;;  %5548 = vmatpush1.bf16.msra.mxu0 %v8854_v46  ;;  %5580 = vmatpush1.bf16.msra.mxu1 %v8855_v47  ;;  %v9034_v41 = vld [vmem:[#allocation7_spill] sm:$0xff] }
 0x592   :  { %v2635_v30 = vadd.f32 1.0, %v6439_v7  ;;  %5550 = vmatprep.subr.bf16.mxu0 %v8914_v2  ;;  %5582 = vmatprep.subr.bf16.mxu1 %v8915_v1  ;;  %v6441_v38 = vpop.eup %6440  ;;  %v9035_v7 = vld [vmem:[#allocation8_spill] sm:$0xff] }
 0x593   :  { %6444 = vrcp.f32 %v2629_v27  ;;  %2856 = vmatprep.mubr.f32.mxu0 %v8788_v22  ;;  %2927 = vmatprep.mubr.f32.mxu1 %v8788_v22  ;;  %v6443_v57 = vpop.eup %6442  ;;  %v2642_v53 = vadd.f32 1.0, %v6441_v38  ;;  %v9036_v27 = vld [vmem:[#allocation9_spill] sm:$0xff]  ;;  %v9038_v38 = vld [vmem:[#allocation11_spill] sm:$0xff] }
 0x594   :  { %6446 = vrcp.f32 %v2635_v30  ;;  %v9037_v30 = vld [vmem:[#allocation10_spill] sm:$0xff] }
 0x595   :  { %5552 = vmatpush1.bf16.msra.mxu0 %v8916_v39  ;;  %5584 = vmatpush1.bf16.msra.mxu1 %v8917_v61  ;;  %6448 = vrcp.f32 %v2642_v53  ;;  %v9043_v53 = vld [vmem:[#allocation16_spill] sm:$0xff] }
 0x596   :  { %5554 = vmatprep.subr.bf16.mxu0 %v8973_v44  ;;  %5586 = vmatprep.subr.bf16.mxu1 %v8974_v55 }
 0x599   :  { %5556 = vmatpush1.bf16.msra.mxu0 %v8975_v4  ;;  %5588 = vmatpush1.bf16.msra.mxu1 %v8976_v0 }
 0x59a   :  { %5558 = vmatprep.subr.bf16.mxu0 %v8977_v60  ;;  %5590 = vmatprep.subr.bf16.mxu1 %v8978_v35 }
 0x59d   :  { %v6445_v10 = vpop.eup %6444  ;;  %5560 = vmatpush1.bf16.msra.mxu0 %v8979_v17  ;;  %5592 = vmatpush1.bf16.msra.mxu1 %v8867_v3 }
 0x59e   :  { %v6447_v37 = vpop.eup %6446  ;;  %v2646_v36 = vmul.f32 %v6445_v10, %v6443_v57  ;;  %5562 = vmatprep.subr.bf16.mxu0 %v8868_v33  ;;  %5594 = vmatprep.subr.bf16.mxu1 %v8869_v6  ;;  %v9039_v57 = vld [vmem:[#allocation12_spill] sm:$0xff]  ;;  %v9040_v10 = vld [vmem:[#allocation13_spill] sm:$0xff] }
 0x59f   :  { %v2645_v49 = vmul.f32 %v6447_v37, %v7960_v21  ;;  %v6449_v21 = vpop.eup %6448  ;;  %v9041_v37 = vld [vmem:[#allocation14_spill] sm:$0xff] }
 0x5a1   :  { %v8078_v14 = vadd.f32 %v2646_v36, %v2645_v49  ;;  %5564 = vmatpush1.bf16.msra.mxu0 %v8925_v13  ;;  %5596 = vmatpush1.bf16.msra.mxu1 %v8926_v25  ;;  %v9042_v36 = vld [vmem:[#allocation15_spill] sm:$0xff]  ;;  %v9044_v49 = vld [vmem:[#allocation17_spill] sm:$0xff] }
 0x5a2   :  { %5566 = vmatprep.subr.bf16.mxu0 %v8927_v16  ;;  %5598 = vmatprep.subr.bf16.mxu1 %v8928_v48 }
 0x5a3   :  { %6450 = vtanh.f32 %v8078_v14 }
 0x5a5   :  { %5568 = vmatpush1.bf16.msra.mxu0 %v8929_v9  ;;  %5600 = vmatpush1.bf16.msra.mxu1 %v8930_v29 }
 0x5a6   :  { %5570 = vmatprep.subr.bf16.mxu0 %v8931_v5  ;;  %5602 = vmatprep.subr.bf16.mxu1 %v8877_v34 }
 0x5a9   :  { %5572 = vmatpush1.bf16.msra.mxu0 %v8878_v43  ;;  %5604 = vmatpush1.bf16.msra.mxu1 %v8879_v63 }
 0x5aa   :  { %5574 = vmatprep.subr.bf16.mxu0 %v8880_v58  ;;  %5606 = vmatprep.subr.bf16.mxu1 %v8881_v62 }
 0x5ad   :  { %v6451_v56 = vpop.eup %6450  ;;  %5576 = vmatpush1.bf16.msra.mxu0 %v8882_v31  ;;  %5608 = vmatpush1.bf16.msra.mxu1 %v8883_v8 }
 0x5ae   :  { %5610 = vmatprep.subr.bf16.mxu0 %v8884_v20  ;;  %5642 = vmatprep.subr.bf16.mxu1 %v8885_v54  ;;  %v2649_v45 = vmul.f32 %v6451_v56, %v6449_v21  ;;  %v9045_v21 = vld [vmem:[#allocation18_spill] sm:$0xff]  ;;  %v9046_v56 = vld [vmem:[#allocation19_spill] sm:$0xff] }
 0x5b0   :  { %2857 = vmatmul.mubr.f32.vlgmr.msra.gmra.mrb[24].mxu0 %v2649_v45  ;;  %2928 = vmatmul.mubr.f32.vlgmr.msra.gmra.mrb[24].mxu1 %v2649_v45 }
 0x5b1   :  { %5612 = vmatpush1.bf16.msra.mxu0 %v6675_v15  ;;  %5644 = vmatpush1.bf16.msra.mxu1 %v6690_v19 }
 0x5b2   :  { %5614 = vmatprep.subr.bf16.mxu0 %v6702_v23  ;;  %5646 = vmatprep.subr.bf16.mxu1 %v6704_v24 }
 0x5b3   :  { %3026 = vmatprep.mubr.f32.mxu0 %v8788_v22  ;;  %3097 = vmatprep.mubr.f32.mxu1 %v8788_v22 }
 0x5b5   :  { %5616 = vmatpush1.bf16.msra.mxu0 %v6717_v28  ;;  %5648 = vmatpush1.bf16.msra.mxu1 %v6730_v32 }
 0x5b6   :  { %5618 = vmatprep.subr.bf16.mxu0 %v9032_v40  ;;  %5650 = vmatprep.subr.bf16.mxu1 %v9033_v50 }
 0x5b9   :  { %5620 = vmatpush1.bf16.msra.mxu0 %v9034_v41  ;;  %5652 = vmatpush1.bf16.msra.mxu1 %v9035_v7 }
 0x5ba   :  { %5622 = vmatprep.subr.bf16.mxu0 %v9036_v27  ;;  %5654 = vmatprep.subr.bf16.mxu1 %v9037_v30  ;;  %v9047_v27 = vld [vmem:[#allocation20_spill] sm:$0xff]  ;;  %v9048_v30 = vld [vmem:[#allocation21_spill] sm:$0xff] }
 0x5bd   :  { %5624 = vmatpush1.bf16.msra.mxu0 %v9038_v38  ;;  %5656 = vmatpush1.bf16.msra.mxu1 %v9039_v57  ;;  %v9049_v38 = vld [vmem:[#allocation22_spill] sm:$0xff]  ;;  %v9050_v57 = vld [vmem:[#allocation23_spill] sm:$0xff] }
 0x5be   :  { %5626 = vmatprep.subr.bf16.mxu0 %v9040_v10  ;;  %5658 = vmatprep.subr.bf16.mxu1 %v9041_v37  ;;  %v9051_v10 = vld [vmem:[#allocation24_spill] sm:$0xff]  ;;  %v9052_v37 = vld [vmem:[#allocation25_spill] sm:$0xff] }
 0x5c1   :  { %5628 = vmatpush1.bf16.msra.mxu0 %v9042_v36  ;;  %5660 = vmatpush1.bf16.msra.mxu1 %v9043_v53  ;;  %v9053_v36 = vld [vmem:[#allocation26_spill] sm:$0xff]  ;;  %v9054_v53 = vld [vmem:[#allocation27_spill] sm:$0xff] }
 0x5c2   :  { %5630 = vmatprep.subr.bf16.mxu0 %v9044_v49  ;;  %5662 = vmatprep.subr.bf16.mxu1 %v9045_v21  ;;  %v9055_v49 = vld [vmem:[#allocation28_spill] sm:$0xff]  ;;  %v9056_v21 = vld [vmem:[#allocation29_spill] sm:$0xff] }
 0x5c5   :  { %5632 = vmatpush1.bf16.msra.mxu0 %v9046_v56  ;;  %5664 = vmatpush1.bf16.msra.mxu1 %v9047_v27  ;;  %v9057_v56 = vld [vmem:[#allocation30_spill] sm:$0xff]  ;;  %v9090_v27 = vld [vmem:[#allocation93_spill] sm:$0xff] }
 0x5c6   :  { %5634 = vmatprep.subr.bf16.mxu0 %v9048_v30  ;;  %5666 = vmatprep.subr.bf16.mxu1 %v9049_v38  ;;  %v9058_v30 = vld [vmem:[#allocation31_spill] sm:$0xff]  ;;  %v9059_v38 = vld [vmem:[#allocation32_spill] sm:$0xff] }
 0x5c9   :  { %5636 = vmatpush1.bf16.msra.mxu0 %v9050_v57  ;;  %5668 = vmatpush1.bf16.msra.mxu1 %v9051_v10  ;;  %v9060_v57 = vld [vmem:[#allocation33_spill] sm:$0xff]  ;;  %v9061_v10 = vld [vmem:[#allocation34_spill] sm:$0xff] }
 0x5ca   :  { %5638 = vmatprep.subr.bf16.mxu0 %v9052_v37  ;;  %5670 = vmatprep.subr.bf16.mxu1 %v9053_v36  ;;  %v9071_v36 = vld [vmem:[#allocation44_spill] sm:$0xff]  ;;  %v9072_v37 = vld [vmem:[#allocation45_spill] sm:$0xff] }
 0x5cd   :  { %5640 = vmatpush1.bf16.msra.mxu0 %v9054_v53  ;;  %5672 = vmatpush1.bf16.msra.mxu1 %v9055_v49  ;;  %v9062_v53 = vld [vmem:[#allocation35_spill] sm:$0xff]  ;;  %v9063_v49 = vld [vmem:[#allocation36_spill] sm:$0xff] }
 0x5ce   :  { %5674 = vmatprep.subr.bf16.mxu0 %v9056_v21  ;;  %5706 = vmatprep.subr.bf16.mxu1 %v9057_v56  ;;  %v9064_v21 = vld [vmem:[#allocation37_spill] sm:$0xff]  ;;  %v9065_v56 = vld [vmem:[#allocation38_spill] sm:$0xff] }
 0x5d0   :  { %3027 = vmatmul.mubr.f32.vlgmr.msra.gmra.mrb[10].mxu0 %v2649_v45  ;;  %3098 = vmatmul.mubr.f32.vlgmr.msra.gmra.mrb[10].mxu1 %v2649_v45  ;;  %v9066_v45 = vld [vmem:[#allocation39_spill] sm:$0xff] }
 0x5d1   :  { %5676 = vmatpush1.bf16.msra.mxu0 %v9058_v30  ;;  %5708 = vmatpush1.bf16.msra.mxu1 %v9059_v38  ;;  %v9067_v30 = vld [vmem:[#allocation40_spill] sm:$0xff]  ;;  %v9068_v38 = vld [vmem:[#allocation41_spill] sm:$0xff] }
 0x5d2   :  { %5678 = vmatprep.subr.bf16.mxu0 %v9060_v57  ;;  %5710 = vmatprep.subr.bf16.mxu1 %v9061_v10  ;;  %v9069_v57 = vld [vmem:[#allocation42_spill] sm:$0xff]  ;;  %v9070_v10 = vld [vmem:[#allocation43_spill] sm:$0xff] }
 0x5d3   :  { %3196 = vmatprep.mubr.f32.mxu0 %v8788_v22  ;;  %3267 = vmatprep.mubr.f32.mxu1 %v8788_v22 }
 0x5d5   :  { %5680 = vmatpush1.bf16.msra.mxu0 %v9062_v53  ;;  %5712 = vmatpush1.bf16.msra.mxu1 %v9063_v49  ;;  %v9073_v53 = vld [vmem:[#allocation46_spill] sm:$0xff]  ;;  %v9074_v49 = vld [vmem:[#allocation47_spill] sm:$0xff] }
 0x5d6   :  { %5682 = vmatprep.subr.bf16.mxu0 %v9064_v21  ;;  %5714 = vmatprep.subr.bf16.mxu1 %v9065_v56  ;;  %v9075_v21 = vld [vmem:[#allocation48_spill] sm:$0xff]  ;;  %v9076_v56 = vld [vmem:[#allocation49_spill] sm:$0xff] }
 0x5d9   :  { %5684 = vmatpush1.bf16.msra.mxu0 %v9066_v45  ;;  %5716 = vmatpush1.bf16.msra.mxu1 %v9067_v30  ;;  %v9077_v45 = vld [vmem:[#allocation50_spill] sm:$0xff]  ;;  %v9078_v30 = vld [vmem:[#allocation51_spill] sm:$0xff] }
 0x5da   :  { %5686 = vmatprep.subr.bf16.mxu0 %v9068_v38  ;;  %5718 = vmatprep.subr.bf16.mxu1 %v9069_v57  ;;  %v9079_v38 = vld [vmem:[#allocation52_spill] sm:$0xff]  ;;  %v9080_v57 = vld [vmem:[#allocation53_spill] sm:$0xff] }
 0x5dd   :  { %5688 = vmatpush1.bf16.msra.mxu0 %v9070_v10  ;;  %5720 = vmatpush1.bf16.msra.mxu1 %v9071_v36  ;;  %v9081_v10 = vld [vmem:[#allocation54_spill] sm:$0xff]  ;;  %v9082_v36 = vld [vmem:[#allocation55_spill] sm:$0xff] }
 0x5de   :  { %5690 = vmatprep.subr.bf16.mxu0 %v9072_v37  ;;  %5722 = vmatprep.subr.bf16.mxu1 %v9073_v53  ;;  %v9083_v37 = vld [vmem:[#allocation56_spill] sm:$0xff]  ;;  %v9084_v53 = vld [vmem:[#allocation57_spill] sm:$0xff] }
 0x5e1   :  { %5692 = vmatpush1.bf16.msra.mxu0 %v9074_v49  ;;  %5724 = vmatpush1.bf16.msra.mxu1 %v9075_v21  ;;  %v9085_v49 = vld [vmem:[#allocation58_spill] sm:$0xff]  ;;  %v9086_v21 = vld [vmem:[#allocation59_spill] sm:$0xff] }
 0x5e2   :  { %5694 = vmatprep.subr.bf16.mxu0 %v9076_v56  ;;  %5726 = vmatprep.subr.bf16.mxu1 %v9077_v45  ;;  %v9087_v56 = vld [vmem:[#allocation60_spill] sm:$0xff]  ;;  %v9088_v45 = vld [vmem:[#allocation61_spill] sm:$0xff] }
 0x5e5   :  { %5696 = vmatpush1.bf16.msra.mxu0 %v9078_v30  ;;  %5728 = vmatpush1.bf16.msra.mxu1 %v9079_v38  ;;  %v9089_v30 = vld [vmem:[#allocation62_spill] sm:$0xff] }
 0x5e6   :  { %5698 = vmatprep.subr.bf16.mxu0 %v9080_v57  ;;  %5730 = vmatprep.subr.bf16.mxu1 %v9081_v10 }
 0x5e9   :  { %5700 = vmatpush1.bf16.msra.mxu0 %v9082_v36  ;;  %5732 = vmatpush1.bf16.msra.mxu1 %v9083_v37 }
 0x5ea   :  { %5702 = vmatprep.subr.bf16.mxu0 %v9084_v53  ;;  %5734 = vmatprep.subr.bf16.mxu1 %v9085_v49 }
 0x5ed   :  { %5704 = vmatpush1.bf16.msra.mxu0 %v9086_v21  ;;  %5736 = vmatpush1.bf16.msra.mxu1 %v9087_v56 }
 0x5ee   :  { %5738 = vmatprep.subr.bf16.mxu0 %v9088_v45  ;;  %5770 = vmatprep.subr.bf16.mxu1 %v9089_v30 }
 0x683   :  { %v2858_v38 = vpop.f32.mrb[24].mxu0  ;;  %v2929_v57 = vpop.f32.mrb[24].mxu1 }
 0x684   :  { %v2934_v10 = vadd.f32 %v2858_v38, %v9090_v27  ;;  %v2860_v7 = vpop.f32.mrb[25].mxu0  ;;  %v2931_v36 = vpop.f32.mrb[25].mxu1  ;;  %v2936_v56 = vadd.f32 %v2929_v57, %v8972_v26 }
 0x685   :  { %v2935_v37 = vadd.f32 %v2860_v7, %v8971_v12  ;;  %v2937_v21 = vadd.f32 %v2931_v36, %v8910_v51 }
 0x686   :  { %v4573_v41 = vmul.f32 -1.442695, %v2934_v10 }
 0x687   :  { %v4574_v53 = vmul.f32 -1.442695, %v2935_v37  ;;  %v4575_v49 = vmul.f32 -1.442695, %v2937_v21 }
 0x688   :  { %6452 = vpow2.f32 %v4573_v41 }
 0x689   :  { %6454 = vpow2.f32 %v4574_v53 }
 0x68a   :  { %6456 = vpow2.f32 %v4575_v49 }
 0x68b   :  { %6458 = vtanh.f32 %v2936_v56 }
 0x692   :  { %v6453_v45 = vpop.eup %6452 }
 0x693   :  { %v6455_v50 = vpop.eup %6454  ;;  %v2941_v30 = vadd.f32 1.0, %v6453_v45 }
 0x694   :  { %v2947_v40 = vadd.f32 1.0, %v6455_v50  ;;  %v6457_v38 = vpop.eup %6456 }
 0x695   :  { %6460 = vrcp.f32 %v2941_v30  ;;  %v6459_v27 = vpop.eup %6458  ;;  %v2954_v41 = vadd.f32 1.0, %v6457_v38 }
 0x696   :  { %6462 = vrcp.f32 %v2947_v40 }
 0x697   :  { %6464 = vrcp.f32 %v2954_v41 }
 0x69f   :  { %v6461_v7 = vpop.eup %6460 }
 0x6a0   :  { %v6463_v10 = vpop.eup %6462  ;;  %v2958_v37 = vmul.f32 %v6461_v7, %v6459_v27 }
 0x6a1   :  { %v2957_v53 = vmul.f32 %v6463_v10, %v8052_v52  ;;  %v6465_v52 = vpop.eup %6464 }
 0x6a3   :  { %v8170_v36 = vadd.f32 %v2958_v37, %v2957_v53  ;;  %v3028_v21 = vpop.f32.mrb[10].mxu0  ;;  %v3099_v57 = vpop.f32.mrb[10].mxu1 }
 0x6a4   :  { %v6219_v45 = vadd.f32 %v3028_v21, %v8913_v59  ;;  %v3030_v49 = vpop.f32.mrb[11].mxu0  ;;  %v3101_v56 = vpop.f32.mrb[11].mxu1  ;;  %v6235_v10 = vadd.f32 %v3099_v57, %v7601_v11 }
 0x6a5   :  { %v6220_v50 = vadd.f32 %v3030_v49, %v8852_v18  ;;  %6466 = vtanh.f32 %v8170_v36  ;;  %v6236_v27 = vadd.f32 %v3101_v56, %v8853_v42 }
 0x6a6   :  { %v4576_v40 = vmul.f32 -1.442695, %v6219_v45 }
 0x6a7   :  { %v4577_v30 = vmul.f32 -1.442695, %v6220_v50  ;;  %v4578_v7 = vmul.f32 -1.442695, %v6236_v27 }
 0x6a8   :  { %6468 = vpow2.f32 %v4576_v40 }
 0x6a9   :  { %6470 = vpow2.f32 %v4577_v30 }
 0x6aa   :  { %6472 = vpow2.f32 %v4578_v7 }
 0x6ab   :  { %6474 = vtanh.f32 %v6235_v10  ;;  %v9091_v10 = vld [vmem:[#allocation5_spill] sm:$0xff] }
 0x6af   :  { %v6467_v38 = vpop.eup %6466 }
 0x6b0   :  { %v2961_v37 = vmul.f32 %v6467_v38, %v6465_v52 }
 0x6b2   :  { %v6469_v41 = vpop.eup %6468  ;;  %3197 = vmatmul.mubr.f32.vlgmr.msra.gmra.mrb[26].mxu0 %v2961_v37  ;;  %3268 = vmatmul.mubr.f32.vlgmr.msra.gmra.mrb[26].mxu1 %v2961_v37  ;;  %v9092_v37 = vld [vmem:[#allocation6_spill] sm:$0xff] }
 0x6b3   :  { %v6471_v53 = vpop.eup %6470  ;;  %v3111_v21 = vadd.f32 1.0, %v6469_v41  ;;  %5740 = vmatpush1.bf16.msra.mxu0 %v8854_v46  ;;  %5772 = vmatpush1.bf16.msra.mxu1 %v8855_v47  ;;  %v9093_v41 = vld [vmem:[#allocation7_spill] sm:$0xff] }
 0x6b4   :  { %v3117_v45 = vadd.f32 1.0, %v6471_v53  ;;  %5742 = vmatprep.subr.bf16.mxu0 %v8914_v2  ;;  %5774 = vmatprep.subr.bf16.mxu1 %v8915_v1  ;;  %v6473_v57 = vpop.eup %6472  ;;  %v9094_v53 = vld [vmem:[#allocation8_spill] sm:$0xff] }
 0x6b5   :  { %6476 = vrcp.f32 %v3111_v21  ;;  %3338 = vmatprep.mubr.f32.mxu0 %v8788_v22  ;;  %3409 = vmatprep.mubr.f32.mxu1 %v8788_v22  ;;  %v6475_v49 = vpop.eup %6474  ;;  %v3124_v30 = vadd.f32 1.0, %v6473_v57  ;;  %v9095_v21 = vld [vmem:[#allocation9_spill] sm:$0xff]  ;;  %v9097_v57 = vld [vmem:[#allocation11_spill] sm:$0xff] }
 0x6b6   :  { %6478 = vrcp.f32 %v3117_v45  ;;  %v9096_v45 = vld [vmem:[#allocation10_spill] sm:$0xff] }
 0x6b7   :  { %5744 = vmatpush1.bf16.msra.mxu0 %v8916_v39  ;;  %5776 = vmatpush1.bf16.msra.mxu1 %v8917_v61  ;;  %6480 = vrcp.f32 %v3124_v30  ;;  %v9102_v30 = vld [vmem:[#allocation16_spill] sm:$0xff] }
 0x6b8   :  { %5746 = vmatprep.subr.bf16.mxu0 %v8973_v44  ;;  %5778 = vmatprep.subr.bf16.mxu1 %v8974_v55 }
 0x6bb   :  { %5748 = vmatpush1.bf16.msra.mxu0 %v8975_v4  ;;  %5780 = vmatpush1.bf16.msra.mxu1 %v8976_v0 }
 0x6bc   :  { %5750 = vmatprep.subr.bf16.mxu0 %v8977_v60  ;;  %5782 = vmatprep.subr.bf16.mxu1 %v8978_v35 }
 0x6bf   :  { %v6477_v56 = vpop.eup %6476  ;;  %5752 = vmatpush1.bf16.msra.mxu0 %v8979_v17  ;;  %5784 = vmatpush1.bf16.msra.mxu1 %v8867_v3 }
 0x6c0   :  { %v6479_v50 = vpop.eup %6478  ;;  %v3128_v40 = vmul.f32 %v6477_v56, %v6475_v49  ;;  %5754 = vmatprep.subr.bf16.mxu0 %v8868_v33  ;;  %5786 = vmatprep.subr.bf16.mxu1 %v8869_v6  ;;  %v9098_v49 = vld [vmem:[#allocation12_spill] sm:$0xff]  ;;  %v9099_v56 = vld [vmem:[#allocation13_spill] sm:$0xff] }
 0x6c1   :  { %v3127_v27 = vmul.f32 %v6479_v50, %v8078_v14  ;;  %v6481_v14 = vpop.eup %6480  ;;  %v9100_v50 = vld [vmem:[#allocation14_spill] sm:$0xff] }
 0x6c3   :  { %v8196_v52 = vadd.f32 %v3128_v40, %v3127_v27  ;;  %5756 = vmatpush1.bf16.msra.mxu0 %v8925_v13  ;;  %5788 = vmatpush1.bf16.msra.mxu1 %v8926_v25  ;;  %v9101_v40 = vld [vmem:[#allocation15_spill] sm:$0xff]  ;;  %v9103_v27 = vld [vmem:[#allocation17_spill] sm:$0xff] }
 0x6c4   :  { %5758 = vmatprep.subr.bf16.mxu0 %v8927_v16  ;;  %5790 = vmatprep.subr.bf16.mxu1 %v8928_v48 }
 0x6c5   :  { %6482 = vtanh.f32 %v8196_v52 }
 0x6c7   :  { %5760 = vmatpush1.bf16.msra.mxu0 %v8929_v9  ;;  %5792 = vmatpush1.bf16.msra.mxu1 %v8930_v29 }
 0x6c8   :  { %5762 = vmatprep.subr.bf16.mxu0 %v8931_v5  ;;  %5794 = vmatprep.subr.bf16.mxu1 %v8877_v34 }
 0x6cb   :  { %5764 = vmatpush1.bf16.msra.mxu0 %v8878_v43  ;;  %5796 = vmatpush1.bf16.msra.mxu1 %v8879_v63 }
 0x6cc   :  { %5766 = vmatprep.subr.bf16.mxu0 %v8880_v58  ;;  %5798 = vmatprep.subr.bf16.mxu1 %v8881_v62 }
 0x6cf   :  { %v6483_v38 = vpop.eup %6482  ;;  %5768 = vmatpush1.bf16.msra.mxu0 %v8882_v31  ;;  %5800 = vmatpush1.bf16.msra.mxu1 %v8883_v8 }
 0x6d0   :  { %v3131_v7 = vmul.f32 %v6483_v38, %v6481_v14  ;;  %5802 = vmatprep.subr.bf16.mxu0 %v8884_v20  ;;  %5834 = vmatprep.subr.bf16.mxu1 %v8885_v54  ;;  %v9104_v14 = vld [vmem:[#allocation18_spill] sm:$0xff]  ;;  %v9105_v38 = vld [vmem:[#allocation19_spill] sm:$0xff] }
 0x6d2   :  { %3339 = vmatmul.mubr.f32.vlgmr.msra.gmra.mrb[26].mxu0 %v3131_v7  ;;  %3410 = vmatmul.mubr.f32.vlgmr.msra.gmra.mrb[26].mxu1 %v3131_v7 }
 0x6d3   :  { %5804 = vmatpush1.bf16.msra.mxu0 %v6675_v15  ;;  %5836 = vmatpush1.bf16.msra.mxu1 %v6690_v19 }
 0x6d4   :  { %5806 = vmatprep.subr.bf16.mxu0 %v6702_v23  ;;  %5838 = vmatprep.subr.bf16.mxu1 %v6704_v24 }
 0x6d5   :  { %3508 = vmatprep.mubr.f32.mxu0 %v8788_v22  ;;  %3579 = vmatprep.mubr.f32.mxu1 %v8788_v22 }
 0x6d7   :  { %5808 = vmatpush1.bf16.msra.mxu0 %v6717_v28  ;;  %5840 = vmatpush1.bf16.msra.mxu1 %v6730_v32 }
 0x6d8   :  { %5810 = vmatprep.subr.bf16.mxu0 %v9091_v10  ;;  %5842 = vmatprep.subr.bf16.mxu1 %v9092_v37 }
 0x6db   :  { %5812 = vmatpush1.bf16.msra.mxu0 %v9093_v41  ;;  %5844 = vmatpush1.bf16.msra.mxu1 %v9094_v53 }
 0x6dc   :  { %5814 = vmatprep.subr.bf16.mxu0 %v9095_v21  ;;  %5846 = vmatprep.subr.bf16.mxu1 %v9096_v45  ;;  %v9106_v21 = vld [vmem:[#allocation20_spill] sm:$0xff]  ;;  %v9107_v45 = vld [vmem:[#allocation21_spill] sm:$0xff] }
 0x6df   :  { %5816 = vmatpush1.bf16.msra.mxu0 %v9097_v57  ;;  %5848 = vmatpush1.bf16.msra.mxu1 %v9098_v49  ;;  %v9108_v57 = vld [vmem:[#allocation22_spill] sm:$0xff]  ;;  %v9109_v49 = vld [vmem:[#allocation23_spill] sm:$0xff] }
 0x6e0   :  { %5818 = vmatprep.subr.bf16.mxu0 %v9099_v56  ;;  %5850 = vmatprep.subr.bf16.mxu1 %v9100_v50  ;;  %v9110_v56 = vld [vmem:[#allocation24_spill] sm:$0xff]  ;;  %v9111_v50 = vld [vmem:[#allocation25_spill] sm:$0xff] }
 0x6e3   :  { %5820 = vmatpush1.bf16.msra.mxu0 %v9101_v40  ;;  %5852 = vmatpush1.bf16.msra.mxu1 %v9102_v30  ;;  %v9112_v40 = vld [vmem:[#allocation26_spill] sm:$0xff]  ;;  %v9113_v30 = vld [vmem:[#allocation27_spill] sm:$0xff] }
 0x6e4   :  { %5822 = vmatprep.subr.bf16.mxu0 %v9103_v27  ;;  %5854 = vmatprep.subr.bf16.mxu1 %v9104_v14  ;;  %v9114_v27 = vld [vmem:[#allocation28_spill] sm:$0xff]  ;;  %v9115_v14 = vld [vmem:[#allocation29_spill] sm:$0xff] }
 0x6e7   :  { %5824 = vmatpush1.bf16.msra.mxu0 %v9105_v38  ;;  %5856 = vmatpush1.bf16.msra.mxu1 %v9106_v21  ;;  %v9116_v38 = vld [vmem:[#allocation30_spill] sm:$0xff]  ;;  %v9149_v21 = vld [vmem:[#allocation93_spill] sm:$0xff] }
 0x6e8   :  { %5826 = vmatprep.subr.bf16.mxu0 %v9107_v45  ;;  %5858 = vmatprep.subr.bf16.mxu1 %v9108_v57  ;;  %v9117_v45 = vld [vmem:[#allocation31_spill] sm:$0xff]  ;;  %v9118_v57 = vld [vmem:[#allocation32_spill] sm:$0xff] }
 0x6eb   :  { %5828 = vmatpush1.bf16.msra.mxu0 %v9109_v49  ;;  %5860 = vmatpush1.bf16.msra.mxu1 %v9110_v56  ;;  %v9119_v49 = vld [vmem:[#allocation33_spill] sm:$0xff]  ;;  %v9120_v56 = vld [vmem:[#allocation34_spill] sm:$0xff] }
 0x6ec   :  { %5830 = vmatprep.subr.bf16.mxu0 %v9111_v50  ;;  %5862 = vmatprep.subr.bf16.mxu1 %v9112_v40  ;;  %v9130_v40 = vld [vmem:[#allocation44_spill] sm:$0xff]  ;;  %v9131_v50 = vld [vmem:[#allocation45_spill] sm:$0xff] }
 0x6ef   :  { %5832 = vmatpush1.bf16.msra.mxu0 %v9113_v30  ;;  %5864 = vmatpush1.bf16.msra.mxu1 %v9114_v27  ;;  %v9121_v30 = vld [vmem:[#allocation35_spill] sm:$0xff]  ;;  %v9122_v27 = vld [vmem:[#allocation36_spill] sm:$0xff] }
 0x6f0   :  { %5866 = vmatprep.subr.bf16.mxu0 %v9115_v14  ;;  %5898 = vmatprep.subr.bf16.mxu1 %v9116_v38  ;;  %v9123_v14 = vld [vmem:[#allocation37_spill] sm:$0xff]  ;;  %v9124_v38 = vld [vmem:[#allocation38_spill] sm:$0xff] }
 0x6f2   :  { %3509 = vmatmul.mubr.f32.vlgmr.msra.gmra.mrb[12].mxu0 %v3131_v7  ;;  %3580 = vmatmul.mubr.f32.vlgmr.msra.gmra.mrb[12].mxu1 %v3131_v7  ;;  %v9125_v7 = vld [vmem:[#allocation39_spill] sm:$0xff] }
 0x6f3   :  { %5868 = vmatpush1.bf16.msra.mxu0 %v9117_v45  ;;  %5900 = vmatpush1.bf16.msra.mxu1 %v9118_v57  ;;  %v9126_v45 = vld [vmem:[#allocation40_spill] sm:$0xff]  ;;  %v9127_v57 = vld [vmem:[#allocation41_spill] sm:$0xff] }
 0x6f4   :  { %5870 = vmatprep.subr.bf16.mxu0 %v9119_v49  ;;  %5902 = vmatprep.subr.bf16.mxu1 %v9120_v56  ;;  %v9128_v49 = vld [vmem:[#allocation42_spill] sm:$0xff]  ;;  %v9129_v56 = vld [vmem:[#allocation43_spill] sm:$0xff] }
 0x6f5   :  { %3678 = vmatprep.mubr.f32.mxu0 %v8788_v22  ;;  %3749 = vmatprep.mubr.f32.mxu1 %v8788_v22 }
 0x6f7   :  { %5872 = vmatpush1.bf16.msra.mxu0 %v9121_v30  ;;  %5904 = vmatpush1.bf16.msra.mxu1 %v9122_v27  ;;  %v9132_v30 = vld [vmem:[#allocation46_spill] sm:$0xff]  ;;  %v9133_v27 = vld [vmem:[#allocation47_spill] sm:$0xff] }
 0x6f8   :  { %5874 = vmatprep.subr.bf16.mxu0 %v9123_v14  ;;  %5906 = vmatprep.subr.bf16.mxu1 %v9124_v38  ;;  %v9134_v14 = vld [vmem:[#allocation48_spill] sm:$0xff]  ;;  %v9135_v38 = vld [vmem:[#allocation49_spill] sm:$0xff] }
 0x6fb   :  { %5876 = vmatpush1.bf16.msra.mxu0 %v9125_v7  ;;  %5908 = vmatpush1.bf16.msra.mxu1 %v9126_v45  ;;  %v9136_v7 = vld [vmem:[#allocation50_spill] sm:$0xff]  ;;  %v9137_v45 = vld [vmem:[#allocation51_spill] sm:$0xff] }
 0x6fc   :  { %5878 = vmatprep.subr.bf16.mxu0 %v9127_v57  ;;  %5910 = vmatprep.subr.bf16.mxu1 %v9128_v49  ;;  %v9138_v57 = vld [vmem:[#allocation52_spill] sm:$0xff]  ;;  %v9139_v49 = vld [vmem:[#allocation53_spill] sm:$0xff] }
 0x6ff   :  { %5880 = vmatpush1.bf16.msra.mxu0 %v9129_v56  ;;  %5912 = vmatpush1.bf16.msra.mxu1 %v9130_v40  ;;  %v9140_v56 = vld [vmem:[#allocation54_spill] sm:$0xff]  ;;  %v9141_v40 = vld [vmem:[#allocation55_spill] sm:$0xff] }
 0x700   :  { %5882 = vmatprep.subr.bf16.mxu0 %v9131_v50  ;;  %5914 = vmatprep.subr.bf16.mxu1 %v9132_v30  ;;  %v9142_v50 = vld [vmem:[#allocation56_spill] sm:$0xff]  ;;  %v9143_v30 = vld [vmem:[#allocation57_spill] sm:$0xff] }
 0x703   :  { %5884 = vmatpush1.bf16.msra.mxu0 %v9133_v27  ;;  %5916 = vmatpush1.bf16.msra.mxu1 %v9134_v14  ;;  %v9144_v27 = vld [vmem:[#allocation58_spill] sm:$0xff]  ;;  %v9145_v14 = vld [vmem:[#allocation59_spill] sm:$0xff] }
 0x704   :  { %5886 = vmatprep.subr.bf16.mxu0 %v9135_v38  ;;  %5918 = vmatprep.subr.bf16.mxu1 %v9136_v7  ;;  %v9146_v38 = vld [vmem:[#allocation60_spill] sm:$0xff]  ;;  %v9147_v7 = vld [vmem:[#allocation61_spill] sm:$0xff] }
 0x707   :  { %5888 = vmatpush1.bf16.msra.mxu0 %v9137_v45  ;;  %5920 = vmatpush1.bf16.msra.mxu1 %v9138_v57  ;;  %v9148_v45 = vld [vmem:[#allocation62_spill] sm:$0xff] }
 0x708   :  { %5890 = vmatprep.subr.bf16.mxu0 %v9139_v49  ;;  %5922 = vmatprep.subr.bf16.mxu1 %v9140_v56 }
 0x70b   :  { %5892 = vmatpush1.bf16.msra.mxu0 %v9141_v40  ;;  %5924 = vmatpush1.bf16.msra.mxu1 %v9142_v50 }
 0x70c   :  { %5894 = vmatprep.subr.bf16.mxu0 %v9143_v30  ;;  %5926 = vmatprep.subr.bf16.mxu1 %v9144_v27 }
 0x70f   :  { %5896 = vmatpush1.bf16.msra.mxu0 %v9145_v14  ;;  %5928 = vmatpush1.bf16.msra.mxu1 %v9146_v38 }
 0x710   :  { %5930 = vmatprep.subr.bf16.mxu0 %v9147_v7  ;;  %5962 = vmatprep.subr.bf16.mxu1 %v9148_v45 }
 0x7a5   :  { %v3340_v57 = vpop.f32.mrb[26].mxu0  ;;  %v3411_v49 = vpop.f32.mrb[26].mxu1 }
 0x7a6   :  { %v3416_v56 = vadd.f32 %v3340_v57, %v9149_v21  ;;  %v3342_v53 = vpop.f32.mrb[27].mxu0  ;;  %v3413_v40 = vpop.f32.mrb[27].mxu1  ;;  %v3418_v38 = vadd.f32 %v3411_v49, %v8972_v26 }
 0x7a7   :  { %v3417_v50 = vadd.f32 %v3342_v53, %v8971_v12  ;;  %v3419_v14 = vadd.f32 %v3413_v40, %v8910_v51 }
 0x7a8   :  { %v4579_v41 = vmul.f32 -1.442695, %v3416_v56 }
 0x7a9   :  { %v4580_v30 = vmul.f32 -1.442695, %v3417_v50  ;;  %v4581_v27 = vmul.f32 -1.442695, %v3419_v14 }
 0x7aa   :  { %6484 = vpow2.f32 %v4579_v41 }
 0x7ab   :  { %6486 = vpow2.f32 %v4580_v30 }
 0x7ac   :  { %6488 = vpow2.f32 %v4581_v27 }
 0x7ad   :  { %6490 = vtanh.f32 %v3418_v38 }
 0x7b4   :  { %v6485_v7 = vpop.eup %6484 }
 0x7b5   :  { %v6487_v37 = vpop.eup %6486  ;;  %v3423_v45 = vadd.f32 1.0, %v6485_v7 }
 0x7b6   :  { %v3429_v10 = vadd.f32 1.0, %v6487_v37  ;;  %v6489_v57 = vpop.eup %6488 }
 0x7b7   :  { %6492 = vrcp.f32 %v3423_v45  ;;  %v6491_v21 = vpop.eup %6490  ;;  %v3436_v41 = vadd.f32 1.0, %v6489_v57 }
 0x7b8   :  { %6494 = vrcp.f32 %v3429_v10 }
 0x7b9   :  { %6496 = vrcp.f32 %v3436_v41 }
 0x7c1   :  { %v6493_v53 = vpop.eup %6492 }
 0x7c2   :  { %v6495_v56 = vpop.eup %6494  ;;  %v3440_v50 = vmul.f32 %v6493_v53, %v6491_v21 }
 0x7c3   :  { %v3439_v30 = vmul.f32 %v6495_v56, %v8170_v36  ;;  %v6497_v36 = vpop.eup %6496 }
 0x7c5   :  { %v8288_v40 = vadd.f32 %v3440_v50, %v3439_v30  ;;  %v3510_v14 = vpop.f32.mrb[12].mxu0  ;;  %v3581_v49 = vpop.f32.mrb[12].mxu1 }
 0x7c6   :  { %v6221_v7 = vadd.f32 %v3510_v14, %v8913_v59  ;;  %v3512_v27 = vpop.f32.mrb[13].mxu0  ;;  %v3583_v38 = vpop.f32.mrb[13].mxu1  ;;  %v6237_v56 = vadd.f32 %v3581_v49, %v7601_v11 }
 0x7c7   :  { %v6222_v37 = vadd.f32 %v3512_v27, %v8852_v18  ;;  %6498 = vtanh.f32 %v8288_v40  ;;  %v6238_v21 = vadd.f32 %v3583_v38, %v8853_v42 }
 0x7c8   :  { %v4582_v10 = vmul.f32 -1.442695, %v6221_v7 }
 0x7c9   :  { %v4583_v45 = vmul.f32 -1.442695, %v6222_v37  ;;  %v4584_v53 = vmul.f32 -1.442695, %v6238_v21 }
 0x7ca   :  { %6500 = vpow2.f32 %v4582_v10 }
 0x7cb   :  { %6502 = vpow2.f32 %v4583_v45 }
 0x7cc   :  { %6504 = vpow2.f32 %v4584_v53 }
 0x7cd   :  { %6506 = vtanh.f32 %v6237_v56  ;;  %v9152_v56 = vld [vmem:[#allocation7_spill] sm:$0xff] }
 0x7d1   :  { %v6499_v57 = vpop.eup %6498 }
 0x7d2   :  { %v3443_v50 = vmul.f32 %v6499_v57, %v6497_v36 }
 0x7d4   :  { %v6501_v41 = vpop.eup %6500  ;;  %3679 = vmatmul.mubr.f32.vlgmr.msra.gmra.mrb[28].mxu0 %v3443_v50  ;;  %3750 = vmatmul.mubr.f32.vlgmr.msra.gmra.mrb[28].mxu1 %v3443_v50  ;;  %v9157_v50 = vld [vmem:[#allocation12_spill] sm:$0xff] }
 0x7d5   :  { %v6503_v30 = vpop.eup %6502  ;;  %v3593_v14 = vadd.f32 1.0, %v6501_v41  ;;  %5932 = vmatpush1.bf16.msra.mxu0 %v8854_v46  ;;  %5964 = vmatpush1.bf16.msra.mxu1 %v8855_v47  ;;  %v9158_v41 = vld [vmem:[#allocation13_spill] sm:$0xff] }
 0x7d6   :  { %v3599_v7 = vadd.f32 1.0, %v6503_v30  ;;  %5934 = vmatprep.subr.bf16.mxu0 %v8914_v2  ;;  %5966 = vmatprep.subr.bf16.mxu1 %v8915_v1  ;;  %v6505_v49 = vpop.eup %6504  ;;  %v9161_v30 = vld [vmem:[#allocation16_spill] sm:$0xff] }
 0x7d7   :  { %6508 = vrcp.f32 %v3593_v14  ;;  %3820 = vmatprep.mubr.f32.mxu0 %v8788_v22  ;;  %3891 = vmatprep.mubr.f32.mxu1 %v8788_v22  ;;  %v6507_v27 = vpop.eup %6506  ;;  %v3606_v45 = vadd.f32 1.0, %v6505_v49  ;;  %v9162_v14 = vld [vmem:[#allocation17_spill] sm:$0xff]  ;;  %v9164_v49 = vld [vmem:[#allocation19_spill] sm:$0xff] }
 0x7d8   :  { %6510 = vrcp.f32 %v3599_v7  ;;  %v9163_v7 = vld [vmem:[#allocation18_spill] sm:$0xff] }
 0x7d9   :  { %5936 = vmatpush1.bf16.msra.mxu0 %v8916_v39  ;;  %5968 = vmatpush1.bf16.msra.mxu1 %v8917_v61  ;;  %6512 = vrcp.f32 %v3606_v45  ;;  %v9169_v45 = vld [vmem:[#allocation24_spill] sm:$0xff] }
 0x7da   :  { %5938 = vmatprep.subr.bf16.mxu0 %v8973_v44  ;;  %5970 = vmatprep.subr.bf16.mxu1 %v8974_v55 }
 0x7dd   :  { %5940 = vmatpush1.bf16.msra.mxu0 %v8975_v4  ;;  %5972 = vmatpush1.bf16.msra.mxu1 %v8976_v0 }
 0x7de   :  { %5942 = vmatprep.subr.bf16.mxu0 %v8977_v60  ;;  %5974 = vmatprep.subr.bf16.mxu1 %v8978_v35 }
 0x7e1   :  { %v6509_v38 = vpop.eup %6508  ;;  %5944 = vmatpush1.bf16.msra.mxu0 %v8979_v17  ;;  %5976 = vmatpush1.bf16.msra.mxu1 %v8867_v3 }
 0x7e2   :  { %v6511_v37 = vpop.eup %6510  ;;  %v3610_v10 = vmul.f32 %v6509_v38, %v6507_v27  ;;  %5946 = vmatprep.subr.bf16.mxu0 %v8868_v33  ;;  %5978 = vmatprep.subr.bf16.mxu1 %v8869_v6  ;;  %v9165_v27 = vld [vmem:[#allocation20_spill] sm:$0xff]  ;;  %v9166_v38 = vld [vmem:[#allocation21_spill] sm:$0xff] }
 0x7e3   :  { %v3609_v21 = vmul.f32 %v6511_v37, %v8196_v52  ;;  %v6513_v52 = vpop.eup %6512  ;;  %v9167_v37 = vld [vmem:[#allocation22_spill] sm:$0xff] }
 0x7e5   :  { %v8314_v36 = vadd.f32 %v3610_v10, %v3609_v21  ;;  %5948 = vmatpush1.bf16.msra.mxu0 %v8925_v13  ;;  %5980 = vmatpush1.bf16.msra.mxu1 %v8926_v25  ;;  %v9168_v10 = vld [vmem:[#allocation23_spill] sm:$0xff]  ;;  %v9170_v21 = vld [vmem:[#allocation25_spill] sm:$0xff] }
 0x7e6   :  { %5950 = vmatprep.subr.bf16.mxu0 %v8927_v16  ;;  %5982 = vmatprep.subr.bf16.mxu1 %v8928_v48 }
 0x7e7   :  { %6514 = vtanh.f32 %v8314_v36 }
 0x7e9   :  { %5952 = vmatpush1.bf16.msra.mxu0 %v8929_v9  ;;  %5984 = vmatpush1.bf16.msra.mxu1 %v8930_v29 }
 0x7ea   :  { %5954 = vmatprep.subr.bf16.mxu0 %v8931_v5  ;;  %5986 = vmatprep.subr.bf16.mxu1 %v8877_v34 }
 0x7ed   :  { %5956 = vmatpush1.bf16.msra.mxu0 %v8878_v43  ;;  %5988 = vmatpush1.bf16.msra.mxu1 %v8879_v63 }
 0x7ee   :  { %5958 = vmatprep.subr.bf16.mxu0 %v8880_v58  ;;  %5990 = vmatprep.subr.bf16.mxu1 %v8881_v62 }
 0x7f1   :  { %v6515_v57 = vpop.eup %6514  ;;  %5960 = vmatpush1.bf16.msra.mxu0 %v8882_v31  ;;  %5992 = vmatpush1.bf16.msra.mxu1 %v8883_v8 }
 0x7f2   :  { %5994 = vmatprep.subr.bf16.mxu0 %v8884_v20  ;;  %6026 = vmatprep.subr.bf16.mxu1 %v8885_v54  ;;  %v3613_v53 = vmul.f32 %v6515_v57, %v6513_v52  ;;  %v9150_v20 = vld [vmem:[#allocation5_spill] sm:$0xff]  ;;  %v9151_v54 = vld [vmem:[#allocation6_spill] sm:$0xff]  ;;  %v9172_v57 = vld [vmem:[#allocation27_spill] sm:$0xff] }
 0x7f3   :  { %v9171_v52 = vld [vmem:[#allocation26_spill] sm:$0xff] }
 0x7f4   :  { %3821 = vmatmul.mubr.f32.vlgmr.msra.gmra.mrb[28].mxu0 %v3613_v53  ;;  %3892 = vmatmul.mubr.f32.vlgmr.msra.gmra.mrb[28].mxu1 %v3613_v53 }
 0x7f5   :  { %5996 = vmatpush1.bf16.msra.mxu0 %v6675_v15  ;;  %6028 = vmatpush1.bf16.msra.mxu1 %v6690_v19  ;;  %v9153_v15 = vld [vmem:[#allocation8_spill] sm:$0xff]  ;;  %v9154_v19 = vld [vmem:[#allocation9_spill] sm:$0xff] }
 0x7f6   :  { %5998 = vmatprep.subr.bf16.mxu0 %v6702_v23  ;;  %6030 = vmatprep.subr.bf16.mxu1 %v6704_v24  ;;  %v9155_v23 = vld [vmem:[#allocation10_spill] sm:$0xff]  ;;  %v9156_v24 = vld [vmem:[#allocation11_spill] sm:$0xff] }
 0x7f7   :  { %3990 = vmatprep.mubr.f32.mxu0 %v8788_v22  ;;  %4061 = vmatprep.mubr.f32.mxu1 %v8788_v22 }
 0x7f9   :  { %6000 = vmatpush1.bf16.msra.mxu0 %v6717_v28  ;;  %6032 = vmatpush1.bf16.msra.mxu1 %v6730_v32  ;;  %v9159_v28 = vld [vmem:[#allocation14_spill] sm:$0xff]  ;;  %v9160_v32 = vld [vmem:[#allocation15_spill] sm:$0xff] }
 0x7fa   :  { %6002 = vmatprep.subr.bf16.mxu0 %v9150_v20  ;;  %6034 = vmatprep.subr.bf16.mxu1 %v9151_v54  ;;  %v9173_v20 = vld [vmem:[#allocation28_spill] sm:$0xff]  ;;  %v9174_v54 = vld [vmem:[#allocation29_spill] sm:$0xff] }
 0x7fd   :  { %6004 = vmatpush1.bf16.msra.mxu0 %v9152_v56  ;;  %6036 = vmatpush1.bf16.msra.mxu1 %v9153_v15  ;;  %v9175_v56 = vld [vmem:[#allocation30_spill] sm:$0xff]  ;;  %v9176_v15 = vld [vmem:[#allocation31_spill] sm:$0xff] }
 0x7fe   :  { %6006 = vmatprep.subr.bf16.mxu0 %v9154_v19  ;;  %6038 = vmatprep.subr.bf16.mxu1 %v9155_v23  ;;  %v9177_v19 = vld [vmem:[#allocation32_spill] sm:$0xff]  ;;  %v9178_v23 = vld [vmem:[#allocation33_spill] sm:$0xff] }
 0x801   :  { %6008 = vmatpush1.bf16.msra.mxu0 %v9156_v24  ;;  %6040 = vmatpush1.bf16.msra.mxu1 %v9157_v50  ;;  %v9179_v24 = vld [vmem:[#allocation34_spill] sm:$0xff]  ;;  %v9180_v50 = vld [vmem:[#allocation35_spill] sm:$0xff] }
 0x802   :  { %6010 = vmatprep.subr.bf16.mxu0 %v9158_v41  ;;  %6042 = vmatprep.subr.bf16.mxu1 %v9159_v28  ;;  %v9181_v41 = vld [vmem:[#allocation36_spill] sm:$0xff]  ;;  %v9182_v28 = vld [vmem:[#allocation37_spill] sm:$0xff] }
 0x805   :  { %6012 = vmatpush1.bf16.msra.mxu0 %v9160_v32  ;;  %6044 = vmatpush1.bf16.msra.mxu1 %v9161_v30  ;;  %v9183_v32 = vld [vmem:[#allocation38_spill] sm:$0xff]  ;;  %v9185_v30 = vld [vmem:[#allocation40_spill] sm:$0xff] }
 0x806   :  { %6014 = vmatprep.subr.bf16.mxu0 %v9162_v14  ;;  %6046 = vmatprep.subr.bf16.mxu1 %v9163_v7  ;;  %v9186_v14 = vld [vmem:[#allocation41_spill] sm:$0xff]  ;;  %v9187_v7 = vld [vmem:[#allocation42_spill] sm:$0xff] }
 0x809   :  { %6016 = vmatpush1.bf16.msra.mxu0 %v9164_v49  ;;  %6048 = vmatpush1.bf16.msra.mxu1 %v9165_v27  ;;  %v9188_v49 = vld [vmem:[#allocation43_spill] sm:$0xff]  ;;  %v9189_v27 = vld [vmem:[#allocation44_spill] sm:$0xff] }
 0x80a   :  { %6018 = vmatprep.subr.bf16.mxu0 %v9166_v38  ;;  %6050 = vmatprep.subr.bf16.mxu1 %v9167_v37  ;;  %v9190_v38 = vld [vmem:[#allocation45_spill] sm:$0xff]  ;;  %v9191_v37 = vld [vmem:[#allocation46_spill] sm:$0xff] }
 0x80d   :  { %6020 = vmatpush1.bf16.msra.mxu0 %v9168_v10  ;;  %6052 = vmatpush1.bf16.msra.mxu1 %v9169_v45  ;;  %v9192_v10 = vld [vmem:[#allocation47_spill] sm:$0xff]  ;;  %v9193_v45 = vld [vmem:[#allocation48_spill] sm:$0xff] }
 0x80e   :  { %6022 = vmatprep.subr.bf16.mxu0 %v9170_v21  ;;  %6054 = vmatprep.subr.bf16.mxu1 %v9171_v52  ;;  %v9194_v21 = vld [vmem:[#allocation49_spill] sm:$0xff]  ;;  %v9195_v52 = vld [vmem:[#allocation50_spill] sm:$0xff] }
 0x811   :  { %6024 = vmatpush1.bf16.msra.mxu0 %v9172_v57  ;;  %6056 = vmatpush1.bf16.msra.mxu1 %v9173_v20  ;;  %v9196_v57 = vld [vmem:[#allocation51_spill] sm:$0xff]  ;;  %v9197_v20 = vld [vmem:[#allocation52_spill] sm:$0xff] }
 0x812   :  { %6058 = vmatprep.subr.bf16.mxu0 %v9174_v54  ;;  %6090 = vmatprep.subr.bf16.mxu1 %v9175_v56  ;;  %v9198_v54 = vld [vmem:[#allocation53_spill] sm:$0xff]  ;;  %v9199_v56 = vld [vmem:[#allocation54_spill] sm:$0xff] }
 0x814   :  { %3991 = vmatmul.mubr.f32.vlgmr.msra.gmra.mrb[14].mxu0 %v3613_v53  ;;  %4062 = vmatmul.mubr.f32.vlgmr.msra.gmra.mrb[14].mxu1 %v3613_v53  ;;  %v9184_v53 = vld [vmem:[#allocation39_spill] sm:$0xff] }
 0x815   :  { %6060 = vmatpush1.bf16.msra.mxu0 %v9176_v15  ;;  %6092 = vmatpush1.bf16.msra.mxu1 %v9177_v19  ;;  %v9200_v15 = vld [vmem:[#allocation55_spill] sm:$0xff]  ;;  %v9201_v19 = vld [vmem:[#allocation56_spill] sm:$0xff] }
 0x816   :  { %6062 = vmatprep.subr.bf16.mxu0 %v9178_v23  ;;  %6094 = vmatprep.subr.bf16.mxu1 %v9179_v24  ;;  %v9202_v23 = vld [vmem:[#allocation57_spill] sm:$0xff]  ;;  %v9203_v24 = vld [vmem:[#allocation58_spill] sm:$0xff] }
 0x817   :  { %4160 = vmatprep.mubr.f32.mxu0 %v8788_v22  ;;  %4231 = vmatprep.mubr.f32.mxu1 %v8788_v22 }
 0x819   :  { %6064 = vmatpush1.bf16.msra.mxu0 %v9180_v50  ;;  %6096 = vmatpush1.bf16.msra.mxu1 %v9181_v41  ;;  %v9204_v50 = vld [vmem:[#allocation59_spill] sm:$0xff]  ;;  %v9205_v41 = vld [vmem:[#allocation60_spill] sm:$0xff] }
 0x81a   :  { %6066 = vmatprep.subr.bf16.mxu0 %v9182_v28  ;;  %6098 = vmatprep.subr.bf16.mxu1 %v9183_v32  ;;  %v9206_v28 = vld [vmem:[#allocation61_spill] sm:$0xff]  ;;  %v9207_v32 = vld [vmem:[#allocation62_spill] sm:$0xff] }
 0x81d   :  { %6068 = vmatpush1.bf16.msra.mxu0 %v9184_v53  ;;  %6100 = vmatpush1.bf16.msra.mxu1 %v9185_v30 }
 0x81e   :  { %6070 = vmatprep.subr.bf16.mxu0 %v9186_v14  ;;  %6102 = vmatprep.subr.bf16.mxu1 %v9187_v7  ;;  %v9208_v14 = vld [vmem:[#allocation93_spill] sm:$0xff] }
 0x821   :  { %6072 = vmatpush1.bf16.msra.mxu0 %v9188_v49  ;;  %6104 = vmatpush1.bf16.msra.mxu1 %v9189_v27 }
 0x822   :  { %6074 = vmatprep.subr.bf16.mxu0 %v9190_v38  ;;  %6106 = vmatprep.subr.bf16.mxu1 %v9191_v37 }
 0x825   :  { %6076 = vmatpush1.bf16.msra.mxu0 %v9192_v10  ;;  %6108 = vmatpush1.bf16.msra.mxu1 %v9193_v45 }
 0x826   :  { %6078 = vmatprep.subr.bf16.mxu0 %v9194_v21  ;;  %6110 = vmatprep.subr.bf16.mxu1 %v9195_v52 }
 0x829   :  { %6080 = vmatpush1.bf16.msra.mxu0 %v9196_v57  ;;  %6112 = vmatpush1.bf16.msra.mxu1 %v9197_v20 }
 0x82a   :  { %6082 = vmatprep.subr.bf16.mxu0 %v9198_v54  ;;  %6114 = vmatprep.subr.bf16.mxu1 %v9199_v56 }
 0x82d   :  { %6084 = vmatpush1.bf16.msra.mxu0 %v9200_v15  ;;  %6116 = vmatpush1.bf16.msra.mxu1 %v9201_v19 }
 0x82e   :  { %6086 = vmatprep.subr.bf16.mxu0 %v9202_v23  ;;  %6118 = vmatprep.subr.bf16.mxu1 %v9203_v24 }
 0x831   :  { %6088 = vmatpush1.bf16.msra.mxu0 %v9204_v50  ;;  %6120 = vmatpush1.bf16.msra.mxu1 %v9205_v41 }
 0x832   :  { %6122 = vmatprep.subr.bf16.mxu0 %v9206_v28  ;;  %6154 = vmatprep.subr.bf16.mxu1 %v9207_v32 }
 0x8c7   :  { %v3822_v53 = vpop.f32.mrb[28].mxu0  ;;  %v3893_v30 = vpop.f32.mrb[28].mxu1 }
 0x8c8   :  { %v3898_v7 = vadd.f32 %v3822_v53, %v9208_v14  ;;  %v3824_v49 = vpop.f32.mrb[29].mxu0  ;;  %v3895_v27 = vpop.f32.mrb[29].mxu1  ;;  %v3900_v52 = vadd.f32 %v3893_v30, %v8972_v26 }
 0x8c9   :  { %v3899_v38 = vadd.f32 %v3824_v49, %v8971_v12  ;;  %v3901_v45 = vadd.f32 %v3895_v27, %v8910_v51 }
 0x8ca   :  { %v4585_v37 = vmul.f32 -1.442695, %v3898_v7 }
 0x8cb   :  { %v4586_v10 = vmul.f32 -1.442695, %v3899_v38  ;;  %v4587_v21 = vmul.f32 -1.442695, %v3901_v45 }
 0x8cc   :  { %6516 = vpow2.f32 %v4585_v37 }
 0x8cd   :  { %6518 = vpow2.f32 %v4586_v10 }
 0x8ce   :  { %6520 = vpow2.f32 %v4587_v21 }
 0x8cf   :  { %6522 = vtanh.f32 %v3900_v52 }
 0x8d6   :  { %v6517_v57 = vpop.eup %6516 }
 0x8d7   :  { %v6519_v20 = vpop.eup %6518  ;;  %v3905_v54 = vadd.f32 1.0, %v6517_v57 }
 0x8d8   :  { %v3911_v56 = vadd.f32 1.0, %v6519_v20  ;;  %v6521_v15 = vpop.eup %6520 }
 0x8d9   :  { %6524 = vrcp.f32 %v3905_v54  ;;  %v6523_v19 = vpop.eup %6522  ;;  %v3918_v41 = vadd.f32 1.0, %v6521_v15  ;;  %v4422_v15 = vld [vmem:[%s8519_s7 + $0x70] sm:$0xff] }
 0x8da   :  { %6526 = vrcp.f32 %v3911_v56 }
 0x8db   :  { %6528 = vrcp.f32 %v3918_v41 }
 0x8e3   :  { %v6525_v23 = vpop.eup %6524 }
 0x8e4   :  { %v6527_v24 = vpop.eup %6526  ;;  %v3922_v50 = vmul.f32 %v6525_v23, %v6523_v19  ;;  %v4423_v19 = vld [vmem:[%s8519_s7 + $0x78] sm:$0xff] }
 0x8e5   :  { %v3921_v28 = vmul.f32 %v6527_v24, %v8288_v40  ;;  %v6529_v40 = vpop.eup %6528  ;;  %v6207_v23 = vpack.c.bf16 %v4423_v19, %v4422_v15 }
 0x8e7   :  { %v8406_v32 = vadd.f32 %v3922_v50, %v3921_v28  ;;  %v3992_v53 = vpop.f32.mrb[14].mxu0  ;;  %v4063_v30 = vpop.f32.mrb[14].mxu1 }
 0x8e8   :  { %v6223_v7 = vadd.f32 %v3992_v53, %v8913_v59  ;;  %v3994_v49 = vpop.f32.mrb[15].mxu0  ;;  %v4065_v27 = vpop.f32.mrb[15].mxu1  ;;  %v6239_v57 = vadd.f32 %v4063_v30, %v7601_v11 }
 0x8e9   :  { %v6224_v38 = vadd.f32 %v3994_v49, %v8852_v18  ;;  %6530 = vtanh.f32 %v8406_v32  ;;  %v6240_v45 = vadd.f32 %v4065_v27, %v8853_v42 }
 0x8ea   :  { %v4588_v37 = vmul.f32 -1.442695, %v6223_v7 }
 0x8eb   :  { %v4589_v10 = vmul.f32 -1.442695, %v6224_v38  ;;  %v4590_v52 = vmul.f32 -1.442695, %v6240_v45 }
 0x8ec   :  { %6532 = vpow2.f32 %v4588_v37 }
 0x8ed   :  { %6534 = vpow2.f32 %v4589_v10 }
 0x8ee   :  { %6536 = vpow2.f32 %v4590_v52 }
 0x8ef   :  { %6538 = vtanh.f32 %v6239_v57 }
 0x8f3   :  { %v6531_v21 = vpop.eup %6530 }
 0x8f4   :  { %v3925_v20 = vmul.f32 %v6531_v21, %v6529_v40 }
 0x8f6   :  { %v6533_v54 = vpop.eup %6532  ;;  %4161 = vmatmul.mubr.f32.vlgmr.msra.gmra.mrb[30].mxu0 %v3925_v20  ;;  %4232 = vmatmul.mubr.f32.vlgmr.msra.gmra.mrb[30].mxu1 %v3925_v20 }
 0x8f7   :  { %v6535_v59 = vpop.eup %6534  ;;  %v4075_v56 = vadd.f32 1.0, %v6533_v54  ;;  %6124 = vmatpush1.bf16.msra.mxu0 %v8854_v46  ;;  %6156 = vmatpush1.bf16.msra.mxu1 %v8855_v47 }
 0x8f8   :  { %v4081_v18 = vadd.f32 1.0, %v6535_v59  ;;  %6126 = vmatprep.subr.bf16.mxu0 %v8914_v2  ;;  %6158 = vmatprep.subr.bf16.mxu1 %v8915_v1  ;;  %v6537_v11 = vpop.eup %6536 }
 0x8f9   :  { %6540 = vrcp.f32 %v4075_v56  ;;  %4302 = vmatprep.mubr.f32.mxu0 %v8788_v22  ;;  %4373 = vmatprep.mubr.f32.mxu1 %v8788_v22  ;;  %v6539_v46 = vpop.eup %6538  ;;  %v4088_v1 = vadd.f32 1.0, %v6537_v11  ;;  %v4594_v11 = vld [vmem:[%s8521_s8] ss:$0 sm:$0xff] }
 0x8fa   :  { %6542 = vrcp.f32 %v4081_v18  ;;  %v16_v18 = vstv %s8520_s10 }
 0x8fb   :  { %6128 = vmatpush1.bf16.msra.mxu0 %v8916_v39  ;;  %6160 = vmatpush1.bf16.msra.mxu1 %v8917_v61  ;;  %6544 = vrcp.f32 %v4088_v1  ;;  %17 = vst [vmem:[#allocation2] sm:$0x1] %v16_v18 }
 0x8fc   :  { %6130 = vmatprep.subr.bf16.mxu0 %v8973_v44  ;;  %6162 = vmatprep.subr.bf16.mxu1 %v8974_v55  ;;  %v4417_v44 = vld [vmem:[%s8519_s7 + $0x48] sm:$0xff] }
 0x8ff   :  { %6132 = vmatpush1.bf16.msra.mxu0 %v8975_v4  ;;  %6164 = vmatpush1.bf16.msra.mxu1 %v8976_v0  ;;  %v4418_v4 = vld [vmem:[%s8519_s7 + $0x50] sm:$0xff]  ;;  %v4419_v0 = vld [vmem:[%s8519_s7 + $0x58] sm:$0xff] }
 0x900   :  { %6134 = vmatprep.subr.bf16.mxu0 %v8977_v60  ;;  %6166 = vmatprep.subr.bf16.mxu1 %v8978_v35  ;;  %v4420_v60 = vld [vmem:[%s8519_s7 + $0x60] sm:$0xff]  ;;  %v6201_v35 = vpack.c.bf16 %v4419_v0, %v4418_v4 }
 0x903   :  { %v6541_v42 = vpop.eup %6540  ;;  %6136 = vmatpush1.bf16.msra.mxu0 %v8979_v17  ;;  %6168 = vmatpush1.bf16.msra.mxu1 %v8867_v3  ;;  %v4421_v17 = vld [vmem:[%s8519_s7 + $0x68] sm:$0xff] }
 0x904   :  { %v6543_v47 = vpop.eup %6542  ;;  %v4092_v2 = vmul.f32 %v6541_v42, %v6539_v46  ;;  %6138 = vmatprep.subr.bf16.mxu0 %v8868_v33  ;;  %6170 = vmatprep.subr.bf16.mxu1 %v8869_v6 }
 0x905   :  { %v4091_v39 = vmul.f32 %v6543_v47, %v8314_v36  ;;  %v6545_v33 = vpop.eup %6544  ;;  %v6204_v36 = vpack.c.bf16 %v4421_v17, %v4420_v60 }
 0x907   :  { %v4093_v61 = vadd.f32 %v4092_v2, %v4091_v39  ;;  %6140 = vmatpush1.bf16.msra.mxu0 %v8925_v13  ;;  %6172 = vmatpush1.bf16.msra.mxu1 %v8926_v25  ;;  %v4413_v13 = vld [vmem:[%s8519_s7 + $0x28] sm:$0xff]  ;;  %v4596_v39 = vld [vmem:[#allocation2] ss:$0 sm:$0xff] }
 0x908   :  { %6142 = vmatprep.subr.bf16.mxu0 %v8927_v16  ;;  %6174 = vmatprep.subr.bf16.mxu1 %v8928_v48  ;;  %v4412_v16 = vld [vmem:[%s8519_s7 + $0x20] sm:$0xff]  ;;  %v4414_v48 = vld [vmem:[%s8519_s7 + $0x30] sm:$0xff] }
 0x909   :  { %6546 = vtanh.f32 %v4093_v61  ;;  %v6192_v25 = vpack.c.bf16 %v4413_v13, %v4412_v16 }
 0x90b   :  { %6144 = vmatpush1.bf16.msra.mxu0 %v8929_v9  ;;  %6176 = vmatpush1.bf16.msra.mxu1 %v8930_v29  ;;  %v4415_v9 = vld [vmem:[%s8519_s7 + $0x38] sm:$0xff] }
 0x90c   :  { %6146 = vmatprep.subr.bf16.mxu0 %v8931_v5  ;;  %6178 = vmatprep.subr.bf16.mxu1 %v8877_v34  ;;  %v4408_v34 = vld [vmem:[%s8519_s7] sm:$0xff]  ;;  %v6195_v29 = vpack.c.bf16 %v4415_v9, %v4414_v48 }
 0x90d   :  { %v4416_v5 = vld [vmem:[%s8519_s7 + $0x40] sm:$0xff] }
 0x90e   :  { %v6198_v55 = vpack.c.bf16 %v4417_v44, %v4416_v5 }
 0x90f   :  { %6148 = vmatpush1.bf16.msra.mxu0 %v8878_v43  ;;  %6180 = vmatpush1.bf16.msra.mxu1 %v8879_v63  ;;  %v4409_v43 = vld [vmem:[%s8519_s7 + $0x8] sm:$0xff] }
 0x910   :  { %6150 = vmatprep.subr.bf16.mxu0 %v8880_v58  ;;  %6182 = vmatprep.subr.bf16.mxu1 %v8881_v62  ;;  %v6186_v63 = vpack.c.bf16 %v4409_v43, %v4408_v34  ;;  %v6565_v58 = vmov 0.0|0.0  }
 0x913   :  { %v6547_v6 = vpop.eup %6546  ;;  %6152 = vmatpush1.bf16.msra.mxu0 %v8882_v31  ;;  %6184 = vmatpush1.bf16.msra.mxu1 %v8883_v8  ;;  %v4410_v8 = vld [vmem:[%s8519_s7 + $0x10] sm:$0xff]  ;;  %v4411_v31 = vld [vmem:[%s8519_s7 + $0x18] sm:$0xff] }
 0x914   :  { %v4095_v3 = vmul.f32 %v6547_v6, %v6545_v33  ;;  %6185 = vmatprep.subr.bf16.mxu0 %v6565_v58  ;;  %v6189_v62 = vpack.c.bf16 %v4411_v31, %v4410_v8 }
 0x916   :  { %4303 = vmatmul.mubr.f32.vlgmr.msra.gmra.mrb[30].mxu0 %v4095_v3  ;;  %4374 = vmatmul.mubr.f32.vlgmr.msra.gmra.mrb[30].mxu1 %v4095_v3 }
 0x917   :  { %6187 = vmatpush3.bf16.msra.mxu0 %v6186_v63  ;;  %4646 = vmatprep.mubr.msk.f32.mxu0 %vm6566_vm2, %v8788_v22 }
 0x918   :  { %6188 = vmatprep.subr.bf16.mxu0 %v6565_v58 }
 0x91b   :  { %6190 = vmatpush3.bf16.msra.mxu0 %v6189_v62 }
 0x91c   :  { %6191 = vmatprep.subr.bf16.mxu0 %v6565_v58 }
 0x91f   :  { %6193 = vmatpush3.bf16.msra.mxu0 %v6192_v25 }
 0x920   :  { %6194 = vmatprep.subr.bf16.mxu0 %v6565_v58 }
 0x923   :  { %6196 = vmatpush3.bf16.msra.mxu0 %v6195_v29 }
 0x924   :  { %6197 = vmatprep.subr.bf16.mxu0 %v6565_v58 }
 0x927   :  { %6199 = vmatpush3.bf16.msra.mxu0 %v6198_v55 }
 0x928   :  { %6200 = vmatprep.subr.bf16.mxu0 %v6565_v58 }
 0x92b   :  { %6202 = vmatpush3.bf16.msra.mxu0 %v6201_v35 }
 0x92c   :  { %6203 = vmatprep.subr.bf16.mxu0 %v6565_v58 }
 0x92f   :  { %6205 = vmatpush3.bf16.msra.mxu0 %v6204_v36 }
 0x930   :  { %6206 = vmatprep.subr.bf16.mxu0 %v6565_v58 }
 0x933   :  { %6208 = vmatpush3.bf16.msra.mxu0 %v6207_v23 }
 0x9e9   :  { %v4304_v24 = vpop.f32.mrb[30].mxu0  ;;  %v4375_v50 = vpop.f32.mrb[30].mxu1 }
 0x9ea   :  { %v4380_v41 = vadd.f32 %v4304_v24, %v9208_v14  ;;  %v4306_v22 = vpop.f32.mrb[31].mxu0  ;;  %v4377_v28 = vpop.f32.mrb[31].mxu1  ;;  %v4382_v38 = vadd.f32 %v4375_v50, %v8972_v26 }
 0x9eb   :  { %v4381_v53 = vadd.f32 %v4306_v22, %v8971_v12  ;;  %v4383_v49 = vadd.f32 %v4377_v28, %v8910_v51 }
 0x9ec   :  { %v4591_v30 = vmul.f32 -1.442695, %v4380_v41 }
 0x9ed   :  { %v4592_v7 = vmul.f32 -1.442695, %v4381_v53  ;;  %v4593_v27 = vmul.f32 -1.442695, %v4383_v49 }
 0x9ee   :  { %6548 = vpow2.f32 %v4591_v30 }
 0x9ef   :  { %6550 = vpow2.f32 %v4592_v7 }
 0x9f0   :  { %6552 = vpow2.f32 %v4593_v27 }
 0x9f1   :  { %6554 = vtanh.f32 %v4382_v38 }
 0x9f8   :  { %v6549_v37 = vpop.eup %6548 }
 0x9f9   :  { %v6551_v10 = vpop.eup %6550  ;;  %v4387_v45 = vadd.f32 1.0, %v6549_v37 }
 0x9fa   :  { %v4393_v40 = vadd.f32 1.0, %v6551_v10  ;;  %v6553_v14 = vpop.eup %6552 }
 0x9fb   :  { %6556 = vrcp.f32 %v4387_v45  ;;  %v6555_v21 = vpop.eup %6554  ;;  %v4400_v20 = vadd.f32 1.0, %v6553_v14 }
 0x9fc   :  { %6558 = vrcp.f32 %v4393_v40 }
 0x9fd   :  { %6560 = vrcp.f32 %v4400_v20 }
 0xa05   :  { %v6557_v12 = vpop.eup %6556 }
 0xa06   :  { %v6559_v52 = vpop.eup %6558  ;;  %v4404_v57 = vmul.f32 %v6557_v12, %v6555_v21 }
 0xa07   :  { %v4403_v54 = vmul.f32 %v6559_v52, %v8406_v32  ;;  %v6561_v26 = vpop.eup %6560  ;;  %v4595_v32 = vld [vmem:[%s8522_s9] ss:$0 sm:$0xff] }
 0xa09   :  { %v4405_v51 = vadd.f32 %v4404_v57, %v4403_v54 }
 0xa0b   :  { %6562 = vtanh.f32 %v4405_v51 }
 0xa15   :  { %v6563_v59 = vpop.eup %6562 }
 0xa16   :  { %v4407_v56 = vmul.f32 %v6563_v59, %v6561_v26 }
 0xa18   :  { %4647 = vmatmul.mubr.f32.vlgmr.msra.gmra.mrb[32].mxu0 %v4407_v56 }
 0xaeb   :  { %v4497_v46 = vpop.f32.mrb[32].mxu0 }
 0xaec   :  { %v4498_v42 = vadd.f32 %v4594_v11, %v4497_v46  ;;  %v4648_v47 = vpop.f32.mrb[33].mxu0 }
 0xaee   :  { %v4501_v2 = vmax.f32 %v4498_v42, 0.0 }
 0xaf0   :  { %v4509_v1 = vmul.f32 %v4595_v32, %v4501_v2 }
 0xaf2   :  { %4510 = vadd.xlane.f32.xlu0 %v4509_v1 }
 0xb7f   :  { %v4511_v61 = vpop.xlane.xlu0 %4510 }
 0xb80   :  { %v4519_v33 = vadd.f32 %v4596_v39, %v4511_v61 }
 0xb82   :  { %4521 = vst.msk [vmem:[%s8523_s11] sm:$0xff] %vm4520_vm3, %v4519_v33 }

</bundles_post_ra>
